<compile_context>
chip_gen: v7x
topology: tpu7x:2x2x1
jax: 0.10.0
libtpu: 0.0.40
codegen_flags: <defaults>
</compile_context>

<pallas_src>
import math
import functools

import jax
import jax.numpy as jnp
from jax.experimental import pallas as pl
from jax.experimental.pallas import tpu as pltpu


# ----------------------------------------------------------------------------
# In-kernel helpers (f32 elementwise math; cast to bf16 only at MXU operands)
# ----------------------------------------------------------------------------
def _layernorm(x, g, b, eps=1e-5):
    mu = jnp.mean(x, axis=-1, keepdims=True)
    var = jnp.mean((x - mu) ** 2, axis=-1, keepdims=True)
    return (x - mu) * jax.lax.rsqrt(var + eps) * g + b


def _gelu(x):
    # tanh-approximate GELU (BERT-pytorch)
    c = math.sqrt(2.0 / math.pi)
    return 0.5 * x * (1.0 + jnp.tanh(c * (x + 0.044715 * x * x * x)))


# ----------------------------------------------------------------------------
# Fused AT forward kernel: one grid step = Bt sequences (Bt*S rows)
# ----------------------------------------------------------------------------
def _at_fused_kernel(x_ref,
                     emb_w_ref, emb_b_ref,
                     ln1_g_ref, ln1_b_ref,
                     wqkv_ref, bqkv_ref,
                     wo_ref, bo_ref,
                     ln2_g_ref, ln2_b_ref,
                     w1_ref, b1_ref, w2_ref, b2_ref,
                     pred_w_ref, pred_b_ref,
                     o_ref, *, heads, seq_len):
    cdt = wqkv_ref.dtype                    # MXU operand dtype (bf16)
    D = wo_ref.shape[1]
    dh = D // heads
    rows = x_ref.shape[0]
    bt = rows // seq_len

    def mxu(a, w):                          # bf16 operands, f32 accumulate
        return jnp.dot(a.astype(cdt), w, preferred_element_type=jnp.float32)

    x = x_ref[...]                          # (rows, Din) f32

    # ---- Embedding ----
    h = mxu(x, emb_w_ref[...]) + emb_b_ref[...]

    # ---- Transformer block (pre-norm), dropout = identity ----
    hn = _layernorm(h, ln1_g_ref[...], ln1_b_ref[...])
    # Fused QKV projection; 1/sqrt(dh) is pre-folded into the Q columns.
    qkv = mxu(hn, wqkv_ref[...]) + bqkv_ref[...]          # (rows, 3D) f32

    proj = None                            # per-head accumulation into out-proj
    for hh in range(heads):                # static unroll over heads
        lo = hh * dh
        seq_outs = []
        for bi in range(bt):               # static unroll over sequences in block
            r0 = bi * seq_len
            qh = qkv[r0:r0 + seq_len, lo:lo + dh].astype(cdt)
            kh = qkv[r0:r0 + seq_len, D + lo:D + lo + dh].astype(cdt)
            vh = qkv[r0:r0 + seq_len, 2 * D + lo:2 * D + lo + dh].astype(cdt)
            # q . k^T without materializing a transpose (contract last dims).
            s = jax.lax.dot_general(qh, kh, (((1,), (1,)), ((), ())),
                                    preferred_element_type=jnp.float32)
            m = jnp.max(s, axis=-1, keepdims=True)
            p = jnp.exp(s - m)
            p = p * pl.reciprocal(jnp.sum(p, axis=-1, keepdims=True), approx=True)
            seq_outs.append(jnp.dot(p.astype(cdt), vh,
                                    preferred_element_type=jnp.float32))
        head_out = seq_outs[0] if bt == 1 else jnp.concatenate(seq_outs, axis=0)
        # dh-row sublane slice of wo; accumulate instead of lane-concatenating.
        contrib = mxu(head_out, wo_ref[lo:lo + dh, :])
        proj = contrib if proj is None else proj + contrib
    h = h + proj + bo_ref[...]

    # Feed-forward sub-layer: fused LN + GELU + residual.
    hn = _layernorm(h, ln2_g_ref[...], ln2_b_ref[...])
    f = _gelu(mxu(hn, w1_ref[...]) + b1_ref[...])
    h = h + mxu(f, w2_ref[...]) + b2_ref[...]

    # ---- Prediction head (lane-padded output) ----
    o_ref[...] = (mxu(h, pred_w_ref[...]) + pred_b_ref[...]).astype(o_ref.dtype)


# ----------------------------------------------------------------------------
# One-time weight preparation (hoisted out of the per-call path)
# ----------------------------------------------------------------------------
def prepare_params(p, compute_dtype=jnp.bfloat16):
    D, H = p["hidden"], p["heads"]
    dh = D // H
    scale = 1.0 / math.sqrt(dh)
    out_dim = p["pred_w"].shape[1]
    out_pad = ((out_dim + 127) // 128) * 128            # 618 -> 640 lane-dense

    wqkv = jnp.concatenate([p["wq"] * scale, p["wk"], p["wv"]], axis=1)
    bqkv = jnp.concatenate([p["bq"] * scale, p["bk"], p["bv"]], axis=0)
    pred_w = jnp.pad(p["pred_w"], ((0, 0), (0, out_pad - out_dim)))
    pred_b = jnp.pad(p["pred_b"], ((0, out_pad - out_dim),))

    row = lambda a: a.reshape(1, -1).astype(jnp.float32)  # biases stay f32
    w = lambda a: a.astype(compute_dtype)                 # matmul weights bf16

    return {
        "hidden": D, "heads": H, "ff": p["w1"].shape[1],
        "out_dim": out_dim, "out_pad": out_pad,
        "emb_w": w(p["emb_w"]), "emb_b": row(p["emb_b"]),
        "ln1_g": row(p["ln1_g"]), "ln1_b": row(p["ln1_b"]),
        "wqkv": w(wqkv), "bqkv": row(bqkv),
        "wo": w(p["wo"]), "bo": row(p["bo"]),
        "ln2_g": row(p["ln2_g"]), "ln2_b": row(p["ln2_b"]),
        "w1": w(p["w1"]), "b1": row(p["b1"]),
        "w2": w(p["w2"]), "b2": row(p["b2"]),
        "pred_w": w(pred_w), "pred_b": row(pred_b),
    }


def _choose_bt(B, S, target_rows=256):
    """Sequences per grid step: aim for M = Bt*S >= target_rows while keeping
    >= 2 grid steps (both v7x TensorCores busy) when the batch allows it."""
    divisors = [bt for bt in range(1, B + 1) if B % bt == 0]
    viable = [bt for bt in divisors if bt * S >= target_rows and B // bt >= 2]
    if viable:
        return min(viable)
    viable = [bt for bt in divisors if B // bt >= 2]
    return max(viable) if viable else B


# ----------------------------------------------------------------------------
# Wrapper
# ----------------------------------------------------------------------------
def _build_and_run(x2d, prep, bt, seq_len, single_buffer_weights):
    BS, Din = x2d.shape
    D, H, FF = prep["hidden"], prep["heads"], prep["ff"]
    dh = D // H
    out_pad = prep["out_pad"]
    rows = bt * seq_len
    nsteps = BS // rows
    B_total = BS // seq_len

    weights = (prep["emb_w"], prep["emb_b"],
               prep["ln1_g"], prep["ln1_b"],
               prep["wqkv"], prep["bqkv"],
               prep["wo"], prep["bo"],
               prep["ln2_g"], prep["ln2_b"],
               prep["w1"], prep["b1"], prep["w2"], prep["b2"],
               prep["pred_w"], prep["pred_b"])

    if single_buffer_weights:
        def wspec(shape):
            # Constant index_map -> never re-fetched; single-buffer to halve
            # resident-weight VMEM (decisive on v7x's 64 MiB).
            return pl.BlockSpec(shape, lambda b: (0, 0),
                                pipeline_mode=pl.Buffered(1))
    else:
        def wspec(shape):
            return pl.BlockSpec(shape, lambda b: (0, 0))

    # Explicit VMEM budget: resident weights + double-buffered x/out blocks
    # + rough live-intermediate estimate, with 2x headroom.
    weight_bytes = sum(int(a.size) * a.dtype.itemsize for a in weights)
    io_bytes = 2 * rows * (Din + out_pad) * 4
    live_bytes = rows * (6 * D + 2 * FF + out_pad) * 4
    vmem_limit = int(min(max(2 * (weight_bytes + io_bytes + live_bytes),
                             32 * 2 ** 20), 96 * 2 ** 20))

    flops = (2 * BS * (Din * D + D * 3 * D + D * D + 2 * D * FF + D * out_pad)
             + 4 * B_total * H * seq_len * seq_len * dh)
    transcendentals = B_total * (H * seq_len * seq_len + seq_len * FF + H * seq_len)
    bytes_accessed = (4 * x2d.size + weight_bytes + 4 * BS * out_pad)

    return pl.pallas_call(
        functools.partial(_at_fused_kernel, heads=H, seq_len=seq_len),
        out_shape=jax.ShapeDtypeStruct((BS, out_pad), jnp.float32),
        grid=(nsteps,),
        in_specs=[pl.BlockSpec((rows, Din), lambda b: (b, 0))]
                 + [wspec(a.shape) for a in weights],
        out_specs=pl.BlockSpec((rows, out_pad), lambda b: (b, 0)),
        compiler_params=pltpu.CompilerParams(
            dimension_semantics=("parallel",),
            vmem_limit_bytes=vmem_limit),
        cost_estimate=pl.CostEstimate(flops=flops,
                                      transcendentals=transcendentals,
                                      bytes_accessed=bytes_accessed),
    )(x2d, *weights)


def at_forward(x, prep, *, target_rows=256):
    B, S, Din = x.shape
    bt = _choose_bt(B, S, target_rows)
    x2d = x.reshape(B * S, Din)
    try:
        out = _build_and_run(x2d, prep, bt, S, single_buffer_weights=True)
        out = jax.block_until_ready(out)
    except Exception:
        # pipeline_mode=pl.Buffered(1) not supported by this jax build/path:
        # fall back to default (double-buffered) weight specs.
        out = _build_and_run(x2d, prep, bt, S, single_buffer_weights=False)
    return out.reshape(B, S, prep["out_pad"])[..., :prep["out_dim"]]


# ----------------------------------------------------------------------------
# Pure-JAX reference (for correctness check)
# ----------------------------------------------------------------------------
def at_forward_ref(x, p):
    B, S, Din = x.shape
    H, D = p["heads"], p["hidden"]
    dh = D // H

    def ln(t, g, b):
        mu = jnp.mean(t, -1, keepdims=True)
        var = jnp.mean((t - mu) ** 2, -1, keepdims=True)
        return (t - mu) * jax.lax.rsqrt(var + 1e-5) * g + b

    def gelu(t):
        c = math.sqrt(2.0 / math.pi)
        return 0.5 * t * (1.0 + jnp.tanh(c * (t + 0.044715 * t ** 3)))

    h = x @ p["emb_w"] + p["emb_b"]
    hn = ln(h, p["ln1_g"], p["ln1_b"])
    q = (hn @ p["wq"] + p["bq"]).reshape(B, S, H, dh).transpose(0, 2, 1, 3)
    k = (hn @ p["wk"] + p["bk"]).reshape(B, S, H, dh).transpose(0, 2, 1, 3)
    v = (hn @ p["wv"] + p["bv"]).reshape(B, S, H, dh).transpose(0, 2, 1, 3)
    s = jnp.einsum("bhqd,bhkd->bhqk", q, k) / math.sqrt(dh)
    a = jax.nn.softmax(s, axis=-1)
    o = jnp.einsum("bhqk,bhkd->bhqd", a, v).transpose(0, 2, 1, 3).reshape(B, S, D)
    h = h + (o @ p["wo"] + p["bo"])
    hn = ln(h, p["ln2_g"], p["ln2_b"])
    h = h + (gelu(hn @ p["w1"] + p["b1"]) @ p["w2"] + p["b2"])
    return h @ p["pred_w"] + p["pred_b"]


# ----------------------------------------------------------------------------
def make_params(key, feat_in, hidden, heads, ff, out_dim):
    keys = jax.random.split(key, 10)
    def w(k, shape):
        return (0.02 * jax.random.normal(k, shape)).astype(jnp.float32)
    z = lambda n: jnp.zeros((n,), jnp.float32)
    return {
        "hidden": hidden, "heads": heads,
        "emb_w": w(keys[0], (feat_in, hidden)), "emb_b": z(hidden),
        "wq": w(keys[1], (hidden, hidden)), "bq": z(hidden),
        "wk": w(keys[2], (hidden, hidden)), "bk": z(hidden),
        "wv": w(keys[3], (hidden, hidden)), "bv": z(hidden),
        "wo": w(keys[4], (hidden, hidden)), "bo": z(hidden),
        "ln1_g": jnp.ones((hidden,), jnp.float32), "ln1_b": z(hidden),
        "ln2_g": jnp.ones((hidden,), jnp.float32), "ln2_b": z(hidden),
        "w1": w(keys[5], (hidden, ff)), "b1": z(ff),
        "w2": w(keys[6], (ff, hidden)), "b2": z(hidden),
        "pred_w": w(keys[7], (hidden, out_dim)), "pred_b": z(out_dim),
    }


if __name__ == "__main__":
    # Small shapes consistent with the module (hidden, 1 transformer block,
    # multi-head attention, 618-way prediction head).
    B, S, FEAT_IN = 2, 8, 16
    HIDDEN, HEADS, OUT_DIM = 32, 4, 618
    FF = HIDDEN * 4

    key = jax.random.PRNGKey(0)
    kx, kp = jax.random.split(key)
    x = jax.random.normal(kx, (B, S, FEAT_IN), dtype=jnp.float32)
    raw = make_params(kp, FEAT_IN, HIDDEN, HEADS, FF, OUT_DIM)

    prep = prepare_params(raw)              # one-time weight prep (hoisted)

    y = at_forward(x, prep)
    jax.block_until_ready(y)

    y_ref = at_forward_ref(x, raw)
    assert y.shape == (B, S, OUT_DIM), y.shape
    # bf16 MXU operands + approx reciprocal softmax -> looser-than-f32 tolerance
    err = float(jnp.max(jnp.abs(y - y_ref)))
    assert jnp.allclose(y, y_ref, atol=5e-3, rtol=1e-2), err

    print("KERNEL_OK")
</pallas_src>

<mosaic_0001>
module attributes {stable_mosaic.version = 11 : i64} {
  func.func @_at_fused_kernel(%arg0: i32, %arg1: memref<8x16xf32, #tpu.memory_space<vmem>>, %arg2: memref<16x32xbf16, #tpu.memory_space<vmem>>, %arg3: memref<1x32xf32, #tpu.memory_space<vmem>>, %arg4: memref<1x32xf32, #tpu.memory_space<vmem>>, %arg5: memref<1x32xf32, #tpu.memory_space<vmem>>, %arg6: memref<32x96xbf16, #tpu.memory_space<vmem>>, %arg7: memref<1x96xf32, #tpu.memory_space<vmem>>, %arg8: memref<32x32xbf16, #tpu.memory_space<vmem>>, %arg9: memref<1x32xf32, #tpu.memory_space<vmem>>, %arg10: memref<1x32xf32, #tpu.memory_space<vmem>>, %arg11: memref<1x32xf32, #tpu.memory_space<vmem>>, %arg12: memref<32x128xbf16, #tpu.memory_space<vmem>>, %arg13: memref<1x128xf32, #tpu.memory_space<vmem>>, %arg14: memref<128x32xbf16, #tpu.memory_space<vmem>>, %arg15: memref<1x32xf32, #tpu.memory_space<vmem>>, %arg16: memref<32x640xbf16, #tpu.memory_space<vmem>>, %arg17: memref<1x640xf32, #tpu.memory_space<vmem>>, %arg18: memref<8x640xf32, #tpu.memory_space<vmem>>) attributes {dimension_semantics = [#tpu.dimension_semantics<parallel>], iteration_bounds = array<i64: 2>, scalar_prefetch = 0 : i64, scratch_operands = 0 : i64, tpu.core_type = #tpu.core_type<tc>, window_params = [{transform_indices = @transform_0, window_bounds = array<i64: 8, 16>}, {pipeline_mode = #tpu.pipeline_mode<synchronous>, transform_indices = @transform_1, window_bounds = array<i64: 16, 32>}, {pipeline_mode = #tpu.pipeline_mode<synchronous>, transform_indices = @transform_2, window_bounds = array<i64: 1, 32>}, {pipeline_mode = #tpu.pipeline_mode<synchronous>, transform_indices = @transform_3, window_bounds = array<i64: 1, 32>}, {pipeline_mode = #tpu.pipeline_mode<synchronous>, transform_indices = @transform_4, window_bounds = array<i64: 1, 32>}, {pipeline_mode = #tpu.pipeline_mode<synchronous>, transform_indices = @transform_5, window_bounds = array<i64: 32, 96>}, {pipeline_mode = #tpu.pipeline_mode<synchronous>, transform_indices = @transform_6, window_bounds = array<i64: 1, 96>}, {pipeline_mode = #tpu.pipeline_mode<synchronous>, transform_indices = @transform_7, window_bounds = array<i64: 32, 32>}, {pipeline_mode = #tpu.pipeline_mode<synchronous>, transform_indices = @transform_8, window_bounds = array<i64: 1, 32>}, {pipeline_mode = #tpu.pipeline_mode<synchronous>, transform_indices = @transform_9, window_bounds = array<i64: 1, 32>}, {pipeline_mode = #tpu.pipeline_mode<synchronous>, transform_indices = @transform_10, window_bounds = array<i64: 1, 32>}, {pipeline_mode = #tpu.pipeline_mode<synchronous>, transform_indices = @transform_11, window_bounds = array<i64: 32, 128>}, {pipeline_mode = #tpu.pipeline_mode<synchronous>, transform_indices = @transform_12, window_bounds = array<i64: 1, 128>}, {pipeline_mode = #tpu.pipeline_mode<synchronous>, transform_indices = @transform_13, window_bounds = array<i64: 128, 32>}, {pipeline_mode = #tpu.pipeline_mode<synchronous>, transform_indices = @transform_14, window_bounds = array<i64: 1, 32>}, {pipeline_mode = #tpu.pipeline_mode<synchronous>, transform_indices = @transform_15, window_bounds = array<i64: 32, 640>}, {pipeline_mode = #tpu.pipeline_mode<synchronous>, transform_indices = @transform_16, window_bounds = array<i64: 1, 640>}, {transform_indices = @transform_17, window_bounds = array<i64: 8, 640>}]} {
    %c0 = arith.constant 0 : index
    %c0_0 = arith.constant 0 : index
    %0 = vector.load %arg1[%c0, %c0_0] : memref<8x16xf32, #tpu.memory_space<vmem>>, vector<8x16xf32>
    %c0_1 = arith.constant 0 : index
    %c0_2 = arith.constant 0 : index
    %1 = vector.load %arg2[%c0_1, %c0_2] : memref<16x32xbf16, #tpu.memory_space<vmem>>, vector<16x32xbf16>
    %2 = arith.truncf %0 : vector<8x16xf32> to vector<8x16xbf16>
    %cst = arith.constant dense<0.000000e+00> : vector<8x32xf32>
    %3 = tpu.matmul %2, %1, %cst {dimension_numbers = #tpu.dot_dimension_numbers<[1], [0], [0], [1], [0, 0, 1, 1], [], []>} : vector<8x16xbf16>, vector<16x32xbf16>, vector<8x32xf32> -> vector<8x32xf32>
    %c0_3 = arith.constant 0 : index
    %c0_4 = arith.constant 0 : index
    %4 = vector.load %arg3[%c0_3, %c0_4] : memref<1x32xf32, #tpu.memory_space<vmem>>, vector<1x32xf32>
    %5 = vector.broadcast %4 : vector<1x32xf32> to vector<8x32xf32>
    %6 = arith.addf %3, %5 : vector<8x32xf32>
    %c0_5 = arith.constant 0 : index
    %c0_6 = arith.constant 0 : index
    %7 = vector.load %arg4[%c0_5, %c0_6] : memref<1x32xf32, #tpu.memory_space<vmem>>, vector<1x32xf32>
    %c0_7 = arith.constant 0 : index
    %c0_8 = arith.constant 0 : index
    %8 = vector.load %arg5[%c0_7, %c0_8] : memref<1x32xf32, #tpu.memory_space<vmem>>, vector<1x32xf32>
    %cst_9 = arith.constant dense<0.000000e+00> : vector<8xf32>
    %9 = vector.multi_reduction <add>, %6, %cst_9 [1] : vector<8x32xf32> to vector<8xf32>
    %10 = vector.shape_cast %9 : vector<8xf32> to vector<8x1xf32>
    %cst_10 = arith.constant 3.200000e+01 : f32
    %11 = vector.broadcast %cst_10 : f32 to vector<8x1xf32>
    %12 = arith.divf %10, %11 : vector<8x1xf32>
    %13 = vector.broadcast %12 : vector<8x1xf32> to vector<8x32xf32>
    %14 = arith.subf %6, %13 : vector<8x32xf32>
    %15 = arith.mulf %14, %14 : vector<8x32xf32>
    %cst_11 = arith.constant dense<0.000000e+00> : vector<8xf32>
    %16 = vector.multi_reduction <add>, %15, %cst_11 [1] : vector<8x32xf32> to vector<8xf32>
    %17 = vector.shape_cast %16 : vector<8xf32> to vector<8x1xf32>
    %cst_12 = arith.constant 3.200000e+01 : f32
    %18 = vector.broadcast %cst_12 : f32 to vector<8x1xf32>
    %19 = arith.divf %17, %18 : vector<8x1xf32>
    %20 = vector.broadcast %12 : vector<8x1xf32> to vector<8x32xf32>
    %21 = arith.subf %6, %20 : vector<8x32xf32>
    %cst_13 = arith.constant 9.99999974E-6 : f32
    %22 = vector.broadcast %cst_13 : f32 to vector<8x1xf32>
    %23 = arith.addf %19, %22 : vector<8x1xf32>
    %24 = math.rsqrt %23 : vector<8x1xf32>
    %25 = vector.broadcast %24 : vector<8x1xf32> to vector<8x32xf32>
    %26 = arith.mulf %21, %25 : vector<8x32xf32>
    %27 = vector.broadcast %7 : vector<1x32xf32> to vector<8x32xf32>
    %28 = arith.mulf %26, %27 : vector<8x32xf32>
    %29 = vector.broadcast %8 : vector<1x32xf32> to vector<8x32xf32>
    %30 = arith.addf %28, %29 : vector<8x32xf32>
    %c0_14 = arith.constant 0 : index
    %c0_15 = arith.constant 0 : index
    %31 = vector.load %arg6[%c0_14, %c0_15] : memref<32x96xbf16, #tpu.memory_space<vmem>>, vector<32x96xbf16>
    %32 = arith.truncf %30 : vector<8x32xf32> to vector<8x32xbf16>
    %cst_16 = arith.constant dense<0.000000e+00> : vector<8x96xf32>
    %33 = tpu.matmul %32, %31, %cst_16 {dimension_numbers = #tpu.dot_dimension_numbers<[1], [0], [0], [1], [0, 0, 1, 1], [], []>} : vector<8x32xbf16>, vector<32x96xbf16>, vector<8x96xf32> -> vector<8x96xf32>
    %c0_17 = arith.constant 0 : index
    %c0_18 = arith.constant 0 : index
    %34 = vector.load %arg7[%c0_17, %c0_18] : memref<1x96xf32, #tpu.memory_space<vmem>>, vector<1x96xf32>
    %35 = vector.broadcast %34 : vector<1x96xf32> to vector<8x96xf32>
    %36 = arith.addf %33, %35 : vector<8x96xf32>
    %37 = vector.extract_strided_slice %36 {offsets = [0, 0], sizes = [8, 8], strides = [1, 1]} : vector<8x96xf32> to vector<8x8xf32>
    %38 = arith.truncf %37 : vector<8x8xf32> to vector<8x8xbf16>
    %39 = vector.extract_strided_slice %36 {offsets = [0, 32], sizes = [8, 8], strides = [1, 1]} : vector<8x96xf32> to vector<8x8xf32>
    %40 = arith.truncf %39 : vector<8x8xf32> to vector<8x8xbf16>
    %41 = vector.extract_strided_slice %36 {offsets = [0, 64], sizes = [8, 8], strides = [1, 1]} : vector<8x96xf32> to vector<8x8xf32>
    %42 = arith.truncf %41 : vector<8x8xf32> to vector<8x8xbf16>
    %cst_19 = arith.constant dense<0.000000e+00> : vector<8x8xf32>
    %43 = tpu.matmul %38, %40, %cst_19 {dimension_numbers = #tpu.dot_dimension_numbers<[1], [1], [0], [0], [0, 0, 1, 0], [], []>} : vector<8x8xbf16>, vector<8x8xbf16>, vector<8x8xf32> -> vector<8x8xf32>
    %cst_20 = arith.constant dense<0xFF800000> : vector<8xf32>
    %44 = vector.multi_reduction <maximumf>, %43, %cst_20 [1] : vector<8x8xf32> to vector<8xf32>
    %45 = vector.shape_cast %44 : vector<8xf32> to vector<8x1xf32>
    %46 = vector.broadcast %45 : vector<8x1xf32> to vector<8x8xf32>
    %47 = arith.subf %43, %46 : vector<8x8xf32>
    %48 = math.exp %47 : vector<8x8xf32>
    %cst_21 = arith.constant dense<0.000000e+00> : vector<8xf32>
    %49 = vector.multi_reduction <add>, %48, %cst_21 [1] : vector<8x8xf32> to vector<8xf32>
    %50 = vector.shape_cast %49 : vector<8xf32> to vector<8x1xf32>
    %51 = tpu.reciprocal %50 {approx = true} : vector<8x1xf32> -> vector<8x1xf32>
    %52 = vector.broadcast %51 : vector<8x1xf32> to vector<8x8xf32>
    %53 = arith.mulf %48, %52 : vector<8x8xf32>
    %54 = arith.truncf %53 : vector<8x8xf32> to vector<8x8xbf16>
    %cst_22 = arith.constant dense<0.000000e+00> : vector<8x8xf32>
    %55 = tpu.matmul %54, %42, %cst_22 {dimension_numbers = #tpu.dot_dimension_numbers<[1], [0], [0], [1], [0, 0, 1, 1], [], []>} : vector<8x8xbf16>, vector<8x8xbf16>, vector<8x8xf32> -> vector<8x8xf32>
    %c0_23 = arith.constant 0 : index
    %c0_24 = arith.constant 0 : index
    %56 = vector.load %arg8[%c0_23, %c0_24] : memref<32x32xbf16, #tpu.memory_space<vmem>>, vector<8x32xbf16>
    %57 = arith.truncf %55 : vector<8x8xf32> to vector<8x8xbf16>
    %cst_25 = arith.constant dense<0.000000e+00> : vector<8x32xf32>
    %58 = tpu.matmul %57, %56, %cst_25 {dimension_numbers = #tpu.dot_dimension_numbers<[1], [0], [0], [1], [0, 0, 1, 1], [], []>} : vector<8x8xbf16>, vector<8x32xbf16>, vector<8x32xf32> -> vector<8x32xf32>
    %59 = vector.extract_strided_slice %36 {offsets = [0, 8], sizes = [8, 8], strides = [1, 1]} : vector<8x96xf32> to vector<8x8xf32>
    %60 = arith.truncf %59 : vector<8x8xf32> to vector<8x8xbf16>
    %61 = vector.extract_strided_slice %36 {offsets = [0, 40], sizes = [8, 8], strides = [1, 1]} : vector<8x96xf32> to vector<8x8xf32>
    %62 = arith.truncf %61 : vector<8x8xf32> to vector<8x8xbf16>
    %63 = vector.extract_strided_slice %36 {offsets = [0, 72], sizes = [8, 8], strides = [1, 1]} : vector<8x96xf32> to vector<8x8xf32>
    %64 = arith.truncf %63 : vector<8x8xf32> to vector<8x8xbf16>
    %cst_26 = arith.constant dense<0.000000e+00> : vector<8x8xf32>
    %65 = tpu.matmul %60, %62, %cst_26 {dimension_numbers = #tpu.dot_dimension_numbers<[1], [1], [0], [0], [0, 0, 1, 0], [], []>} : vector<8x8xbf16>, vector<8x8xbf16>, vector<8x8xf32> -> vector<8x8xf32>
    %cst_27 = arith.constant dense<0xFF800000> : vector<8xf32>
    %66 = vector.multi_reduction <maximumf>, %65, %cst_27 [1] : vector<8x8xf32> to vector<8xf32>
    %67 = vector.shape_cast %66 : vector<8xf32> to vector<8x1xf32>
    %68 = vector.broadcast %67 : vector<8x1xf32> to vector<8x8xf32>
    %69 = arith.subf %65, %68 : vector<8x8xf32>
    %70 = math.exp %69 : vector<8x8xf32>
    %cst_28 = arith.constant dense<0.000000e+00> : vector<8xf32>
    %71 = vector.multi_reduction <add>, %70, %cst_28 [1] : vector<8x8xf32> to vector<8xf32>
    %72 = vector.shape_cast %71 : vector<8xf32> to vector<8x1xf32>
    %73 = tpu.reciprocal %72 {approx = true} : vector<8x1xf32> -> vector<8x1xf32>
    %74 = vector.broadcast %73 : vector<8x1xf32> to vector<8x8xf32>
    %75 = arith.mulf %70, %74 : vector<8x8xf32>
    %76 = arith.truncf %75 : vector<8x8xf32> to vector<8x8xbf16>
    %cst_29 = arith.constant dense<0.000000e+00> : vector<8x8xf32>
    %77 = tpu.matmul %76, %64, %cst_29 {dimension_numbers = #tpu.dot_dimension_numbers<[1], [0], [0], [1], [0, 0, 1, 1], [], []>} : vector<8x8xbf16>, vector<8x8xbf16>, vector<8x8xf32> -> vector<8x8xf32>
    %c8 = arith.constant 8 : index
    %c0_30 = arith.constant 0 : index
    %78 = vector.load %arg8[%c8, %c0_30] : memref<32x32xbf16, #tpu.memory_space<vmem>>, vector<8x32xbf16>
    %79 = arith.truncf %77 : vector<8x8xf32> to vector<8x8xbf16>
    %cst_31 = arith.constant dense<0.000000e+00> : vector<8x32xf32>
    %80 = tpu.matmul %79, %78, %cst_31 {dimension_numbers = #tpu.dot_dimension_numbers<[1], [0], [0], [1], [0, 0, 1, 1], [], []>} : vector<8x8xbf16>, vector<8x32xbf16>, vector<8x32xf32> -> vector<8x32xf32>
    %81 = arith.addf %58, %80 : vector<8x32xf32>
    %82 = vector.extract_strided_slice %36 {offsets = [0, 16], sizes = [8, 8], strides = [1, 1]} : vector<8x96xf32> to vector<8x8xf32>
    %83 = arith.truncf %82 : vector<8x8xf32> to vector<8x8xbf16>
    %84 = vector.extract_strided_slice %36 {offsets = [0, 48], sizes = [8, 8], strides = [1, 1]} : vector<8x96xf32> to vector<8x8xf32>
    %85 = arith.truncf %84 : vector<8x8xf32> to vector<8x8xbf16>
    %86 = vector.extract_strided_slice %36 {offsets = [0, 80], sizes = [8, 8], strides = [1, 1]} : vector<8x96xf32> to vector<8x8xf32>
    %87 = arith.truncf %86 : vector<8x8xf32> to vector<8x8xbf16>
    %cst_32 = arith.constant dense<0.000000e+00> : vector<8x8xf32>
    %88 = tpu.matmul %83, %85, %cst_32 {dimension_numbers = #tpu.dot_dimension_numbers<[1], [1], [0], [0], [0, 0, 1, 0], [], []>} : vector<8x8xbf16>, vector<8x8xbf16>, vector<8x8xf32> -> vector<8x8xf32>
    %cst_33 = arith.constant dense<0xFF800000> : vector<8xf32>
    %89 = vector.multi_reduction <maximumf>, %88, %cst_33 [1] : vector<8x8xf32> to vector<8xf32>
    %90 = vector.shape_cast %89 : vector<8xf32> to vector<8x1xf32>
    %91 = vector.broadcast %90 : vector<8x1xf32> to vector<8x8xf32>
    %92 = arith.subf %88, %91 : vector<8x8xf32>
    %93 = math.exp %92 : vector<8x8xf32>
    %cst_34 = arith.constant dense<0.000000e+00> : vector<8xf32>
    %94 = vector.multi_reduction <add>, %93, %cst_34 [1] : vector<8x8xf32> to vector<8xf32>
    %95 = vector.shape_cast %94 : vector<8xf32> to vector<8x1xf32>
    %96 = tpu.reciprocal %95 {approx = true} : vector<8x1xf32> -> vector<8x1xf32>
    %97 = vector.broadcast %96 : vector<8x1xf32> to vector<8x8xf32>
    %98 = arith.mulf %93, %97 : vector<8x8xf32>
    %99 = arith.truncf %98 : vector<8x8xf32> to vector<8x8xbf16>
    %cst_35 = arith.constant dense<0.000000e+00> : vector<8x8xf32>
    %100 = tpu.matmul %99, %87, %cst_35 {dimension_numbers = #tpu.dot_dimension_numbers<[1], [0], [0], [1], [0, 0, 1, 1], [], []>} : vector<8x8xbf16>, vector<8x8xbf16>, vector<8x8xf32> -> vector<8x8xf32>
    %c16 = arith.constant 16 : index
    %c0_36 = arith.constant 0 : index
    %101 = vector.load %arg8[%c16, %c0_36] : memref<32x32xbf16, #tpu.memory_space<vmem>>, vector<8x32xbf16>
    %102 = arith.truncf %100 : vector<8x8xf32> to vector<8x8xbf16>
    %cst_37 = arith.constant dense<0.000000e+00> : vector<8x32xf32>
    %103 = tpu.matmul %102, %101, %cst_37 {dimension_numbers = #tpu.dot_dimension_numbers<[1], [0], [0], [1], [0, 0, 1, 1], [], []>} : vector<8x8xbf16>, vector<8x32xbf16>, vector<8x32xf32> -> vector<8x32xf32>
    %104 = arith.addf %81, %103 : vector<8x32xf32>
    %105 = vector.extract_strided_slice %36 {offsets = [0, 24], sizes = [8, 8], strides = [1, 1]} : vector<8x96xf32> to vector<8x8xf32>
    %106 = arith.truncf %105 : vector<8x8xf32> to vector<8x8xbf16>
    %107 = vector.extract_strided_slice %36 {offsets = [0, 56], sizes = [8, 8], strides = [1, 1]} : vector<8x96xf32> to vector<8x8xf32>
    %108 = arith.truncf %107 : vector<8x8xf32> to vector<8x8xbf16>
    %109 = vector.extract_strided_slice %36 {offsets = [0, 88], sizes = [8, 8], strides = [1, 1]} : vector<8x96xf32> to vector<8x8xf32>
    %110 = arith.truncf %109 : vector<8x8xf32> to vector<8x8xbf16>
    %cst_38 = arith.constant dense<0.000000e+00> : vector<8x8xf32>
    %111 = tpu.matmul %106, %108, %cst_38 {dimension_numbers = #tpu.dot_dimension_numbers<[1], [1], [0], [0], [0, 0, 1, 0], [], []>} : vector<8x8xbf16>, vector<8x8xbf16>, vector<8x8xf32> -> vector<8x8xf32>
    %cst_39 = arith.constant dense<0xFF800000> : vector<8xf32>
    %112 = vector.multi_reduction <maximumf>, %111, %cst_39 [1] : vector<8x8xf32> to vector<8xf32>
    %113 = vector.shape_cast %112 : vector<8xf32> to vector<8x1xf32>
    %114 = vector.broadcast %113 : vector<8x1xf32> to vector<8x8xf32>
    %115 = arith.subf %111, %114 : vector<8x8xf32>
    %116 = math.exp %115 : vector<8x8xf32>
    %cst_40 = arith.constant dense<0.000000e+00> : vector<8xf32>
    %117 = vector.multi_reduction <add>, %116, %cst_40 [1] : vector<8x8xf32> to vector<8xf32>
    %118 = vector.shape_cast %117 : vector<8xf32> to vector<8x1xf32>
    %119 = tpu.reciprocal %118 {approx = true} : vector<8x1xf32> -> vector<8x1xf32>
    %120 = vector.broadcast %119 : vector<8x1xf32> to vector<8x8xf32>
    %121 = arith.mulf %116, %120 : vector<8x8xf32>
    %122 = arith.truncf %121 : vector<8x8xf32> to vector<8x8xbf16>
    %cst_41 = arith.constant dense<0.000000e+00> : vector<8x8xf32>
    %123 = tpu.matmul %122, %110, %cst_41 {dimension_numbers = #tpu.dot_dimension_numbers<[1], [0], [0], [1], [0, 0, 1, 1], [], []>} : vector<8x8xbf16>, vector<8x8xbf16>, vector<8x8xf32> -> vector<8x8xf32>
    %c24 = arith.constant 24 : index
    %c0_42 = arith.constant 0 : index
    %124 = vector.load %arg8[%c24, %c0_42] : memref<32x32xbf16, #tpu.memory_space<vmem>>, vector<8x32xbf16>
    %125 = arith.truncf %123 : vector<8x8xf32> to vector<8x8xbf16>
    %cst_43 = arith.constant dense<0.000000e+00> : vector<8x32xf32>
    %126 = tpu.matmul %125, %124, %cst_43 {dimension_numbers = #tpu.dot_dimension_numbers<[1], [0], [0], [1], [0, 0, 1, 1], [], []>} : vector<8x8xbf16>, vector<8x32xbf16>, vector<8x32xf32> -> vector<8x32xf32>
    %127 = arith.addf %104, %126 : vector<8x32xf32>
    %128 = arith.addf %6, %127 : vector<8x32xf32>
    %c0_44 = arith.constant 0 : index
    %c0_45 = arith.constant 0 : index
    %129 = vector.load %arg9[%c0_44, %c0_45] : memref<1x32xf32, #tpu.memory_space<vmem>>, vector<1x32xf32>
    %130 = vector.broadcast %129 : vector<1x32xf32> to vector<8x32xf32>
    %131 = arith.addf %128, %130 : vector<8x32xf32>
    %c0_46 = arith.constant 0 : index
    %c0_47 = arith.constant 0 : index
    %132 = vector.load %arg10[%c0_46, %c0_47] : memref<1x32xf32, #tpu.memory_space<vmem>>, vector<1x32xf32>
    %c0_48 = arith.constant 0 : index
    %c0_49 = arith.constant 0 : index
    %133 = vector.load %arg11[%c0_48, %c0_49] : memref<1x32xf32, #tpu.memory_space<vmem>>, vector<1x32xf32>
    %cst_50 = arith.constant dense<0.000000e+00> : vector<8xf32>
    %134 = vector.multi_reduction <add>, %131, %cst_50 [1] : vector<8x32xf32> to vector<8xf32>
    %135 = vector.shape_cast %134 : vector<8xf32> to vector<8x1xf32>
    %cst_51 = arith.constant 3.200000e+01 : f32
    %136 = vector.broadcast %cst_51 : f32 to vector<8x1xf32>
    %137 = arith.divf %135, %136 : vector<8x1xf32>
    %138 = vector.broadcast %137 : vector<8x1xf32> to vector<8x32xf32>
    %139 = arith.subf %131, %138 : vector<8x32xf32>
    %140 = arith.mulf %139, %139 : vector<8x32xf32>
    %cst_52 = arith.constant dense<0.000000e+00> : vector<8xf32>
    %141 = vector.multi_reduction <add>, %140, %cst_52 [1] : vector<8x32xf32> to vector<8xf32>
    %142 = vector.shape_cast %141 : vector<8xf32> to vector<8x1xf32>
    %cst_53 = arith.constant 3.200000e+01 : f32
    %143 = vector.broadcast %cst_53 : f32 to vector<8x1xf32>
    %144 = arith.divf %142, %143 : vector<8x1xf32>
    %145 = vector.broadcast %137 : vector<8x1xf32> to vector<8x32xf32>
    %146 = arith.subf %131, %145 : vector<8x32xf32>
    %cst_54 = arith.constant 9.99999974E-6 : f32
    %147 = vector.broadcast %cst_54 : f32 to vector<8x1xf32>
    %148 = arith.addf %144, %147 : vector<8x1xf32>
    %149 = math.rsqrt %148 : vector<8x1xf32>
    %150 = vector.broadcast %149 : vector<8x1xf32> to vector<8x32xf32>
    %151 = arith.mulf %146, %150 : vector<8x32xf32>
    %152 = vector.broadcast %132 : vector<1x32xf32> to vector<8x32xf32>
    %153 = arith.mulf %151, %152 : vector<8x32xf32>
    %154 = vector.broadcast %133 : vector<1x32xf32> to vector<8x32xf32>
    %155 = arith.addf %153, %154 : vector<8x32xf32>
    %c0_55 = arith.constant 0 : index
    %c0_56 = arith.constant 0 : index
    %156 = vector.load %arg12[%c0_55, %c0_56] : memref<32x128xbf16, #tpu.memory_space<vmem>>, vector<32x128xbf16>
    %157 = arith.truncf %155 : vector<8x32xf32> to vector<8x32xbf16>
    %cst_57 = arith.constant dense<0.000000e+00> : vector<8x128xf32>
    %158 = tpu.matmul %157, %156, %cst_57 {dimension_numbers = #tpu.dot_dimension_numbers<[1], [0], [0], [1], [0, 0, 1, 1], [], []>} : vector<8x32xbf16>, vector<32x128xbf16>, vector<8x128xf32> -> vector<8x128xf32>
    %c0_58 = arith.constant 0 : index
    %c0_59 = arith.constant 0 : index
    %159 = vector.load %arg13[%c0_58, %c0_59] : memref<1x128xf32, #tpu.memory_space<vmem>>, vector<1x128xf32>
    %160 = vector.broadcast %159 : vector<1x128xf32> to vector<8x128xf32>
    %161 = arith.addf %158, %160 : vector<8x128xf32>
    %cst_60 = arith.constant 5.000000e-01 : f32
    %162 = vector.broadcast %cst_60 : f32 to vector<8x128xf32>
    %163 = arith.mulf %162, %161 : vector<8x128xf32>
    %cst_61 = arith.constant 4.471500e-02 : f32
    %164 = vector.broadcast %cst_61 : f32 to vector<8x128xf32>
    %165 = arith.mulf %164, %161 : vector<8x128xf32>
    %166 = arith.mulf %165, %161 : vector<8x128xf32>
    %167 = arith.mulf %166, %161 : vector<8x128xf32>
    %168 = arith.addf %161, %167 : vector<8x128xf32>
    %cst_62 = arith.constant 0.797884583 : f32
    %169 = vector.broadcast %cst_62 : f32 to vector<8x128xf32>
    %170 = arith.mulf %169, %168 : vector<8x128xf32>
    %171 = math.tanh %170 : vector<8x128xf32>
    %cst_63 = arith.constant 1.000000e+00 : f32
    %172 = vector.broadcast %cst_63 : f32 to vector<8x128xf32>
    %173 = arith.addf %172, %171 : vector<8x128xf32>
    %174 = arith.mulf %163, %173 : vector<8x128xf32>
    %c0_64 = arith.constant 0 : index
    %c0_65 = arith.constant 0 : index
    %175 = vector.load %arg14[%c0_64, %c0_65] : memref<128x32xbf16, #tpu.memory_space<vmem>>, vector<128x32xbf16>
    %176 = arith.truncf %174 : vector<8x128xf32> to vector<8x128xbf16>
    %cst_66 = arith.constant dense<0.000000e+00> : vector<8x32xf32>
    %177 = tpu.matmul %176, %175, %cst_66 {dimension_numbers = #tpu.dot_dimension_numbers<[1], [0], [0], [1], [0, 0, 1, 1], [], []>} : vector<8x128xbf16>, vector<128x32xbf16>, vector<8x32xf32> -> vector<8x32xf32>
    %178 = arith.addf %131, %177 : vector<8x32xf32>
    %c0_67 = arith.constant 0 : index
    %c0_68 = arith.constant 0 : index
    %179 = vector.load %arg15[%c0_67, %c0_68] : memref<1x32xf32, #tpu.memory_space<vmem>>, vector<1x32xf32>
    %180 = vector.broadcast %179 : vector<1x32xf32> to vector<8x32xf32>
    %181 = arith.addf %178, %180 : vector<8x32xf32>
    %c0_69 = arith.constant 0 : index
    %c0_70 = arith.constant 0 : index
    %182 = vector.load %arg16[%c0_69, %c0_70] : memref<32x640xbf16, #tpu.memory_space<vmem>>, vector<32x640xbf16>
    %183 = arith.truncf %181 : vector<8x32xf32> to vector<8x32xbf16>
    %cst_71 = arith.constant dense<0.000000e+00> : vector<8x640xf32>
    %184 = tpu.matmul %183, %182, %cst_71 {dimension_numbers = #tpu.dot_dimension_numbers<[1], [0], [0], [1], [0, 0, 1, 1], [], []>} : vector<8x32xbf16>, vector<32x640xbf16>, vector<8x640xf32> -> vector<8x640xf32>
    %c0_72 = arith.constant 0 : index
    %c0_73 = arith.constant 0 : index
    %185 = vector.load %arg17[%c0_72, %c0_73] : memref<1x640xf32, #tpu.memory_space<vmem>>, vector<1x640xf32>
    %186 = vector.broadcast %185 : vector<1x640xf32> to vector<8x640xf32>
    %187 = arith.addf %184, %186 : vector<8x640xf32>
    %c0_74 = arith.constant 0 : index
    %c0_75 = arith.constant 0 : index
    %188 = vector.load %arg18[%c0_74, %c0_75] : memref<8x640xf32, #tpu.memory_space<vmem>>, vector<8x640xf32>
    tpu.vector_store %arg18[%c0_74, %c0_75], %187 {strides = array<i32>} : memref<8x640xf32, #tpu.memory_space<vmem>>, vector<8x640xf32>,
    return
  }
  func.func @transform_0(%arg0: i32) -> (i32, i32) {
    %c0_i32 = arith.constant 0 : i32
    %c0_i32_0 = arith.constant 0 : i32
    return %arg0, %c0_i32 : i32, i32
  }
  func.func @transform_1(%arg0: i32) -> (i32, i32) {
    %c0_i32 = arith.constant 0 : i32
    %c0_i32_0 = arith.constant 0 : i32
    %c0_i32_1 = arith.constant 0 : i32
    return %c0_i32, %c0_i32_0 : i32, i32
  }
  func.func @transform_2(%arg0: i32) -> (i32, i32) {
    %c0_i32 = arith.constant 0 : i32
    %c0_i32_0 = arith.constant 0 : i32
    %c0_i32_1 = arith.constant 0 : i32
    return %c0_i32, %c0_i32_0 : i32, i32
  }
  func.func @transform_3(%arg0: i32) -> (i32, i32) {
    %c0_i32 = arith.constant 0 : i32
    %c0_i32_0 = arith.constant 0 : i32
    %c0_i32_1 = arith.constant 0 : i32
    return %c0_i32, %c0_i32_0 : i32, i32
  }
  func.func @transform_4(%arg0: i32) -> (i32, i32) {
    %c0_i32 = arith.constant 0 : i32
    %c0_i32_0 = arith.constant 0 : i32
    %c0_i32_1 = arith.constant 0 : i32
    return %c0_i32, %c0_i32_0 : i32, i32
  }
  func.func @transform_5(%arg0: i32) -> (i32, i32) {
    %c0_i32 = arith.constant 0 : i32
    %c0_i32_0 = arith.constant 0 : i32
    %c0_i32_1 = arith.constant 0 : i32
    return %c0_i32, %c0_i32_0 : i32, i32
  }
  func.func @transform_6(%arg0: i32) -> (i32, i32) {
    %c0_i32 = arith.constant 0 : i32
    %c0_i32_0 = arith.constant 0 : i32
    %c0_i32_1 = arith.constant 0 : i32
    return %c0_i32, %c0_i32_0 : i32, i32
  }
  func.func @transform_7(%arg0: i32) -> (i32, i32) {
    %c0_i32 = arith.constant 0 : i32
    %c0_i32_0 = arith.constant 0 : i32
    %c0_i32_1 = arith.constant 0 : i32
    return %c0_i32, %c0_i32_0 : i32, i32
  }
  func.func @transform_8(%arg0: i32) -> (i32, i32) {
    %c0_i32 = arith.constant 0 : i32
    %c0_i32_0 = arith.constant 0 : i32
    %c0_i32_1 = arith.constant 0 : i32
    return %c0_i32, %c0_i32_0 : i32, i32
  }
  func.func @transform_9(%arg0: i32) -> (i32, i32) {
    %c0_i32 = arith.constant 0 : i32
    %c0_i32_0 = arith.constant 0 : i32
    %c0_i32_1 = arith.constant 0 : i32
    return %c0_i32, %c0_i32_0 : i32, i32
  }
  func.func @transform_10(%arg0: i32) -> (i32, i32) {
    %c0_i32 = arith.constant 0 : i32
    %c0_i32_0 = arith.constant 0 : i32
    %c0_i32_1 = arith.constant 0 : i32
    return %c0_i32, %c0_i32_0 : i32, i32
  }
  func.func @transform_11(%arg0: i32) -> (i32, i32) {
    %c0_i32 = arith.constant 0 : i32
    %c0_i32_0 = arith.constant 0 : i32
    %c0_i32_1 = arith.constant 0 : i32
    return %c0_i32, %c0_i32_0 : i32, i32
  }
  func.func @transform_12(%arg0: i32) -> (i32, i32) {
    %c0_i32 = arith.constant 0 : i32
    %c0_i32_0 = arith.constant 0 : i32
    %c0_i32_1 = arith.constant 0 : i32
    return %c0_i32, %c0_i32_0 : i32, i32
  }
  func.func @transform_13(%arg0: i32) -> (i32, i32) {
    %c0_i32 = arith.constant 0 : i32
    %c0_i32_0 = arith.constant 0 : i32
    %c0_i32_1 = arith.constant 0 : i32
    return %c0_i32, %c0_i32_0 : i32, i32
  }
  func.func @transform_14(%arg0: i32) -> (i32, i32) {
    %c0_i32 = arith.constant 0 : i32
    %c0_i32_0 = arith.constant 0 : i32
    %c0_i32_1 = arith.constant 0 : i32
    return %c0_i32, %c0_i32_0 : i32, i32
  }
  func.func @transform_15(%arg0: i32) -> (i32, i32) {
    %c0_i32 = arith.constant 0 : i32
    %c0_i32_0 = arith.constant 0 : i32
    %c0_i32_1 = arith.constant 0 : i32
    return %c0_i32, %c0_i32_0 : i32, i32
  }
  func.func @transform_16(%arg0: i32) -> (i32, i32) {
    %c0_i32 = arith.constant 0 : i32
    %c0_i32_0 = arith.constant 0 : i32
    %c0_i32_1 = arith.constant 0 : i32
    return %c0_i32, %c0_i32_0 : i32, i32
  }
  func.func @transform_17(%arg0: i32) -> (i32, i32) {
    %c0_i32 = arith.constant 0 : i32
    %c0_i32_0 = arith.constant 0 : i32
    return %arg0, %c0_i32 : i32, i32
  }
}

module attributes {stable_mosaic.version = 11 : i64} {
  func.func @_at_fused_kernel(%arg0: i32, %arg1: memref<8x16xf32, #tpu.memory_space<vmem>>, %arg2: memref<16x32xbf16, #tpu.memory_space<vmem>>, %arg3: memref<1x32xf32, #tpu.memory_space<vmem>>, %arg4: memref<1x32xf32, #tpu.memory_space<vmem>>, %arg5: memref<1x32xf32, #tpu.memory_space<vmem>>, %arg6: memref<32x96xbf16, #tpu.memory_space<vmem>>, %arg7: memref<1x96xf32, #tpu.memory_space<vmem>>, %arg8: memref<32x32xbf16, #tpu.memory_space<vmem>>, %arg9: memref<1x32xf32, #tpu.memory_space<vmem>>, %arg10: memref<1x32xf32, #tpu.memory_space<vmem>>, %arg11: memref<1x32xf32, #tpu.memory_space<vmem>>, %arg12: memref<32x128xbf16, #tpu.memory_space<vmem>>, %arg13: memref<1x128xf32, #tpu.memory_space<vmem>>, %arg14: memref<128x32xbf16, #tpu.memory_space<vmem>>, %arg15: memref<1x32xf32, #tpu.memory_space<vmem>>, %arg16: memref<32x640xbf16, #tpu.memory_space<vmem>>, %arg17: memref<1x640xf32, #tpu.memory_space<vmem>>, %arg18: memref<8x640xf32, #tpu.memory_space<vmem>>) attributes {dimension_semantics = [#tpu.dimension_semantics<parallel>], iteration_bounds = array<i64: 2>, scalar_prefetch = 0 : i64, scratch_operands = 0 : i64, tpu.core_type = #tpu.core_type<tc>, window_params = [{transform_indices = @transform_0, window_bounds = array<i64: 8, 16>}, {pipeline_mode = #tpu.pipeline_mode<synchronous>, transform_indices = @transform_1, window_bounds = array<i64: 16, 32>}, {pipeline_mode = #tpu.pipeline_mode<synchronous>, transform_indices = @transform_2, window_bounds = array<i64: 1, 32>}, {pipeline_mode = #tpu.pipeline_mode<synchronous>, transform_indices = @transform_3, window_bounds = array<i64: 1, 32>}, {pipeline_mode = #tpu.pipeline_mode<synchronous>, transform_indices = @transform_4, window_bounds = array<i64: 1, 32>}, {pipeline_mode = #tpu.pipeline_mode<synchronous>, transform_indices = @transform_5, window_bounds = array<i64: 32, 96>}, {pipeline_mode = #tpu.pipeline_mode<synchronous>, transform_indices = @transform_6, window_bounds = array<i64: 1, 96>}, {pipeline_mode = #tpu.pipeline_mode<synchronous>, transform_indices = @transform_7, window_bounds = array<i64: 32, 32>}, {pipeline_mode = #tpu.pipeline_mode<synchronous>, transform_indices = @transform_8, window_bounds = array<i64: 1, 32>}, {pipeline_mode = #tpu.pipeline_mode<synchronous>, transform_indices = @transform_9, window_bounds = array<i64: 1, 32>}, {pipeline_mode = #tpu.pipeline_mode<synchronous>, transform_indices = @transform_10, window_bounds = array<i64: 1, 32>}, {pipeline_mode = #tpu.pipeline_mode<synchronous>, transform_indices = @transform_11, window_bounds = array<i64: 32, 128>}, {pipeline_mode = #tpu.pipeline_mode<synchronous>, transform_indices = @transform_12, window_bounds = array<i64: 1, 128>}, {pipeline_mode = #tpu.pipeline_mode<synchronous>, transform_indices = @transform_13, window_bounds = array<i64: 128, 32>}, {pipeline_mode = #tpu.pipeline_mode<synchronous>, transform_indices = @transform_14, window_bounds = array<i64: 1, 32>}, {pipeline_mode = #tpu.pipeline_mode<synchronous>, transform_indices = @transform_15, window_bounds = array<i64: 32, 640>}, {pipeline_mode = #tpu.pipeline_mode<synchronous>, transform_indices = @transform_16, window_bounds = array<i64: 1, 640>}, {transform_indices = @transform_17, window_bounds = array<i64: 8, 640>}]} {
    %c0 = arith.constant 0 : index
    %c0_0 = arith.constant 0 : index
    %0 = vector.load %arg1[%c0, %c0_0] : memref<8x16xf32, #tpu.memory_space<vmem>>, vector<8x16xf32>
    %c0_1 = arith.constant 0 : index
    %c0_2 = arith.constant 0 : index
    %1 = vector.load %arg2[%c0_1, %c0_2] : memref<16x32xbf16, #tpu.memory_space<vmem>>, vector<16x32xbf16>
    %2 = arith.truncf %0 : vector<8x16xf32> to vector<8x16xbf16>
    %cst = arith.constant dense<0.000000e+00> : vector<8x32xf32>
    %3 = tpu.matmul %2, %1, %cst {dimension_numbers = #tpu.dot_dimension_numbers<[1], [0], [0], [1], [0, 0, 1, 1], [], []>} : vector<8x16xbf16>, vector<16x32xbf16>, vector<8x32xf32> -> vector<8x32xf32>
    %c0_3 = arith.constant 0 : index
    %c0_4 = arith.constant 0 : index
    %4 = vector.load %arg3[%c0_3, %c0_4] : memref<1x32xf32, #tpu.memory_space<vmem>>, vector<1x32xf32>
    %5 = vector.broadcast %4 : vector<1x32xf32> to vector<8x32xf32>
    %6 = arith.addf %3, %5 : vector<8x32xf32>
    %c0_5 = arith.constant 0 : index
    %c0_6 = arith.constant 0 : index
    %7 = vector.load %arg4[%c0_5, %c0_6] : memref<1x32xf32, #tpu.memory_space<vmem>>, vector<1x32xf32>
    %c0_7 = arith.constant 0 : index
    %c0_8 = arith.constant 0 : index
    %8 = vector.load %arg5[%c0_7, %c0_8] : memref<1x32xf32, #tpu.memory_space<vmem>>, vector<1x32xf32>
    %cst_9 = arith.constant dense<0.000000e+00> : vector<8xf32>
    %9 = vector.multi_reduction <add>, %6, %cst_9 [1] : vector<8x32xf32> to vector<8xf32>
    %10 = vector.shape_cast %9 : vector<8xf32> to vector<8x1xf32>
    %cst_10 = arith.constant 3.200000e+01 : f32
    %11 = vector.broadcast %cst_10 : f32 to vector<8x1xf32>
    %12 = arith.divf %10, %11 : vector<8x1xf32>
    %13 = vector.broadcast %12 : vector<8x1xf32> to vector<8x32xf32>
    %14 = arith.subf %6, %13 : vector<8x32xf32>
    %15 = arith.mulf %14, %14 : vector<8x32xf32>
    %cst_11 = arith.constant dense<0.000000e+00> : vector<8xf32>
    %16 = vector.multi_reduction <add>, %15, %cst_11 [1] : vector<8x32xf32> to vector<8xf32>
    %17 = vector.shape_cast %16 : vector<8xf32> to vector<8x1xf32>
    %cst_12 = arith.constant 3.200000e+01 : f32
    %18 = vector.broadcast %cst_12 : f32 to vector<8x1xf32>
    %19 = arith.divf %17, %18 : vector<8x1xf32>
    %20 = vector.broadcast %12 : vector<8x1xf32> to vector<8x32xf32>
    %21 = arith.subf %6, %20 : vector<8x32xf32>
    %cst_13 = arith.constant 9.99999974E-6 : f32
    %22 = vector.broadcast %cst_13 : f32 to vector<8x1xf32>
    %23 = arith.addf %19, %22 : vector<8x1xf32>
    %24 = math.rsqrt %23 : vector<8x1xf32>
    %25 = vector.broadcast %24 : vector<8x1xf32> to vector<8x32xf32>
    %26 = arith.mulf %21, %25 : vector<8x32xf32>
    %27 = vector.broadcast %7 : vector<1x32xf32> to vector<8x32xf32>
    %28 = arith.mulf %26, %27 : vector<8x32xf32>
    %29 = vector.broadcast %8 : vector<1x32xf32> to vector<8x32xf32>
    %30 = arith.addf %28, %29 : vector<8x32xf32>
    %c0_14 = arith.constant 0 : index
    %c0_15 = arith.constant 0 : index
    %31 = vector.load %arg6[%c0_14, %c0_15] : memref<32x96xbf16, #tpu.memory_space<vmem>>, vector<32x96xbf16>
    %32 = arith.truncf %30 : vector<8x32xf32> to vector<8x32xbf16>
    %cst_16 = arith.constant dense<0.000000e+00> : vector<8x96xf32>
    %33 = tpu.matmul %32, %31, %cst_16 {dimension_numbers = #tpu.dot_dimension_numbers<[1], [0], [0], [1], [0, 0, 1, 1], [], []>} : vector<8x32xbf16>, vector<32x96xbf16>, vector<8x96xf32> -> vector<8x96xf32>
    %c0_17 = arith.constant 0 : index
    %c0_18 = arith.constant 0 : index
    %34 = vector.load %arg7[%c0_17, %c0_18] : memref<1x96xf32, #tpu.memory_space<vmem>>, vector<1x96xf32>
    %35 = vector.broadcast %34 : vector<1x96xf32> to vector<8x96xf32>
    %36 = arith.addf %33, %35 : vector<8x96xf32>
    %37 = vector.extract_strided_slice %36 {offsets = [0, 0], sizes = [8, 8], strides = [1, 1]} : vector<8x96xf32> to vector<8x8xf32>
    %38 = arith.truncf %37 : vector<8x8xf32> to vector<8x8xbf16>
    %39 = vector.extract_strided_slice %36 {offsets = [0, 32], sizes = [8, 8], strides = [1, 1]} : vector<8x96xf32> to vector<8x8xf32>
    %40 = arith.truncf %39 : vector<8x8xf32> to vector<8x8xbf16>
    %41 = vector.extract_strided_slice %36 {offsets = [0, 64], sizes = [8, 8], strides = [1, 1]} : vector<8x96xf32> to vector<8x8xf32>
    %42 = arith.truncf %41 : vector<8x8xf32> to vector<8x8xbf16>
    %cst_19 = arith.constant dense<0.000000e+00> : vector<8x8xf32>
    %43 = tpu.matmul %38, %40, %cst_19 {dimension_numbers = #tpu.dot_dimension_numbers<[1], [1], [0], [0], [0, 0, 1, 0], [], []>} : vector<8x8xbf16>, vector<8x8xbf16>, vector<8x8xf32> -> vector<8x8xf32>
    %cst_20 = arith.constant dense<0xFF800000> : vector<8xf32>
    %44 = vector.multi_reduction <maximumf>, %43, %cst_20 [1] : vector<8x8xf32> to vector<8xf32>
    %45 = vector.shape_cast %44 : vector<8xf32> to vector<8x1xf32>
    %46 = vector.broadcast %45 : vector<8x1xf32> to vector<8x8xf32>
    %47 = arith.subf %43, %46 : vector<8x8xf32>
    %48 = math.exp %47 : vector<8x8xf32>
    %cst_21 = arith.constant dense<0.000000e+00> : vector<8xf32>
    %49 = vector.multi_reduction <add>, %48, %cst_21 [1] : vector<8x8xf32> to vector<8xf32>
    %50 = vector.shape_cast %49 : vector<8xf32> to vector<8x1xf32>
    %51 = tpu.reciprocal %50 {approx = true} : vector<8x1xf32> -> vector<8x1xf32>
    %52 = vector.broadcast %51 : vector<8x1xf32> to vector<8x8xf32>
    %53 = arith.mulf %48, %52 : vector<8x8xf32>
    %54 = arith.truncf %53 : vector<8x8xf32> to vector<8x8xbf16>
    %cst_22 = arith.constant dense<0.000000e+00> : vector<8x8xf32>
    %55 = tpu.matmul %54, %42, %cst_22 {dimension_numbers = #tpu.dot_dimension_numbers<[1], [0], [0], [1], [0, 0, 1, 1], [], []>} : vector<8x8xbf16>, vector<8x8xbf16>, vector<8x8xf32> -> vector<8x8xf32>
    %c0_23 = arith.constant 0 : index
    %c0_24 = arith.constant 0 : index
    %56 = vector.load %arg8[%c0_23, %c0_24] : memref<32x32xbf16, #tpu.memory_space<vmem>>, vector<8x32xbf16>
    %57 = arith.truncf %55 : vector<8x8xf32> to vector<8x8xbf16>
    %cst_25 = arith.constant dense<0.000000e+00> : vector<8x32xf32>
    %58 = tpu.matmul %57, %56, %cst_25 {dimension_numbers = #tpu.dot_dimension_numbers<[1], [0], [0], [1], [0, 0, 1, 1], [], []>} : vector<8x8xbf16>, vector<8x32xbf16>, vector<8x32xf32> -> vector<8x32xf32>
    %59 = vector.extract_strided_slice %36 {offsets = [0, 8], sizes = [8, 8], strides = [1, 1]} : vector<8x96xf32> to vector<8x8xf32>
    %60 = arith.truncf %59 : vector<8x8xf32> to vector<8x8xbf16>
    %61 = vector.extract_strided_slice %36 {offsets = [0, 40], sizes = [8, 8], strides = [1, 1]} : vector<8x96xf32> to vector<8x8xf32>
    %62 = arith.truncf %61 : vector<8x8xf32> to vector<8x8xbf16>
    %63 = vector.extract_strided_slice %36 {offsets = [0, 72], sizes = [8, 8], strides = [1, 1]} : vector<8x96xf32> to vector<8x8xf32>
    %64 = arith.truncf %63 : vector<8x8xf32> to vector<8x8xbf16>
    %cst_26 = arith.constant dense<0.000000e+00> : vector<8x8xf32>
    %65 = tpu.matmul %60, %62, %cst_26 {dimension_numbers = #tpu.dot_dimension_numbers<[1], [1], [0], [0], [0, 0, 1, 0], [], []>} : vector<8x8xbf16>, vector<8x8xbf16>, vector<8x8xf32> -> vector<8x8xf32>
    %cst_27 = arith.constant dense<0xFF800000> : vector<8xf32>
    %66 = vector.multi_reduction <maximumf>, %65, %cst_27 [1] : vector<8x8xf32> to vector<8xf32>
    %67 = vector.shape_cast %66 : vector<8xf32> to vector<8x1xf32>
    %68 = vector.broadcast %67 : vector<8x1xf32> to vector<8x8xf32>
    %69 = arith.subf %65, %68 : vector<8x8xf32>
    %70 = math.exp %69 : vector<8x8xf32>
    %cst_28 = arith.constant dense<0.000000e+00> : vector<8xf32>
    %71 = vector.multi_reduction <add>, %70, %cst_28 [1] : vector<8x8xf32> to vector<8xf32>
    %72 = vector.shape_cast %71 : vector<8xf32> to vector<8x1xf32>
    %73 = tpu.reciprocal %72 {approx = true} : vector<8x1xf32> -> vector<8x1xf32>
    %74 = vector.broadcast %73 : vector<8x1xf32> to vector<8x8xf32>
    %75 = arith.mulf %70, %74 : vector<8x8xf32>
    %76 = arith.truncf %75 : vector<8x8xf32> to vector<8x8xbf16>
    %cst_29 = arith.constant dense<0.000000e+00> : vector<8x8xf32>
    %77 = tpu.matmul %76, %64, %cst_29 {dimension_numbers = #tpu.dot_dimension_numbers<[1], [0], [0], [1], [0, 0, 1, 1], [], []>} : vector<8x8xbf16>, vector<8x8xbf16>, vector<8x8xf32> -> vector<8x8xf32>
    %c8 = arith.constant 8 : index
    %c0_30 = arith.constant 0 : index
    %78 = vector.load %arg8[%c8, %c0_30] : memref<32x32xbf16, #tpu.memory_space<vmem>>, vector<8x32xbf16>
    %79 = arith.truncf %77 : vector<8x8xf32> to vector<8x8xbf16>
    %cst_31 = arith.constant dense<0.000000e+00> : vector<8x32xf32>
    %80 = tpu.matmul %79, %78, %cst_31 {dimension_numbers = #tpu.dot_dimension_numbers<[1], [0], [0], [1], [0, 0, 1, 1], [], []>} : vector<8x8xbf16>, vector<8x32xbf16>, vector<8x32xf32> -> vector<8x32xf32>
    %81 = arith.addf %58, %80 : vector<8x32xf32>
    %82 = vector.extract_strided_slice %36 {offsets = [0, 16], sizes = [8, 8], strides = [1, 1]} : vector<8x96xf32> to vector<8x8xf32>
    %83 = arith.truncf %82 : vector<8x8xf32> to vector<8x8xbf16>
    %84 = vector.extract_strided_slice %36 {offsets = [0, 48], sizes = [8, 8], strides = [1, 1]} : vector<8x96xf32> to vector<8x8xf32>
    %85 = arith.truncf %84 : vector<8x8xf32> to vector<8x8xbf16>
    %86 = vector.extract_strided_slice %36 {offsets = [0, 80], sizes = [8, 8], strides = [1, 1]} : vector<8x96xf32> to vector<8x8xf32>
    %87 = arith.truncf %86 : vector<8x8xf32> to vector<8x8xbf16>
    %cst_32 = arith.constant dense<0.000000e+00> : vector<8x8xf32>
    %88 = tpu.matmul %83, %85, %cst_32 {dimension_numbers = #tpu.dot_dimension_numbers<[1], [1], [0], [0], [0, 0, 1, 0], [], []>} : vector<8x8xbf16>, vector<8x8xbf16>, vector<8x8xf32> -> vector<8x8xf32>
    %cst_33 = arith.constant dense<0xFF800000> : vector<8xf32>
    %89 = vector.multi_reduction <maximumf>, %88, %cst_33 [1] : vector<8x8xf32> to vector<8xf32>
    %90 = vector.shape_cast %89 : vector<8xf32> to vector<8x1xf32>
    %91 = vector.broadcast %90 : vector<8x1xf32> to vector<8x8xf32>
    %92 = arith.subf %88, %91 : vector<8x8xf32>
    %93 = math.exp %92 : vector<8x8xf32>
    %cst_34 = arith.constant dense<0.000000e+00> : vector<8xf32>
    %94 = vector.multi_reduction <add>, %93, %cst_34 [1] : vector<8x8xf32> to vector<8xf32>
    %95 = vector.shape_cast %94 : vector<8xf32> to vector<8x1xf32>
    %96 = tpu.reciprocal %95 {approx = true} : vector<8x1xf32> -> vector<8x1xf32>
    %97 = vector.broadcast %96 : vector<8x1xf32> to vector<8x8xf32>
    %98 = arith.mulf %93, %97 : vector<8x8xf32>
    %99 = arith.truncf %98 : vector<8x8xf32> to vector<8x8xbf16>
    %cst_35 = arith.constant dense<0.000000e+00> : vector<8x8xf32>
    %100 = tpu.matmul %99, %87, %cst_35 {dimension_numbers = #tpu.dot_dimension_numbers<[1], [0], [0], [1], [0, 0, 1, 1], [], []>} : vector<8x8xbf16>, vector<8x8xbf16>, vector<8x8xf32> -> vector<8x8xf32>
    %c16 = arith.constant 16 : index
    %c0_36 = arith.constant 0 : index
    %101 = vector.load %arg8[%c16, %c0_36] : memref<32x32xbf16, #tpu.memory_space<vmem>>, vector<8x32xbf16>
    %102 = arith.truncf %100 : vector<8x8xf32> to vector<8x8xbf16>
    %cst_37 = arith.constant dense<0.000000e+00> : vector<8x32xf32>
    %103 = tpu.matmul %102, %101, %cst_37 {dimension_numbers = #tpu.dot_dimension_numbers<[1], [0], [0], [1], [0, 0, 1, 1], [], []>} : vector<8x8xbf16>, vector<8x32xbf16>, vector<8x32xf32> -> vector<8x32xf32>
    %104 = arith.addf %81, %103 : vector<8x32xf32>
    %105 = vector.extract_strided_slice %36 {offsets = [0, 24], sizes = [8, 8], strides = [1, 1]} : vector<8x96xf32> to vector<8x8xf32>
    %106 = arith.truncf %105 : vector<8x8xf32> to vector<8x8xbf16>
    %107 = vector.extract_strided_slice %36 {offsets = [0, 56], sizes = [8, 8], strides = [1, 1]} : vector<8x96xf32> to vector<8x8xf32>
    %108 = arith.truncf %107 : vector<8x8xf32> to vector<8x8xbf16>
    %109 = vector.extract_strided_slice %36 {offsets = [0, 88], sizes = [8, 8], strides = [1, 1]} : vector<8x96xf32> to vector<8x8xf32>
    %110 = arith.truncf %109 : vector<8x8xf32> to vector<8x8xbf16>
    %cst_38 = arith.constant dense<0.000000e+00> : vector<8x8xf32>
    %111 = tpu.matmul %106, %108, %cst_38 {dimension_numbers = #tpu.dot_dimension_numbers<[1], [1], [0], [0], [0, 0, 1, 0], [], []>} : vector<8x8xbf16>, vector<8x8xbf16>, vector<8x8xf32> -> vector<8x8xf32>
    %cst_39 = arith.constant dense<0xFF800000> : vector<8xf32>
    %112 = vector.multi_reduction <maximumf>, %111, %cst_39 [1] : vector<8x8xf32> to vector<8xf32>
    %113 = vector.shape_cast %112 : vector<8xf32> to vector<8x1xf32>
    %114 = vector.broadcast %113 : vector<8x1xf32> to vector<8x8xf32>
    %115 = arith.subf %111, %114 : vector<8x8xf32>
    %116 = math.exp %115 : vector<8x8xf32>
    %cst_40 = arith.constant dense<0.000000e+00> : vector<8xf32>
    %117 = vector.multi_reduction <add>, %116, %cst_40 [1] : vector<8x8xf32> to vector<8xf32>
    %118 = vector.shape_cast %117 : vector<8xf32> to vector<8x1xf32>
    %119 = tpu.reciprocal %118 {approx = true} : vector<8x1xf32> -> vector<8x1xf32>
    %120 = vector.broadcast %119 : vector<8x1xf32> to vector<8x8xf32>
    %121 = arith.mulf %116, %120 : vector<8x8xf32>
    %122 = arith.truncf %121 : vector<8x8xf32> to vector<8x8xbf16>
    %cst_41 = arith.constant dense<0.000000e+00> : vector<8x8xf32>
    %123 = tpu.matmul %122, %110, %cst_41 {dimension_numbers = #tpu.dot_dimension_numbers<[1], [0], [0], [1], [0, 0, 1, 1], [], []>} : vector<8x8xbf16>, vector<8x8xbf16>, vector<8x8xf32> -> vector<8x8xf32>
    %c24 = arith.constant 24 : index
    %c0_42 = arith.constant 0 : index
    %124 = vector.load %arg8[%c24, %c0_42] : memref<32x32xbf16, #tpu.memory_space<vmem>>, vector<8x32xbf16>
    %125 = arith.truncf %123 : vector<8x8xf32> to vector<8x8xbf16>
    %cst_43 = arith.constant dense<0.000000e+00> : vector<8x32xf32>
    %126 = tpu.matmul %125, %124, %cst_43 {dimension_numbers = #tpu.dot_dimension_numbers<[1], [0], [0], [1], [0, 0, 1, 1], [], []>} : vector<8x8xbf16>, vector<8x32xbf16>, vector<8x32xf32> -> vector<8x32xf32>
    %127 = arith.addf %104, %126 : vector<8x32xf32>
    %128 = arith.addf %6, %127 : vector<8x32xf32>
    %c0_44 = arith.constant 0 : index
    %c0_45 = arith.constant 0 : index
    %129 = vector.load %arg9[%c0_44, %c0_45] : memref<1x32xf32, #tpu.memory_space<vmem>>, vector<1x32xf32>
    %130 = vector.broadcast %129 : vector<1x32xf32> to vector<8x32xf32>
    %131 = arith.addf %128, %130 : vector<8x32xf32>
    %c0_46 = arith.constant 0 : index
    %c0_47 = arith.constant 0 : index
    %132 = vector.load %arg10[%c0_46, %c0_47] : memref<1x32xf32, #tpu.memory_space<vmem>>, vector<1x32xf32>
    %c0_48 = arith.constant 0 : index
    %c0_49 = arith.constant 0 : index
    %133 = vector.load %arg11[%c0_48, %c0_49] : memref<1x32xf32, #tpu.memory_space<vmem>>, vector<1x32xf32>
    %cst_50 = arith.constant dense<0.000000e+00> : vector<8xf32>
    %134 = vector.multi_reduction <add>, %131, %cst_50 [1] : vector<8x32xf32> to vector<8xf32>
    %135 = vector.shape_cast %134 : vector<8xf32> to vector<8x1xf32>
    %cst_51 = arith.constant 3.200000e+01 : f32
    %136 = vector.broadcast %cst_51 : f32 to vector<8x1xf32>
    %137 = arith.divf %135, %136 : vector<8x1xf32>
    %138 = vector.broadcast %137 : vector<8x1xf32> to vector<8x32xf32>
    %139 = arith.subf %131, %138 : vector<8x32xf32>
    %140 = arith.mulf %139, %139 : vector<8x32xf32>
    %cst_52 = arith.constant dense<0.000000e+00> : vector<8xf32>
    %141 = vector.multi_reduction <add>, %140, %cst_52 [1] : vector<8x32xf32> to vector<8xf32>
    %142 = vector.shape_cast %141 : vector<8xf32> to vector<8x1xf32>
    %cst_53 = arith.constant 3.200000e+01 : f32
    %143 = vector.broadcast %cst_53 : f32 to vector<8x1xf32>
    %144 = arith.divf %142, %143 : vector<8x1xf32>
    %145 = vector.broadcast %137 : vector<8x1xf32> to vector<8x32xf32>
    %146 = arith.subf %131, %145 : vector<8x32xf32>
    %cst_54 = arith.constant 9.99999974E-6 : f32
    %147 = vector.broadcast %cst_54 : f32 to vector<8x1xf32>
    %148 = arith.addf %144, %147 : vector<8x1xf32>
    %149 = math.rsqrt %148 : vector<8x1xf32>
    %150 = vector.broadcast %149 : vector<8x1xf32> to vector<8x32xf32>
    %151 = arith.mulf %146, %150 : vector<8x32xf32>
    %152 = vector.broadcast %132 : vector<1x32xf32> to vector<8x32xf32>
    %153 = arith.mulf %151, %152 : vector<8x32xf32>
    %154 = vector.broadcast %133 : vector<1x32xf32> to vector<8x32xf32>
    %155 = arith.addf %153, %154 : vector<8x32xf32>
    %c0_55 = arith.constant 0 : index
    %c0_56 = arith.constant 0 : index
    %156 = vector.load %arg12[%c0_55, %c0_56] : memref<32x128xbf16, #tpu.memory_space<vmem>>, vector<32x128xbf16>
    %157 = arith.truncf %155 : vector<8x32xf32> to vector<8x32xbf16>
    %cst_57 = arith.constant dense<0.000000e+00> : vector<8x128xf32>
    %158 = tpu.matmul %157, %156, %cst_57 {dimension_numbers = #tpu.dot_dimension_numbers<[1], [0], [0], [1], [0, 0, 1, 1], [], []>} : vector<8x32xbf16>, vector<32x128xbf16>, vector<8x128xf32> -> vector<8x128xf32>
    %c0_58 = arith.constant 0 : index
    %c0_59 = arith.constant 0 : index
    %159 = vector.load %arg13[%c0_58, %c0_59] : memref<1x128xf32, #tpu.memory_space<vmem>>, vector<1x128xf32>
    %160 = vector.broadcast %159 : vector<1x128xf32> to vector<8x128xf32>
    %161 = arith.addf %158, %160 : vector<8x128xf32>
    %cst_60 = arith.constant 5.000000e-01 : f32
    %162 = vector.broadcast %cst_60 : f32 to vector<8x128xf32>
    %163 = arith.mulf %162, %161 : vector<8x128xf32>
    %cst_61 = arith.constant 4.471500e-02 : f32
    %164 = vector.broadcast %cst_61 : f32 to vector<8x128xf32>
    %165 = arith.mulf %164, %161 : vector<8x128xf32>
    %166 = arith.mulf %165, %161 : vector<8x128xf32>
    %167 = arith.mulf %166, %161 : vector<8x128xf32>
    %168 = arith.addf %161, %167 : vector<8x128xf32>
    %cst_62 = arith.constant 0.797884583 : f32
    %169 = vector.broadcast %cst_62 : f32 to vector<8x128xf32>
    %170 = arith.mulf %169, %168 : vector<8x128xf32>
    %171 = math.tanh %170 : vector<8x128xf32>
    %cst_63 = arith.constant 1.000000e+00 : f32
    %172 = vector.broadcast %cst_63 : f32 to vector<8x128xf32>
    %173 = arith.addf %172, %171 : vector<8x128xf32>
    %174 = arith.mulf %163, %173 : vector<8x128xf32>
    %c0_64 = arith.constant 0 : index
    %c0_65 = arith.constant 0 : index
    %175 = vector.load %arg14[%c0_64, %c0_65] : memref<128x32xbf16, #tpu.memory_space<vmem>>, vector<128x32xbf16>
    %176 = arith.truncf %174 : vector<8x128xf32> to vector<8x128xbf16>
    %cst_66 = arith.constant dense<0.000000e+00> : vector<8x32xf32>
    %177 = tpu.matmul %176, %175, %cst_66 {dimension_numbers = #tpu.dot_dimension_numbers<[1], [0], [0], [1], [0, 0, 1, 1], [], []>} : vector<8x128xbf16>, vector<128x32xbf16>, vector<8x32xf32> -> vector<8x32xf32>
    %178 = arith.addf %131, %177 : vector<8x32xf32>
    %c0_67 = arith.constant 0 : index
    %c0_68 = arith.constant 0 : index
    %179 = vector.load %arg15[%c0_67, %c0_68] : memref<1x32xf32, #tpu.memory_space<vmem>>, vector<1x32xf32>
    %180 = vector.broadcast %179 : vector<1x32xf32> to vector<8x32xf32>
    %181 = arith.addf %178, %180 : vector<8x32xf32>
    %c0_69 = arith.constant 0 : index
    %c0_70 = arith.constant 0 : index
    %182 = vector.load %arg16[%c0_69, %c0_70] : memref<32x640xbf16, #tpu.memory_space<vmem>>, vector<32x640xbf16>
    %183 = arith.truncf %181 : vector<8x32xf32> to vector<8x32xbf16>
    %cst_71 = arith.constant dense<0.000000e+00> : vector<8x640xf32>
    %184 = tpu.matmul %183, %182, %cst_71 {dimension_numbers = #tpu.dot_dimension_numbers<[1], [0], [0], [1], [0, 0, 1, 1], [], []>} : vector<8x32xbf16>, vector<32x640xbf16>, vector<8x640xf32> -> vector<8x640xf32>
    %c0_72 = arith.constant 0 : index
    %c0_73 = arith.constant 0 : index
    %185 = vector.load %arg17[%c0_72, %c0_73] : memref<1x640xf32, #tpu.memory_space<vmem>>, vector<1x640xf32>
    %186 = vector.broadcast %185 : vector<1x640xf32> to vector<8x640xf32>
    %187 = arith.addf %184, %186 : vector<8x640xf32>
    %c0_74 = arith.constant 0 : index
    %c0_75 = arith.constant 0 : index
    %188 = vector.load %arg18[%c0_74, %c0_75] : memref<8x640xf32, #tpu.memory_space<vmem>>, vector<8x640xf32>
    tpu.vector_store %arg18[%c0_74, %c0_75], %187 {strides = array<i32>} : memref<8x640xf32, #tpu.memory_space<vmem>>, vector<8x640xf32>,
    return
  }
  func.func @transform_0(%arg0: i32) -> (i32, i32) {
    %c0_i32 = arith.constant 0 : i32
    %c0_i32_0 = arith.constant 0 : i32
    return %arg0, %c0_i32 : i32, i32
  }
  func.func @transform_1(%arg0: i32) -> (i32, i32) {
    %c0_i32 = arith.constant 0 : i32
    %c0_i32_0 = arith.constant 0 : i32
    %c0_i32_1 = arith.constant 0 : i32
    return %c0_i32, %c0_i32_0 : i32, i32
  }
  func.func @transform_2(%arg0: i32) -> (i32, i32) {
    %c0_i32 = arith.constant 0 : i32
    %c0_i32_0 = arith.constant 0 : i32
    %c0_i32_1 = arith.constant 0 : i32
    return %c0_i32, %c0_i32_0 : i32, i32
  }
  func.func @transform_3(%arg0: i32) -> (i32, i32) {
    %c0_i32 = arith.constant 0 : i32
    %c0_i32_0 = arith.constant 0 : i32
    %c0_i32_1 = arith.constant 0 : i32
    return %c0_i32, %c0_i32_0 : i32, i32
  }
  func.func @transform_4(%arg0: i32) -> (i32, i32) {
    %c0_i32 = arith.constant 0 : i32
    %c0_i32_0 = arith.constant 0 : i32
    %c0_i32_1 = arith.constant 0 : i32
    return %c0_i32, %c0_i32_0 : i32, i32
  }
  func.func @transform_5(%arg0: i32) -> (i32, i32) {
    %c0_i32 = arith.constant 0 : i32
    %c0_i32_0 = arith.constant 0 : i32
    %c0_i32_1 = arith.constant 0 : i32
    return %c0_i32, %c0_i32_0 : i32, i32
  }
  func.func @transform_6(%arg0: i32) -> (i32, i32) {
    %c0_i32 = arith.constant 0 : i32
    %c0_i32_0 = arith.constant 0 : i32
    %c0_i32_1 = arith.constant 0 : i32
    return %c0_i32, %c0_i32_0 : i32, i32
  }
  func.func @transform_7(%arg0: i32) -> (i32, i32) {
    %c0_i32 = arith.constant 0 : i32
    %c0_i32_0 = arith.constant 0 : i32
    %c0_i32_1 = arith.constant 0 : i32
    return %c0_i32, %c0_i32_0 : i32, i32
  }
  func.func @transform_8(%arg0: i32) -> (i32, i32) {
    %c0_i32 = arith.constant 0 : i32
    %c0_i32_0 = arith.constant 0 : i32
    %c0_i32_1 = arith.constant 0 : i32
    return %c0_i32, %c0_i32_0 : i32, i32
  }
  func.func @transform_9(%arg0: i32) -> (i32, i32) {
    %c0_i32 = arith.constant 0 : i32
    %c0_i32_0 = arith.constant 0 : i32
    %c0_i32_1 = arith.constant 0 : i32
    return %c0_i32, %c0_i32_0 : i32, i32
  }
  func.func @transform_10(%arg0: i32) -> (i32, i32) {
    %c0_i32 = arith.constant 0 : i32
    %c0_i32_0 = arith.constant 0 : i32
    %c0_i32_1 = arith.constant 0 : i32
    return %c0_i32, %c0_i32_0 : i32, i32
  }
  func.func @transform_11(%arg0: i32) -> (i32, i32) {
    %c0_i32 = arith.constant 0 : i32
    %c0_i32_0 = arith.constant 0 : i32
    %c0_i32_1 = arith.constant 0 : i32
    return %c0_i32, %c0_i32_0 : i32, i32
  }
  func.func @transform_12(%arg0: i32) -> (i32, i32) {
    %c0_i32 = arith.constant 0 : i32
    %c0_i32_0 = arith.constant 0 : i32
    %c0_i32_1 = arith.constant 0 : i32
    return %c0_i32, %c0_i32_0 : i32, i32
  }
  func.func @transform_13(%arg0: i32) -> (i32, i32) {
    %c0_i32 = arith.constant 0 : i32
    %c0_i32_0 = arith.constant 0 : i32
    %c0_i32_1 = arith.constant 0 : i32
    return %c0_i32, %c0_i32_0 : i32, i32
  }
  func.func @transform_14(%arg0: i32) -> (i32, i32) {
    %c0_i32 = arith.constant 0 : i32
    %c0_i32_0 = arith.constant 0 : i32
    %c0_i32_1 = arith.constant 0 : i32
    return %c0_i32, %c0_i32_0 : i32, i32
  }
  func.func @transform_15(%arg0: i32) -> (i32, i32) {
    %c0_i32 = arith.constant 0 : i32
    %c0_i32_0 = arith.constant 0 : i32
    %c0_i32_1 = arith.constant 0 : i32
    return %c0_i32, %c0_i32_0 : i32, i32
  }
  func.func @transform_16(%arg0: i32) -> (i32, i32) {
    %c0_i32 = arith.constant 0 : i32
    %c0_i32_0 = arith.constant 0 : i32
    %c0_i32_1 = arith.constant 0 : i32
    return %c0_i32, %c0_i32_0 : i32, i32
  }
  func.func @transform_17(%arg0: i32) -> (i32, i32) {
    %c0_i32 = arith.constant 0 : i32
    %c0_i32_0 = arith.constant 0 : i32
    return %arg0, %c0_i32 : i32, i32
  }
}

</mosaic_0001>

<bundles_post_ra>
// kernel: tpu_custom_call.1
= control target key start
LH: loop header
LB: loop body
LE: loop exit
PB: predicated region body
PF: predicated region fallthrough
CT: control target
= control target key end

     0   :  { %s3679_s0 = inlined_call_operand.vmem [shape: f32[16,16], index: 0, kind: input, shape index: {}]   ;;  %s3680_s1 = inlined_call_operand.vmem [shape: bf16[16,32], index: 1, kind: input, shape index: {}]   ;;  %s3681_s2 = inlined_call_operand.hbm [shape: f32[1,32], index: 2, kind: input, shape index: {}]   ;;  %s3682_s3 = inlined_call_operand.hbm [shape: f32[1,32], index: 3, kind: input, shape index: {}]   ;;  %s3683_s4 = inlined_call_operand.hbm [shape: f32[1,32], index: 4, kind: input, shape index: {}]   ;;  %s3684_s5 = inlined_call_operand.vmem [shape: bf16[32,96], index: 5, kind: input, shape index: {}]   ;;  %s3685_s6 = inlined_call_operand.hbm [shape: f32[1,96], index: 6, kind: input, shape index: {}]   ;;  %s3686_s7 = inlined_call_operand.vmem [shape: bf16[32,32], index: 7, kind: input, shape index: {}]   ;;  %s3687_s8 = inlined_call_operand.hbm [shape: f32[1,32], index: 8, kind: input, shape index: {}]   ;;  %s3688_s9 = inlined_call_operand.hbm [shape: f32[1,32], index: 9, kind: input, shape index: {}]   ;;  %s3689_s10 = inlined_call_operand.hbm [shape: f32[1,32], index: 10, kind: input, shape index: {}]   ;;  %s3690_s11 = inlined_call_operand.hbm [shape: bf16[32,128], index: 11, kind: input, shape index: {}]   ;;  %s3691_s12 = inlined_call_operand.hbm [shape: f32[1,128], index: 12, kind: input, shape index: {}]   ;;  %s3692_s13 = inlined_call_operand.vmem [shape: bf16[128,32], index: 13, kind: input, shape index: {}]   ;;  %s3693_s14 = inlined_call_operand.hbm [shape: f32[1,32], index: 14, kind: input, shape index: {}]   ;;  %s3694_s15 = inlined_call_operand.vmem [shape: bf16[32,640], index: 15, kind: input, shape index: {}]   ;;  %s3695_s16 = inlined_call_operand.hbm [shape: f32[1,640], index: 16, kind: input, shape index: {}]   ;;  %s3696_s17 = inlined_call_operand.hbm [shape: f32[16,640], index: 17, kind: output, shape index: {}]  }
   0x1   :  { %3711 = sst [smem:[#allocation36_spill]] %s3679_s0 }
   0x2   :  { %3712 = sst [smem:[#allocation37_spill]] %s3680_s1 }
   0x3   :  { %3713 = sst [smem:[#allocation38_spill]] %s3682_s3 }
   0x4   :  { %3714 = sst [smem:[#allocation39_spill]] %s3685_s6 }
   0x5   :  { %3715 = sst [smem:[#allocation40_spill]] %s3696_s17 }
   0x6   :  { %22 = vsyncpa [#allocation3], 0 }
   0x7   :  { %23 = vsyncpa [#allocation6], 0 }
   0x8   :  { %24 = vsyncpa [#allocation9], 0 }
   0x9   :  { %25 = vsyncpa [#allocation12], 0 }
   0xa   :  { %26 = vsyncpa [#allocation15], 0 }
   0xb   :  { %27 = vsyncpa [#allocation18], 0 }
   0xc   :  { %28 = vsyncpa [#allocation4], 0 }
   0xd   :  { %30 = vsyncpa [#allocation4 + $0x1], 0  ;;  %s3088_s24 = smov 0   ;;  %s3090_s25 = smov 0  }
   0xe   :  { %s3092_s26 = smov 0   ;;  %s3094_s27 = smov 0  }
   0xf LB: > { %3716 = sst [smem:[#allocation28_spill]] %s2956_s24  ;;  %s3109_s28 = sadd.s32 4294967295, %s2968_s27   ;;  %s2968_s27 = sphi %s3094_s27, %s3755_s27   ;;  %s2964_s26 = sphi %s3092_s26, %s3758_s26   ;;  %s2960_s25 = sphi %s3090_s25, %s3757_s25   ;;  %s2956_s24 = sphi %s3088_s24, %s3756_s24  }
  0x10   : > { %3717 = sst [smem:[#allocation29_spill]] %s2960_s25  ;;  %s2111_s29 = sadd.s32 4294967294, %s2968_s27  }
  0x11   : > { %3718 = sst [smem:[#allocation30_spill]] %s2964_s26  ;;  %s3113_s0 = sadd.s32 1, %s2968_s27  }
  0x12   : > { %3719 = sst [smem:[#allocation31_spill]] %s2968_s27  ;;  %s405_s30 = sadd.s32 1, %s2964_s26 }
  0x13   : > { %3720 = sst [smem:[#allocation32_spill]] %s3113_s0  ;;  %s402_s18 = ssub.s32 %s2968_s27, %s3113_s0 }
  0x14   : > { %p415_p0 = scmp.ne.s32.totalorder %s2964_s26, %s2960_s25  ;;  %p403_p1 = scmp.eq.s32.totalorder %s402_s18, 0 }
  0x15   : > { %p416_p2 = scmp.eq.s32.totalorder %s3109_s28, 1  ;;  %p421_p3 = scmp.ne.s32.totalorder %s2960_s25, %s2956_s24 }
  0x16   : > { %p422_p4 = scmp.eq.s32.totalorder %s2111_s29, 1  ;;  %p2112_p7 = scmp.ge.s32.totalorder %s2968_s27, 1 }
  0x17   : > { %s3124_s19 = scalar_select %p403_p1, %s2964_s26, %s405_s30  }
  0x18   : > { %p3126_p5 = por %p416_p2, %p415_p0  ;;  %p3130_p6 = por %p422_p4, %p421_p3 }
  0x19   : > { %3721 = sst [smem:[#allocation33_spill]] %s3124_s19  ;;  %p429_p8 = scmp.lt.s32.totalorder %s2968_s27, 3 }
  0x1a   : > { %s3722_s1 = scalar_select %p3126_p5, 1, 0 }
  0x1b   : > { %s3724_s20 = scalar_select %p3130_p6, 1, 0 }
  0x1c   : > { %3723 = sst [smem:[#allocation34_spill]] %s3722_s1  ;;  %p3704_p9 = scmp.eq.s32.totalorder %s3109_s28, 0 }
  0x1d   : > { %3725 = sst [smem:[#allocation35_spill]] %s3724_s20  ;;  %p3137_p10 = pnand %p2112_p7, %p429_p8 }
  0x1e   : > { %s2970_s22 = smov [#allocation5]   ;;  %s2971_s29 = smov [#allocation8]  }
  0x1f   : > { %s3726_s21 = scalar_select %p3137_p10, 1, 0 }
  0x20   : > { %s456_s23 = sshll.u32 %s2970_s22, 4  ;;  %p2405_p11 = pneg %p3137_p10  ;;  %s457_s23 = int_to_ptr.vmem [resolvable:$true] %s456_s23 }
  0x21   : > { %s481_s30 = sshll.u32 %s2971_s29, 4  ;;  %s2972_s19 = smov [#allocation11]   ;;  %s3149_s30 = int_to_ptr.vmem [resolvable:$true] %s481_s30 }
  0x22   : > { %p3145_p12 = pnand %p3704_p9, %p2405_p11  ;;  %s506_s26 = sshll.u32 %s2972_s19, 4  ;;  %s3151_s26 = int_to_ptr.vmem [resolvable:$true] %s506_s26 }
  0x23   : > { %s3728_s3 = sld [smem:[#allocation38_spill]] }
  0x24   : > { %p3161_p0 = pneg %p3145_p12 }
  0x29   : > { %s2574_s22 = scalar_lea.hbm %s3728_s3, 16 }
  0x2a   : > { %p2575_p13 = scmp.ne.s32.totalorder %s3728_s3, %s2574_s22  ;;  %p2581_p3 = scmp.lt.u32.totalorder %s2574_s22, %s3728_s3 }
  0x2c   : > { %p2577_p1 = pnand %p3161_p0, %p2575_p13 }
  0x2e   : > { %p2578_p2 = pneg %p2577_p1 }
  0x30   : > { %p2583_p4 = pnand %p2581_p3, %p2578_p2 }
  0x32   : > { %2586 = shalt.err (!%p2583_p4)
}
  0x33   : > { %s2587_s0 = scalar_lea.vmem %s457_s23, 16  ;;  %s2594_s24 = scalar_lea.vmem %s457_s23, 32 }
  0x34   : > { %p2588_p7 = scmp.ne.s32.totalorder %s457_s23, %s2587_s0  ;;  %p2595_p9 = scmp.lt.s32.totalorder %s457_s23, %s457_s23 }
  0x35   : > { %p2596_p6 = scmp.lt.s32.totalorder %s2594_s24, %s2587_s0 }
  0x36   : > { %p2590_p8 = pnand %p2588_p7, %p3161_p0 }
  0x37   : > { %p2597_p5 = por %p2596_p6, %p2595_p9 }
  0x38   : > { %p2591_p11 = pneg %p2590_p8 }
  0x3a   : > { %p2598_p10 = pnand %p2597_p5, %p2591_p11 }
  0x3c   : > { %2601 = shalt.err (!%p2598_p10)
}
  0x3d   : > { %2411 = dma.hbm_to_vmem [thread:$0]  (!%p3145_p12), %s3728_s3, 16, %s457_s23, [#allocation6]  }
  0x3e   : > { %s3730_s6 = sld [smem:[#allocation39_spill]] }
  0x44   : > { %s2602_s19 = scalar_lea.hbm %s3730_s6, 16 }
  0x45   : > { %p2603_p13 = scmp.ne.s32.totalorder %s3730_s6, %s2602_s19  ;;  %p2609_p5 = scmp.lt.u32.totalorder %s2602_s19, %s3730_s6 }
  0x47   : > { %p2605_p1 = pnand %p2603_p13, %p3161_p0 }
  0x49   : > { %p2606_p6 = pneg %p2605_p1 }
  0x4b   : > { %p2611_p9 = pnand %p2609_p5, %p2606_p6 }
  0x4d   : > { %2614 = shalt.err (!%p2611_p9)
}
  0x4e   : > { %s2615_s23 = scalar_lea.vmem %s3149_s30, 16  ;;  %s2622_s25 = scalar_lea.vmem %s3149_s30, 32 }
  0x4f   : > { %p2616_p10 = scmp.ne.s32.totalorder %s3149_s30, %s2615_s23  ;;  %p2623_p4 = scmp.lt.s32.totalorder %s3149_s30, %s3149_s30 }
  0x50   : > { %p2624_p7 = scmp.lt.s32.totalorder %s2622_s25, %s2615_s23 }
  0x51   : > { %p2618_p2 = pnand %p2616_p10, %p3161_p0 }
  0x52   : > { %p2625_p8 = por %p2624_p7, %p2623_p4 }
  0x53   : > { %p2619_p3 = pneg %p2618_p2 }
  0x55   : > { %p2626_p11 = pnand %p2625_p8, %p2619_p3 }
  0x57   : > { %2629 = shalt.err (!%p2626_p11)
}
  0x58   : > { %2417 = dma.hbm_to_vmem [thread:$0]  (!%p3145_p12), %s3730_s6, 16, %s3149_s30, [#allocation9]  }
  0x59   : > { %s2630_s22 = scalar_lea.hbm %s3688_s9, 16 }
  0x5a   : > { %p2631_p13 = scmp.ne.s32.totalorder %s3688_s9, %s2630_s22  ;;  %p2637_p5 = scmp.lt.u32.totalorder %s2630_s22, %s3688_s9 }
  0x5c   : > { %p2633_p1 = pnand %p2631_p13, %p3161_p0 }
  0x5e   : > { %p2634_p6 = pneg %p2633_p1 }
  0x60   : > { %p2639_p9 = pnand %p2637_p5, %p2634_p6 }
  0x62   : > { %2642 = shalt.err (!%p2639_p9)
}
  0x63   : > { %s2643_s30 = scalar_lea.vmem %s3151_s26, 16  ;;  %s2650_s25 = scalar_lea.vmem %s3151_s26, 32 }
  0x64   : > { %p2644_p10 = scmp.ne.s32.totalorder %s3151_s26, %s2643_s30  ;;  %p2651_p4 = scmp.lt.s32.totalorder %s3151_s26, %s3151_s26 }
  0x65   : > { %p2652_p7 = scmp.lt.s32.totalorder %s2650_s25, %s2643_s30 }
  0x66   : > { %p2646_p2 = pnand %p2644_p10, %p3161_p0 }
  0x67   : > { %p2653_p8 = por %p2652_p7, %p2651_p4 }
  0x68   : > { %p2647_p3 = pneg %p2646_p2 }
  0x6a   : > { %p2654_p11 = pnand %p2653_p8, %p2647_p3 }
  0x6c   : > { %2657 = shalt.err (!%p2654_p11)
}
  0x6d   : > { %2423 = dma.hbm_to_vmem [thread:$0]  (!%p3145_p12), %s3688_s9, 16, %s3151_s26, [#allocation12]  }
  0x6e   : > { %s2973_s20 = smov [#allocation14]   ;;  %s2658_s0 = scalar_lea.hbm %s3690_s11, 256 }
  0x6f   : > { %s527_s17 = sshll.u32 %s2973_s20, 4  ;;  %p2659_p13 = scmp.ne.s32.totalorder %s3690_s11, %s2658_s0  ;;  %s528_s17 = int_to_ptr.vmem [resolvable:$true] %s527_s17 }
  0x70   : > { %p2665_p5 = scmp.lt.u32.totalorder %s2658_s0, %s3690_s11 }
  0x71   : > { %p2661_p1 = pnand %p2659_p13, %p3161_p0 }
  0x73   : > { %p2662_p6 = pneg %p2661_p1 }
  0x75   : > { %p2667_p9 = pnand %p2665_p5, %p2662_p6 }
  0x77   : > { %2670 = shalt.err (!%p2667_p9)
}
  0x78   : > { %s2671_s26 = scalar_lea.vmem %s528_s17, 256  ;;  %p2679_p4 = scmp.lt.s32.totalorder %s528_s17, %s528_s17 }
  0x79   : > { %p2672_p10 = scmp.ne.s32.totalorder %s528_s17, %s2671_s26  ;;  %p2680_p7 = scmp.lt.s32.totalorder %s2671_s26, %s2671_s26 }
  0x7b   : > { %p2674_p2 = pnand %p2672_p10, %p3161_p0  ;;  %p2681_p8 = por %p2680_p7, %p2679_p4 }
  0x7d   : > { %p2675_p3 = pneg %p2674_p2 }
  0x7f   : > { %p2682_p11 = pnand %p2681_p8, %p2675_p3 }
  0x81   : > { %2685 = shalt.err (!%p2682_p11)
}
  0x82   : > { %s2974_s1 = smov 64   ;;  %s2975_s27 = smov 4  }
  0x83   : > { %2429 = dma.hbm_to_vmem [thread:$0]  (!%p3145_p12), %s3690_s11, 256, %s528_s17, [#allocation15], %s2974_s1, %s2974_s1, %s2975_s27  }
  0x84   : > { %s2976_s19 = smov [#allocation17]   ;;  %s2977_s24 = smov [#allocation2]  }
  0x85   : > { %s555_s0 = sshll.u32 %s2976_s19, 4  ;;  %s445_s23 = sshll.u32 %s2977_s24, 4  ;;  %s556_s0 = int_to_ptr.vmem [resolvable:$true] %s555_s0  ;;  %s3243_s23 = int_to_ptr.vmem [resolvable:$true] %s445_s23 }
  0x86   : > { %s2686_s26 = scalar_lea.hbm %s3693_s14, 16 }
  0x87   : > { %p2687_p13 = scmp.ne.s32.totalorder %s3693_s14, %s2686_s26  ;;  %p2693_p5 = scmp.lt.u32.totalorder %s2686_s26, %s3693_s14 }
  0x89   : > { %p2689_p1 = pnand %p2687_p13, %p3161_p0 }
  0x8b   : > { %p2690_p6 = pneg %p2689_p1 }
  0x8d   : > { %p2695_p9 = pnand %p2693_p5, %p2690_p6 }
  0x8f   : > { %2698 = shalt.err (!%p2695_p9)
}
  0x90   : > { %s2699_s1 = scalar_lea.vmem %s556_s0, 16  ;;  %s2706_s27 = scalar_lea.vmem %s556_s0, 32 }
  0x91   : > { %p2700_p10 = scmp.ne.s32.totalorder %s556_s0, %s2699_s1  ;;  %p2707_p4 = scmp.lt.s32.totalorder %s556_s0, %s556_s0 }
  0x92   : > { %p2708_p7 = scmp.lt.s32.totalorder %s2706_s27, %s2699_s1 }
  0x93   : > { %p2702_p2 = pnand %p2700_p10, %p3161_p0 }
  0x94   : > { %p2709_p8 = por %p2708_p7, %p2707_p4 }
  0x95   : > { %p2703_p3 = pneg %p2702_p2 }
  0x97   : > { %p2710_p11 = pnand %p2709_p8, %p2703_p3 }
  0x99   : > { %2713 = shalt.err (!%p2710_p11)
}
  0x9a   : > { %2435 = dma.hbm_to_vmem [thread:$0]  (!%p3145_p12), %s3693_s14, 16, %s556_s0, [#allocation18]  }
  0x9b   : > { %s2714_s24 = scalar_lea.hbm %s3681_s2, 16 }
  0x9c   : > { %p2715_p13 = scmp.ne.s32.totalorder %s3681_s2, %s2714_s24  ;;  %p2721_p5 = scmp.lt.u32.totalorder %s2714_s24, %s3681_s2 }
  0x9e   : > { %p2717_p1 = pnand %p2715_p13, %p3161_p0 }
  0xa0   : > { %p2718_p6 = pneg %p2717_p1 }
  0xa2   : > { %p2723_p9 = pnand %p2721_p5, %p2718_p6 }
  0xa4   : > { %2726 = shalt.err (!%p2723_p9)
}
  0xa5   : > { %s2727_s0 = scalar_lea.vmem %s3243_s23, 16  ;;  %s2734_s17 = scalar_lea.vmem %s3243_s23, 32 }
  0xa6   : > { %p2728_p10 = scmp.ne.s32.totalorder %s3243_s23, %s2727_s0  ;;  %p2735_p4 = scmp.lt.s32.totalorder %s3243_s23, %s3243_s23 }
  0xa7   : > { %p2736_p7 = scmp.lt.s32.totalorder %s2734_s17, %s2727_s0 }
  0xa8   : > { %p2730_p2 = pnand %p2728_p10, %p3161_p0 }
  0xa9   : > { %p2737_p8 = por %p2736_p7, %p2735_p4 }
  0xaa   : > { %p2731_p3 = pneg %p2730_p2 }
  0xac   : > { %p2738_p11 = pnand %p2737_p8, %p2731_p3 }
  0xae   : > { %2741 = shalt.err (!%p2738_p11)
}
  0xaf   : > { %2408 = dma.hbm_to_vmem [thread:$0]  (!%p3145_p12), %s3681_s2, 16, %s3243_s23, [#allocation3]  }
  0xb0   : > { %s2978_s3 = smov [#allocation7]   ;;  %s2979_s22 = smov [#allocation10]  }
  0xb1   : > { %s467_s6 = sshll.u32 %s2978_s3, 4  ;;  %s495_s19 = sshll.u32 %s2979_s22, 4  ;;  %s468_s6 = int_to_ptr.vmem [resolvable:$true] %s467_s6  ;;  %s3287_s19 = int_to_ptr.vmem [resolvable:$true] %s495_s19 }
  0xb2   : > { %s2742_s25 = scalar_lea.hbm %s3683_s4, 16 }
  0xb3   : > { %p2743_p13 = scmp.ne.s32.totalorder %s3683_s4, %s2742_s25  ;;  %p2749_p5 = scmp.lt.u32.totalorder %s2742_s25, %s3683_s4 }
  0xb5   : > { %p2745_p1 = pnand %p2743_p13, %p3161_p0 }
  0xb7   : > { %p2746_p6 = pneg %p2745_p1 }
  0xb9   : > { %p2751_p9 = pnand %p2749_p5, %p2746_p6 }
  0xbb   : > { %2754 = shalt.err (!%p2751_p9)
}
  0xbc   : > { %s2755_s17 = scalar_lea.vmem %s468_s6, 16  ;;  %s2762_s1 = scalar_lea.vmem %s468_s6, 32 }
  0xbd   : > { %p2756_p10 = scmp.ne.s32.totalorder %s468_s6, %s2755_s17  ;;  %p2763_p4 = scmp.lt.s32.totalorder %s468_s6, %s468_s6 }
  0xbe   : > { %p2764_p7 = scmp.lt.s32.totalorder %s2762_s1, %s2755_s17 }
  0xbf   : > { %p2758_p2 = pnand %p2756_p10, %p3161_p0 }
  0xc0   : > { %p2765_p8 = por %p2764_p7, %p2763_p4 }
  0xc1   : > { %p2759_p3 = pneg %p2758_p2 }
  0xc3   : > { %p2766_p11 = pnand %p2765_p8, %p2759_p3 }
  0xc5   : > { %2769 = shalt.err (!%p2766_p11)
}
  0xc6   : > { %2414 = dma.hbm_to_vmem [thread:$0]  (!%p3145_p12), %s3683_s4, 16, %s468_s6, [#allocation6]  }
  0xc7   : > { %s2770_s30 = scalar_lea.hbm %s3687_s8, 16 }
  0xc8   : > { %p2771_p13 = scmp.ne.s32.totalorder %s3687_s8, %s2770_s30  ;;  %p2777_p5 = scmp.lt.u32.totalorder %s2770_s30, %s3687_s8 }
  0xca   : > { %p2773_p1 = pnand %p2771_p13, %p3161_p0 }
  0xcc   : > { %p2774_p6 = pneg %p2773_p1 }
  0xce   : > { %p2779_p9 = pnand %p2777_p5, %p2774_p6 }
  0xd0   : > { %2782 = shalt.err (!%p2779_p9)
}
  0xd1   : > { %s2783_s6 = scalar_lea.vmem %s3287_s19, 16  ;;  %s2790_s23 = scalar_lea.vmem %s3287_s19, 32 }
  0xd2   : > { %p2784_p10 = scmp.ne.s32.totalorder %s3287_s19, %s2783_s6  ;;  %p2791_p4 = scmp.lt.s32.totalorder %s3287_s19, %s3287_s19 }
  0xd3   : > { %p2792_p7 = scmp.lt.s32.totalorder %s2790_s23, %s2783_s6 }
  0xd4   : > { %p2786_p2 = pnand %p2784_p10, %p3161_p0 }
  0xd5   : > { %p2793_p8 = por %p2792_p7, %p2791_p4 }
  0xd6   : > { %p2787_p3 = pneg %p2786_p2 }
  0xd8   : > { %p2794_p11 = pnand %p2793_p8, %p2787_p3 }
  0xda   : > { %2797 = shalt.err (!%p2794_p11)
}
  0xdb   : > { %2420 = dma.hbm_to_vmem [thread:$0]  (!%p3145_p12), %s3687_s8, 16, %s3287_s19, [#allocation9]  }
  0xdc   : > { %s2980_s27 = smov [#allocation13]   ;;  %s2981_s22 = smov [#allocation16]  }
  0xdd   : > { %s517_s3 = sshll.u32 %s2980_s27, 4  ;;  %s541_s24 = sshll.u32 %s2981_s22, 4  ;;  %s518_s3 = int_to_ptr.vmem [resolvable:$true] %s517_s3  ;;  %s3331_s24 = int_to_ptr.vmem [resolvable:$true] %s541_s24 }
  0xde   : > { %s2798_s26 = scalar_lea.hbm %s3689_s10, 16 }
  0xdf   : > { %p2799_p13 = scmp.ne.s32.totalorder %s3689_s10, %s2798_s26  ;;  %p2805_p5 = scmp.lt.u32.totalorder %s2798_s26, %s3689_s10 }
  0xe1   : > { %p2801_p1 = pnand %p2799_p13, %p3161_p0 }
  0xe3   : > { %p2802_p6 = pneg %p2801_p1 }
  0xe5   : > { %p2807_p9 = pnand %p2805_p5, %p2802_p6 }
  0xe7   : > { %2810 = shalt.err (!%p2807_p9)
}
  0xe8   : > { %s2811_s23 = scalar_lea.vmem %s518_s3, 16  ;;  %s2818_s17 = scalar_lea.vmem %s518_s3, 32 }
  0xe9   : > { %p2812_p10 = scmp.ne.s32.totalorder %s518_s3, %s2811_s23  ;;  %p2819_p4 = scmp.lt.s32.totalorder %s518_s3, %s518_s3 }
  0xea   : > { %p2820_p7 = scmp.lt.s32.totalorder %s2818_s17, %s2811_s23 }
  0xeb   : > { %p2814_p2 = pnand %p2812_p10, %p3161_p0 }
  0xec   : > { %p2821_p8 = por %p2820_p7, %p2819_p4 }
  0xed   : > { %p2815_p3 = pneg %p2814_p2 }
  0xef   : > { %p2822_p11 = pnand %p2821_p8, %p2815_p3 }
  0xf1   : > { %2825 = shalt.err (!%p2822_p11)
}
  0xf2   : > { %2426 = dma.hbm_to_vmem [thread:$0]  (!%p3145_p12), %s3689_s10, 16, %s518_s3, [#allocation12]  }
  0xf3   : > { %s2826_s25 = scalar_lea.hbm %s3691_s12, 16 }
  0xf4   : > { %p2827_p13 = scmp.ne.s32.totalorder %s3691_s12, %s2826_s25  ;;  %p2833_p5 = scmp.lt.u32.totalorder %s2826_s25, %s3691_s12 }
  0xf6   : > { %p2829_p1 = pnand %p2827_p13, %p3161_p0 }
  0xf8   : > { %p2830_p6 = pneg %p2829_p1 }
  0xfa   : > { %p2835_p9 = pnand %p2833_p5, %p2830_p6 }
  0xfc   : > { %2838 = shalt.err (!%p2835_p9)
}
  0xfd   : > { %s2839_s3 = scalar_lea.vmem %s3331_s24, 16  ;;  %s2846_s19 = scalar_lea.vmem %s3331_s24, 32 }
  0xfe   : > { %p2840_p10 = scmp.ne.s32.totalorder %s3331_s24, %s2839_s3  ;;  %p2847_p4 = scmp.lt.s32.totalorder %s3331_s24, %s3331_s24 }
  0xff   : > { %p2848_p7 = scmp.lt.s32.totalorder %s2846_s19, %s2839_s3 }
 0x100   : > { %p2842_p2 = pnand %p2840_p10, %p3161_p0 }
 0x101   : > { %p2849_p8 = por %p2848_p7, %p2847_p4 }
 0x102   : > { %p2843_p3 = pneg %p2842_p2 }
 0x104   : > { %p2850_p11 = pnand %p2849_p8, %p2843_p3 }
 0x106   : > { %2853 = shalt.err (!%p2850_p11)
}
 0x107   : > { %2432 = dma.hbm_to_vmem [thread:$0]  (!%p3145_p12), %s3691_s12, 16, %s3331_s24, [#allocation15]  }
 0x108   : > { %s2982_s1 = smov [#allocation19]   ;;  %s2854_s25 = scalar_lea.hbm %s3695_s16, 80 }
 0x109   : > { %s569_s27 = sshll.u32 %s2982_s1, 4  ;;  %p2855_p13 = scmp.ne.s32.totalorder %s3695_s16, %s2854_s25  ;;  %s570_s27 = int_to_ptr.vmem [resolvable:$true] %s569_s27 }
 0x10a   : > { %p2861_p5 = scmp.lt.u32.totalorder %s2854_s25, %s3695_s16 }
 0x10b   : > { %p2857_p1 = pnand %p2855_p13, %p3161_p0 }
 0x10d   : > { %p2858_p6 = pneg %p2857_p1 }
 0x10f   : > { %p2863_p9 = pnand %p2861_p5, %p2858_p6 }
 0x111   : > { %2866 = shalt.err (!%p2863_p9)
}
 0x112   : > { %s2867_s24 = scalar_lea.vmem %s570_s27, 80  ;;  %s2874_s3 = scalar_lea.vmem %s570_s27, 96 }
 0x113   : > { %p2868_p10 = scmp.ne.s32.totalorder %s570_s27, %s2867_s24  ;;  %p2875_p4 = scmp.lt.s32.totalorder %s570_s27, %s570_s27 }
 0x114   : > { %p2876_p7 = scmp.lt.s32.totalorder %s2874_s3, %s2867_s24 }
 0x115   : > { %p2870_p2 = pnand %p2868_p10, %p3161_p0 }
 0x116   : > { %p2877_p8 = por %p2876_p7, %p2875_p4 }
 0x117   : > { %p2871_p3 = pneg %p2870_p2 }
 0x119   : > { %p2878_p11 = pnand %p2877_p8, %p2871_p3 }
 0x11b   : > { %2881 = shalt.err (!%p2878_p11)
}
 0x11c   : > { %2438 = dma.hbm_to_vmem [thread:$0]  (!%p3145_p12), %s3695_s16, 80, %s570_s27, [#allocation18]  }
 0x11d   : > { %p3731_p13 = scmp.ne.s32.totalorder %s3726_s21, 0 }
 0x11e   : > { %p3732_p1 = scmp.eq.s32.totalorder (!%p3731_p13), %s3109_s28, 0 }
 0x11f   : > { %589 = sbr.rel (%p3731_p13) target bundleno = 4463 (0x116f), region = 88 }
 0x126   : > { %2927 = dma.done.wait (%p3732_p1), [#allocation3], 16   ;;  %p3733_p0 = pmov %p3732_p1 }
 0x128   : > { %2929 = vsyncadd (%p3733_p0), [#allocation3], 4294967280  ;;  %p3734_p6 = pmov %p3733_p0 }
 0x129   : > { %p3735_p5 = pmov %p3733_p0 }
 0x12a   : > { %2931 = dma.done.wait (%p3734_p6), [#allocation6], 32  }
 0x12b   : > { %2933 = vsyncadd (%p3735_p5), [#allocation6], 4294967264  ;;  %p3736_p9 = pmov %p3733_p0 }
 0x12c   : > { %p3737_p12 = pmov %p3733_p0 }
 0x12d   : > { %2935 = dma.done.wait (%p3736_p9), [#allocation9], 32  }
 0x12e   : > { %2937 = vsyncadd (%p3737_p12), [#allocation9], 4294967264  ;;  %p3738_p10 = pmov %p3733_p0 }
 0x12f   : > { %p3739_p2 = pmov %p3733_p0 }
 0x130   : > { %2939 = dma.done.wait (%p3738_p10), [#allocation12], 32  }
 0x131   : > { %2941 = vsyncadd (%p3739_p2), [#allocation12], 4294967264  ;;  %p3740_p3 = pmov %p3733_p0 }
 0x132   : > { %p3741_p4 = pmov %p3733_p0 }
 0x133   : > { %2943 = dma.done.wait (%p3740_p3), [#allocation15], 272  }
 0x134   : > { %2945 = vsyncadd (%p3741_p4), [#allocation15], 4294967024  ;;  %p3742_p7 = pmov %p3733_p0 }
 0x135   : > { %p3743_p8 = pmov %p3733_p0 }
 0x136   : > { %2947 = dma.done.wait (%p3742_p7), [#allocation18], 96  }
 0x137   : > { %2949 = vsyncadd (%p3743_p8), [#allocation18], 4294967200  ;;  %p680_p11 = scmp.lt.s32.totalorder %s3109_s28, 1  ;;  %v2983_v0 = vmov 0.0   ;;  %vm2984_vm0 = vmmov 0   ;;  %s3744_s1 = sld [smem:[#allocation36_spill]] }
 0x138   : > { %2235 = vmatprep.subr.bf16.mxu0 %v2983_v0  ;;  %2237 = vmatprep.mubr.msk.bf16.mxu0 %vm2984_vm0, %v2983_v0  ;;  %s3745_s25 = sld [smem:[#allocation37_spill]]  ;;  %vm702_vm1 = vcmask 130048   ;;  %v2138_v4 = vld [vmem:[#allocation2] ss:$0 sm:$0xff]  ;;  %vm748_vm2 = vcmask 261120   ;;  %v2527_v17 = vld [vmem:[%s3684_s5 + $0x8] sm:$0xff]  }
 0x139   : > { %s681_s21 = scalar_select %p680_p11, %s3109_s28, 1  ;;  %2241 = vmatprep.subr.bf16.mxu1 %v2983_v0  ;;  %2245 = vmatprep.mubr.msk.bf16.mxu1 %vm2984_vm0, %v2983_v0  ;;  %v2526_v16 = vld [vmem:[%s3684_s5] sm:$0xff]   ;;  %vm848_vm3 = vcmask 64512   ;;  %vm912_vm4 = vcmask 1043456  }
 0x13a   : > { %2242 = vmatpush3.bf16.msra.mxu1 %v2526_v16  ;;  %v2141_v22 = vld [vmem:[#allocation5] ss:$0 sm:$0xff]  ;;  %v2142_v24 = vld [vmem:[#allocation7] ss:$0 sm:$0xff]  ;;  %v2143_v28 = vld [vmem:[#allocation8] ss:$0 sm:$0xff] }
 0x13b   : > { %s2137_s18 = sshll.u32 %s681_s21, 3  ;;  %2243 = vmatprep.subr.bf16.mxu1 %v2983_v0  ;;  %s2985_s24 = smov 120  }
 0x13c   : > { %s2986_s3 = smov 96   ;;  %s2987_s19 = smov 88  }
 0x13d   : > { %s683_s27 = scalar_lea.vmem %s3744_s1, %s2137_s18  ;;  %s2988_s23 = smov 56  }
 0x13e   : > { %v2525_v1 = vld [vmem:[%s3745_s25] sm:$0xff]   ;;  %2244 = vmatpush3.bf16.msra.mxu1 %v2527_v17  ;;  %s2989_s21 = smov 64   ;;  %s2990_s18 = smov 80  }
 0x13f   : > { %v685_v2 = vld [vmem:[%s683_s27] sm:$0xff]  ;;  %2236 = vmatpush3.bf16.msra.mxu0 %v2525_v1  ;;  %2255 = vmatprep.subr.bf16.mxu1 %v2983_v0  ;;  %s2991_s29 = smov 112   ;;  %s2992_s30 = smov 48  }
 0x140   : > { %v688_v3 = vpack.c.bf16 %v685_v2, %v685_v2  ;;  %2249 = vmatprep.subr.bf16.mxu0 %v2983_v0  ;;  %s2993_s25 = smov 104   ;;  %s2994_s26 = smov 72  }
 0x141   : > { %s2995_s6 = smov 40   ;;  %s3747_s1 = sld [smem:[#allocation34_spill]] }
 0x142   : > { %2238 = vmatmul.mubr.msk.bf16.vlgmr.msra.gmra.mrb[0].mxu0 %vm702_vm1, %v688_v3  ;;  %s2358_s27 = smul.u32 640, %s3109_s28 }
 0x143   : > { %2251 = vmatprep.mubr.msk.bf16.mxu0 %vm2984_vm0, %v2983_v0 }
 0x147   : > { %p3750_p1 = scmp.ne.s32.totalorder %s3747_s1, 0 }
 0x215   : > { %v740_v5 = vpop.f32.mrb[0].mxu0 }
 0x216   : > { %v3436_v6 = vadd.f32 %v2138_v4, %v740_v5  ;;  %v2239_v7 = vpop.f32.mrb[1].mxu0 }
 0x217   : > { %v743_v8 = vpop.f32.mrb[2].mxu0 }
 0x218   : > { %v2240_v9 = vpop.f32.mrb[3].mxu0  ;;  %v749_v10 = vsel %vm748_vm2, %v3436_v6, 0.0 }
 0x219   : > { %750 = vadd.xlane.f32.xlu0 %v749_v10  ;;  %v956_v10 = vld [vmem:[%s3686_s7] sm:$0xf] }
 0x2a6   : > { %v751_v11 = vpop.xlane.xlu0 %750 }
 0x2a7   : > { %v753_v12 = vmul.f32 0.03125, %v751_v11  ;;  %v1120_v11 = vsel %vm912_vm4, %v956_v10, 0 }
 0x2a9   : > { %v754_v13 = vsub.f32 %v3436_v6, %v753_v12  ;;  %v1068_v12 = vld [vmem:[%s3686_s7 + $0x4] sm:$0xf] }
 0x2ab   : > { %v755_v14 = vmul.f32 %v754_v13, %v754_v13 }
 0x2ad   : > { %v756_v15 = vsel %vm748_vm2, %v755_v14, 0.0 }
 0x2ae   : > { %757 = vadd.xlane.f32.xlu0 %v756_v15 }
 0x33b   : > { %v758_v18 = vpop.xlane.xlu0 %757 }
 0x33c   : > { %v759_v19 = vmul.f32 0.03125, %v758_v18 }
 0x33e   : > { %v760_v20 = vadd.f32 1e-05, %v759_v19 }
 0x340   : > { %2552 = vrsqrt.f32 %v760_v20 }
 0x34a   : > { %v2553_v21 = vpop.eup %2552 }
 0x34b   : > { %v762_v23 = vmul.f32 %v2553_v21, %v754_v13  ;;  %v1074_v13 = vsel %vm912_vm4, %v1068_v12, 0 }
 0x34d   : > { %v769_v25 = vmul.f32 %v2141_v22, %v762_v23 }
 0x34f   : > { %v776_v26 = vadd.f32 %v2142_v24, %v769_v25 }
 0x351   : > { %v781_v27 = vpack.c.bf16 %v776_v26, %v776_v26 }
 0x353   : > { %2246 = vmatmul.mubr.msk.bf16.vlgmr.msra.gmra.mrb[0].mxu1 %vm748_vm2, %v781_v27 }
 0x354   : > { %2257 = vmatprep.mubr.msk.bf16.mxu1 %vm2984_vm0, %v2983_v0 }
 0x426   : > { %v838_v29 = vpop.f32.mrb[0].mxu1 }
 0x427   : > { %v839_v30 = vadd.f32 %v2143_v28, %v838_v29  ;;  %v2247_v31 = vpop.f32.mrb[1].mxu1 }
 0x428   : > { %v841_v32 = vpop.f32.mrb[2].mxu1 }
 0x429   : > { %v3453_v33 = vpack.c.bf16 %v839_v30, %v839_v30  ;;  %v2248_v34 = vpop.f32.mrb[3].mxu1 }
 0x42b   : > { %958 = vrot.lane.b32.xlu0 %v3453_v33, %s2985_s24  ;;  %846 = vrot.lane.b32.xlu1 %v3453_v33, %s2986_s3  ;;  %s3746_s24 = sld [smem:[#allocation29_spill]]  ;;  %s2997_s3 = smov [#allocation20]  }
 0x42f   : > { %960 = vrot.lane.b32.xlu1 %v3453_v33, %s2987_s19  ;;  %s2886_s19 = sshll.u32 %s2997_s3, 4  ;;  %s2887_s19 = int_to_ptr.vmem [resolvable:$false] %s2886_s19 }
 0x49d   : > { %v847_v35 = vpop.permute.xlu1 %846  ;;  %v959_v39 = vpop.permute.xlu0 %958 }
 0x49e   : > { %v853_v36 = vsel %vm848_vm3, %v847_v35, 0 }
 0x49f   : > { %2250 = vmatpush3.bf16.xpose.msra.mxu0 %v853_v36 }
 0x4a0   : > { %2261 = vmatprep.subr.bf16.mxu0 %v2983_v0 }
 0x4a1   : > { %v961_v37 = vpop.permute.xlu1 %960 }
 0x4a2   : > { %v966_v38 = vsel %vm848_vm3, %v961_v37, 0 }
 0x4a6   : > { %2252 = vmatmul.mubr.msk.bf16.vlgmr.msra.gmra.mrb[4].mxu0 %vm848_vm3, %v3453_v33 }
 0x4a7   : > { %2262 = vmatpush3.bf16.xpose.msra.mxu0 %v966_v38  ;;  %2263 = vmatprep.mubr.msk.bf16.mxu0 %vm2984_vm0, %v2983_v0 }
 0x4a8   : > { %2273 = vmatprep.subr.bf16.mxu0 %v2983_v0 }
 0x4ae   : > { %2264 = vmatmul.mubr.msk.bf16.vlgmr.msra.gmra.mrb[8].mxu0 %vm848_vm3, %v959_v39 }
 0x4af   : > { %2275 = vmatprep.mubr.msk.bf16.mxu0 %vm2984_vm0, %v2983_v0  ;;  %2274 = vmatpush3.bf16.msra.mxu0 %v1074_v13 }
 0x4b0   : > { %2285 = vmatprep.subr.bf16.mxu0 %v2983_v0 }
 0x579   : > { %v889_v40 = vpop.f32.mrb[4].mxu0 }
 0x57a   : > { %v2253_v41 = vpop.f32.mrb[5].mxu0  ;;  %v895_v42 = vsel %vm848_vm3, %v889_v40, -inf }
 0x57b   : > { %896 = vmax.xlane.f32.xlu1 %v895_v42  ;;  %v892_v43 = vpop.f32.mrb[6].mxu0 }
 0x57c   : > { %v2254_v44 = vpop.f32.mrb[7].mxu0 }
 0x581   : > { %v1002_v45 = vpop.f32.mrb[8].mxu0 }
 0x582   : > { %v2265_v46 = vpop.f32.mrb[9].mxu0  ;;  %v1008_v47 = vsel %vm848_vm3, %v1002_v45, -inf }
 0x583   : > { %1009 = vmax.xlane.f32.xlu0 %v1008_v47  ;;  %v1005_v48 = vpop.f32.mrb[10].mxu0 }
 0x584   : > { %v2266_v49 = vpop.f32.mrb[11].mxu0 }
 0x599   : > { %1020 = vrot.lane.b32.xlu0 %v3453_v33, %s2988_s23  ;;  %s2888_s23 = scalar_lea.vmem %s2887_s19, 1280 }
 0x608   : > { %v897_v50 = vpop.xlane.xlu1 %896 }
 0x609   : > { %v898_v51 = vsub.f32 %v889_v40, %v897_v50 }
 0x60b   : > { %v899_v52 = vmul.f32 1.442695, %v898_v51 }
 0x60d   : > { %2554 = vpow2.f32 %v899_v52 }
 0x610   : > { %v1010_v53 = vpop.xlane.xlu0 %1009 }
 0x611   : > { %v1011_v54 = vsub.f32 %v1002_v45, %v1010_v53 }
 0x613   : > { %v1012_v55 = vmul.f32 1.442695, %v1011_v54 }
 0x614   : > { %v1021_v3 = vpop.permute.xlu0 %1020 }
 0x615   : > { %2556 = vpow2.f32 %v1012_v55  ;;  %v1026_v5 = vsel %vm912_vm4, %v1021_v3, 0 }
 0x617   : > { %v2555_v56 = vpop.eup %2554 }
 0x618   : > { %v901_v57 = vsel %vm848_vm3, %v2555_v56, 0.0 }
 0x619   : > { %902 = vadd.xlane.f32.xlu1 %v901_v57 }
 0x61f   : > { %v2557_v58 = vpop.eup %2556 }
 0x620   : > { %v1014_v59 = vsel %vm848_vm3, %v2557_v58, 0.0 }
 0x621   : > { %1015 = vadd.xlane.f32.xlu1 %v1014_v59 }
 0x632   : > { %907 = vrot.lane.b32.xlu1 %v3453_v33, %s2989_s21 }
 0x636   : > { %1164 = vrot.lane.b32.xlu1 %v3453_v33, %s2990_s18  ;;  %s677_s18 = sand.u32 1, %s3746_s24  }
 0x63a   : > { %1162 = vrot.lane.b32.xlu1 %v3453_v33, %s2991_s29  ;;  %s2357_s29 = smul.u32 40, %s677_s18 }
 0x63c   : > { %s679_s17 = scalar_lea.vmem [#allocation20], %s2357_s29 }
 0x63d   : > { %s1945_s22 = sshll.u32 %s679_s17, 4  ;;  %s3637_s22 = int_to_ptr.vmem [resolvable:$true] %s1945_s22 }
 0x63e   : > { %s2882_s28 = scalar_lea.vmem %s3637_s22, 640  ;;  %p2889_p5 = scmp.lt.s32.totalorder %s3637_s22, %s2887_s19 }
 0x63f   : > { %p2883_p13 = scmp.ne.s32.totalorder %s3637_s22, %s2882_s28  ;;  %p2890_p9 = scmp.lt.s32.totalorder %s2888_s23, %s2882_s28 }
 0x641   : > { %p2884_p0 = pnand %p2883_p13, %p3750_p1  ;;  %p2891_p12 = por %p2890_p9, %p2889_p5 }
 0x643   : > { %p2885_p6 = pneg %p2884_p0 }
 0x645   : > { %p2892_p10 = pnand %p2891_p12, %p2885_p6 }
 0x6a6   : > { %v903_v60 = vpop.xlane.xlu1 %902 }
 0x6a7   : > { %2558 = vrcp.f32 %v903_v60 }
 0x6ae   : > { %v1016_v61 = vpop.xlane.xlu1 %1015 }
 0x6af   : > { %2560 = vrcp.f32 %v1016_v61 }
 0x6b1   : > { %v2559_v62 = vpop.eup %2558 }
 0x6b2   : > { %v905_v63 = vmul.f32 %v2559_v62, %v2555_v56  ;;  %v908_v1 = vpop.permute.xlu1 %907  ;;  %v1272_v56 = vld [vmem:[%s3686_s7 + $0x8] sm:$0xf] }
 0x6b3   : > { %v914_v2 = vsel %vm912_vm4, %v908_v1, 0  ;;  %v1278_v57 = vsel %vm912_vm4, %v1272_v56, 0  ;;  %v2532_v56 = vld [vmem:[%s3692_s13 + $0x10] sm:$0xff]  }
 0x6b4   : > { %2256 = vmatpush3.bf16.msra.mxu1 %v914_v2  ;;  %v906_v4 = vpack.c.bf16 %v905_v63, %v905_v63 }
 0x6b5   : > { %2267 = vmatprep.subr.bf16.mxu1 %v2983_v0 }
 0x6b6   : > { %v1165_v19 = vpop.permute.xlu1 %1164 }
 0x6b7   : > { %2258 = vmatmul.mubr.msk.bf16.vlgmr.msra.gmra.mrb[4].mxu1 %vm848_vm3, %v906_v4  ;;  %v1170_v24 = vsel %vm848_vm3, %v1165_v19, 0 }
 0x6b8   : > { %2268 = vmatpush3.bf16.msra.mxu1 %v1026_v5  ;;  %2269 = vmatprep.mubr.msk.bf16.mxu1 %vm2984_vm0, %v2983_v0 }
 0x6b9   : > { %v2561_v7 = vpop.eup %2560  ;;  %2279 = vmatprep.subr.bf16.mxu1 %v2983_v0 }
 0x6ba   : > { %v1018_v8 = vmul.f32 %v2561_v7, %v2557_v58  ;;  %v1163_v26 = vpop.permute.xlu1 %1162 }
 0x6bc   : > { %v1019_v9 = vpack.c.bf16 %v1018_v8, %v1018_v8 }
 0x6bf   : > { %2270 = vmatmul.mubr.msk.bf16.vlgmr.msra.gmra.mrb[8].mxu1 %vm848_vm3, %v1019_v9 }
 0x6c0   : > { %2281 = vmatprep.mubr.msk.bf16.mxu1 %vm2984_vm0, %v2983_v0  ;;  %2280 = vmatpush3.bf16.msra.mxu1 %v1120_v11 }
 0x6c1   : > { %2291 = vmatprep.subr.bf16.mxu1 %v2983_v0 }
 0x78a   : > { %v950_v14 = vpop.f32.mrb[4].mxu1 }
 0x78b   : > { %v957_v15 = vpack.c.bf16 %v950_v14, %v950_v14  ;;  %v2259_v16 = vpop.f32.mrb[5].mxu1 }
 0x78c   : > { %v953_v17 = vpop.f32.mrb[6].mxu1 }
 0x78d   : > { %v2260_v18 = vpop.f32.mrb[7].mxu1  ;;  %2282 = vmatmul.mubr.msk.bf16.vlgmr.msra.gmra.mrb[12].mxu1 %vm848_vm3, %v957_v15 }
 0x78e   : > { %2293 = vmatprep.mubr.msk.bf16.mxu1 %vm2984_vm0, %v2983_v0 }
 0x792   : > { %v1062_v20 = vpop.f32.mrb[8].mxu1 }
 0x793   : > { %v1069_v21 = vpack.c.bf16 %v1062_v20, %v1062_v20  ;;  %v2271_v22 = vpop.f32.mrb[9].mxu1 }
 0x794   : > { %v1065_v23 = vpop.f32.mrb[10].mxu1 }
 0x795   : > { %v2272_v25 = vpop.f32.mrb[11].mxu1  ;;  %2276 = vmatmul.mubr.msk.bf16.vlgmr.msra.gmra.mrb[12].mxu0 %vm848_vm3, %v1069_v21 }
 0x796   : > { %2286 = vmatpush3.bf16.xpose.msra.mxu0 %v1170_v24  ;;  %2287 = vmatprep.mubr.msk.bf16.mxu0 %vm2984_vm0, %v2983_v0 }
 0x797   : > { %2297 = vmatprep.subr.bf16.mxu0 %v2983_v0 }
 0x79d   : > { %2288 = vmatmul.mubr.msk.bf16.vlgmr.msra.gmra.mrb[16].mxu0 %vm848_vm3, %v1163_v26 }
 0x79e   : > { %2299 = vmatprep.mubr.msk.bf16.mxu0 %vm2984_vm0, %v2983_v0  ;;  %2298 = vmatpush3.bf16.msra.mxu0 %v1278_v57  ;;  %v2533_v57 = vld [vmem:[%s3692_s13 + $0x18] sm:$0xff]  }
 0x79f   : > { %2309 = vmatprep.subr.bf16.mxu0 %v2983_v0 }
 0x860   : > { %v1156_v27 = vpop.f32.mrb[12].mxu1 }
 0x861   : > { %v2283_v28 = vpop.f32.mrb[13].mxu1 }
 0x862   : > { %v1159_v29 = vpop.f32.mrb[14].mxu1 }
 0x863   : > { %v2284_v30 = vpop.f32.mrb[15].mxu1 }
 0x868   : > { %v1110_v31 = vpop.f32.mrb[12].mxu0 }
 0x869   : > { %v3508_v32 = vadd.f32 %v1156_v27, %v1110_v31  ;;  %v2277_v34 = vpop.f32.mrb[13].mxu0  ;;  %v2159_v31 = vld [vmem:[#allocation10] ss:$0 sm:$0xff] }
 0x86a   : > { %v1113_v35 = vpop.f32.mrb[14].mxu0 }
 0x86b   : > { %v2278_v36 = vpop.f32.mrb[15].mxu0 }
 0x870   : > { %v1206_v37 = vpop.f32.mrb[16].mxu0 }
 0x871   : > { %v2289_v38 = vpop.f32.mrb[17].mxu0  ;;  %v1212_v39 = vsel %vm848_vm3, %v1206_v37, -inf }
 0x872   : > { %1213 = vmax.xlane.f32.xlu1 %v1212_v39  ;;  %v1209_v40 = vpop.f32.mrb[18].mxu0 }
 0x873   : > { %v2290_v41 = vpop.f32.mrb[19].mxu0 }
 0x883   : > { %1224 = vrot.lane.b32.xlu1 %v3453_v33, %s2992_s30 }
 0x887   : > { %1321 = vrot.lane.b32.xlu1 %v3453_v33, %s2993_s25 }
 0x8ff   : > { %v1214_v42 = vpop.xlane.xlu1 %1213 }
 0x900   : > { %v1215_v43 = vsub.f32 %v1206_v37, %v1214_v42 }
 0x902   : > { %v1216_v44 = vmul.f32 1.442695, %v1215_v43  ;;  %v2528_v43 = vld [vmem:[#allocation14] sm:$0xff]  }
 0x903   : > { %v1225_v45 = vpop.permute.xlu1 %1224 }
 0x904   : > { %2562 = vpow2.f32 %v1216_v44  ;;  %v1230_v46 = vsel %vm912_vm4, %v1225_v45, 0  ;;  %v2529_v44 = vld [vmem:[#allocation14 + $0x8] sm:$0xff]  }
 0x905   : > { %2292 = vmatpush3.bf16.msra.mxu1 %v1230_v46 }
 0x906   : > { %2303 = vmatprep.subr.bf16.mxu1 %v2983_v0 }
 0x907   : > { %v1322_v55 = vpop.permute.xlu1 %1321 }
 0x90e   : > { %v2563_v47 = vpop.eup %2562 }
 0x90f   : > { %v1218_v48 = vsel %vm848_vm3, %v2563_v47, 0.0 }
 0x910   : > { %1219 = vadd.xlane.f32.xlu0 %v1218_v48 }
 0x926   : > { %1323 = vrot.lane.b32.xlu0 %v3453_v33, %s2994_s26  ;;  %s3748_s26 = sld [smem:[#allocation40_spill]] }
 0x92c   : > { %s3749_s20 = smov %s3748_s26  ;;  %s3635_s0 = scalar_lea.hbm %s3748_s26, %s2358_s27 }
 0x99d   : > { %v1220_v49 = vpop.xlane.xlu0 %1219 }
 0x99e   : > { %2564 = vrcp.f32 %v1220_v49  ;;  %v2160_v49 = vld [vmem:[#allocation11] ss:$0 sm:$0xff] }
 0x9a1   : > { %v1324_v52 = vpop.permute.xlu0 %1323 }
 0x9a2   : > { %v1329_v54 = vsel %vm848_vm3, %v1324_v52, 0 }
 0x9a8   : > { %v2565_v50 = vpop.eup %2564 }
 0x9a9   : > { %v1222_v51 = vmul.f32 %v2565_v50, %v2563_v47 }
 0x9ab   : > { %v1223_v53 = vpack.c.bf16 %v1222_v51, %v1222_v51  ;;  %v2161_v51 = vld [vmem:[#allocation13] ss:$0 sm:$0xff] }
 0x9ad   : > { %2294 = vmatmul.mubr.msk.bf16.vlgmr.msra.gmra.mrb[16].mxu1 %vm848_vm3, %v1223_v53 }
 0x9ae   : > { %2304 = vmatpush3.bf16.xpose.msra.mxu1 %v1329_v54  ;;  %2305 = vmatprep.mubr.msk.bf16.mxu1 %vm2984_vm0, %v2983_v0 }
 0x9af   : > { %2315 = vmatprep.subr.bf16.mxu1 %v2983_v0 }
 0x9b5   : > { %2306 = vmatmul.mubr.msk.bf16.vlgmr.msra.gmra.mrb[20].mxu1 %vm848_vm3, %v1322_v55  ;;  %v2531_v55 = vld [vmem:[%s3692_s13 + $0x8] sm:$0xff]  }
 0x9b6   : > { %2317 = vmatprep.mubr.msk.bf16.mxu1 %vm2984_vm0, %v2983_v0 }
 0xa80   : > { %v1266_v58 = vpop.f32.mrb[16].mxu1 }
 0xa81   : > { %v1273_v59 = vpack.c.bf16 %v1266_v58, %v1266_v58  ;;  %v2295_v60 = vpop.f32.mrb[17].mxu1  ;;  %v2534_v58 = vld [vmem:[%s3692_s13 + $0x20] sm:$0xff]  }
 0xa82   : > { %v1269_v61 = vpop.f32.mrb[18].mxu1  ;;  %v2536_v60 = vld [vmem:[%s3692_s13 + $0x30] sm:$0xff]  }
 0xa83   : > { %v2296_v62 = vpop.f32.mrb[19].mxu1  ;;  %2300 = vmatmul.mubr.msk.bf16.vlgmr.msra.gmra.mrb[20].mxu0 %vm848_vm3, %v1273_v59  ;;  %v2535_v59 = vld [vmem:[%s3692_s13 + $0x28] sm:$0xff]   ;;  %v2537_v61 = vld [vmem:[%s3692_s13 + $0x38] sm:$0xff]  }
 0xa84   : > { %2311 = vmatprep.mubr.msk.bf16.mxu0 %vm2984_vm0, %v2983_v0  ;;  %v2538_v62 = vld [vmem:[%s3694_s15] ss:$20 sps:$4 sm:$0xff]  }
 0xa88   : > { %v1365_v63 = vpop.f32.mrb[20].mxu1 }
 0xa89   : > { %v2307_v1 = vpop.f32.mrb[21].mxu1  ;;  %v1371_v2 = vsel %vm848_vm3, %v1365_v63, -inf }
 0xa8a   : > { %1372 = vmax.xlane.f32.xlu1 %v1371_v2  ;;  %v1368_v3 = vpop.f32.mrb[22].mxu1  ;;  %v2162_v1 = vld [vmem:[#allocation16] ss:$0 sm:$0xff] }
 0xa8b   : > { %v2308_v4 = vpop.f32.mrb[23].mxu1 }
 0xb17   : > { %v1373_v5 = vpop.xlane.xlu1 %1372 }
 0xb18   : > { %v1374_v7 = vsub.f32 %v1365_v63, %v1373_v5  ;;  %v2540_v63 = vld [vmem:[%s3694_s15 + $0x4] ss:$20 sps:$4 sm:$0xff]  }
 0xb1a   : > { %v1375_v8 = vmul.f32 1.442695, %v1374_v7 }
 0xb1c   : > { %2566 = vpow2.f32 %v1375_v8 }
 0xb26   : > { %v2567_v9 = vpop.eup %2566 }
 0xb27   : > { %v1377_v10 = vsel %vm848_vm3, %v2567_v9, 0.0 }
 0xb28   : > { %1378 = vadd.xlane.f32.xlu0 %v1377_v10 }
 0xb3e   : > { %1383 = vrot.lane.b32.xlu0 %v3453_v33, %s2995_s6  ;;  %v1431_v33 = vld [vmem:[%s3686_s7 + $0xc] sm:$0xf]  ;;  %s1931_s6 = scalar_lea.sflag [#allocation4], %s677_s18 }
 0xb3f   : > { %v1437_v22 = vsel %vm912_vm4, %v1431_v33, 0 }
 0xb40   : > { %2316 = vmatpush3.bf16.msra.mxu1 %v1437_v22  ;;  %v2174_v22 = vld [vmem:[#allocation17] ss:$0 sm:$0xff] }
 0xb41   : > { %2329 = vmatprep.subr.bf16.mxu1 %v2983_v0 }
 0xb56   : > { %v1314_v11 = vpop.f32.mrb[20].mxu0 }
 0xb57   : > { %v1320_v12 = vadd.f32 %v1314_v11, %v3508_v32  ;;  %v2301_v13 = vpop.f32.mrb[21].mxu0 }
 0xb58   : > { %v1317_v14 = vpop.f32.mrb[22].mxu0 }
 0xb59   : > { %v2302_v15 = vpop.f32.mrb[23].mxu0 }
 0xbb5   : > { %v1379_v16 = vpop.xlane.xlu0 %1378 }
 0xbb6   : > { %2568 = vrcp.f32 %v1379_v16 }
 0xbb9   : > { %v1384_v17 = vpop.permute.xlu0 %1383 }
 0xbba   : > { %v1389_v18 = vsel %vm912_vm4, %v1384_v17, 0 }
 0xbbb   : > { %2310 = vmatpush3.bf16.msra.mxu0 %v1389_v18  ;;  %v2543_v18 = vld [vmem:[%s3694_s15 + $0x2c] ss:$20 sps:$4 sm:$0xff]  }
 0xbbc   : > { %2321 = vmatprep.subr.bf16.mxu0 %v2983_v0 }
 0xbc0   : > { %v2569_v19 = vpop.eup %2568 }
 0xbc1   : > { %v1381_v20 = vmul.f32 %v2569_v19, %v2567_v9  ;;  %v2541_v19 = vld [vmem:[%s3694_s15 + $0x28] ss:$20 sps:$4 sm:$0xff]  }
 0xbc3   : > { %v1382_v21 = vpack.c.bf16 %v1381_v20, %v1381_v20  ;;  %v2996_v20 = vmov 0  }
 0xbc5   : > { %2312 = vmatmul.mubr.msk.bf16.vlgmr.msra.gmra.mrb[24].mxu0 %vm848_vm3, %v1382_v21  ;;  %v2546_v21 = vld [vmem:[%s3694_s15 + $0xc] ss:$20 sps:$4 sm:$0xff]  }
 0xbc6   : > { %2325 = vmatprep.mubr.msk.bf16.mxu0 %vm2984_vm0, %v2983_v0  ;;  %2322 = vmatpush3.bf16.msra.mxu0 %v2528_v43 }
 0xbc7   : > { %2323 = vmatprep.subr.bf16.mxu0 %v2983_v0 }
 0xbca   : > { %2324 = vmatpush3.bf16.msra.mxu0 %v2529_v44 }
 0xbcb   : > { %1803 = vmatprep.subr.bf16.mxu0 %v2540_v63 }
 0xc98   : > { %v1425_v23 = vpop.f32.mrb[24].mxu0 }
 0xc99   : > { %v1432_v24 = vpack.c.bf16 %v1425_v23, %v1425_v23  ;;  %v2313_v25 = vpop.f32.mrb[25].mxu0 }
 0xc9a   : > { %v1428_v26 = vpop.f32.mrb[26].mxu0 }
 0xc9b   : > { %v2314_v27 = vpop.f32.mrb[27].mxu0  ;;  %2318 = vmatmul.mubr.msk.bf16.vlgmr.msra.gmra.mrb[24].mxu1 %vm848_vm3, %v1432_v24 }
 0xc9c   : > { %2345 = vmatprep.mubr.msk.bf16.mxu1 %vm2984_vm0, %v2983_v0 }
 0xd6e   : > { %v1473_v28 = vpop.f32.mrb[24].mxu1 }
 0xd6f   : > { %v1479_v29 = vadd.f32 %v1473_v28, %v1320_v12  ;;  %v2319_v30 = vpop.f32.mrb[25].mxu1  ;;  %v2544_v28 = vld [vmem:[%s3694_s15 + $0x8] ss:$20 sps:$4 sm:$0xff]  }
 0xd70   : > { %v1476_v32 = vpop.f32.mrb[26].mxu1  ;;  %v2549_v30 = vld [vmem:[%s3694_s15 + $0x34] ss:$20 sps:$4 sm:$0xff]  }
 0xd71   : > { %v1480_v34 = vadd.f32 %v1479_v29, %v3436_v6  ;;  %v2320_v35 = vpop.f32.mrb[27].mxu1  ;;  %v2530_v6 = vld [vmem:[%s3692_s13] sm:$0xff]  }
 0xd72   : > { %2330 = vmatpush3.bf16.msra.mxu1 %v2530_v6  ;;  %v2550_v32 = vld [vmem:[%s3694_s15 + $0x10] ss:$20 sps:$4 sm:$0xff]   ;;  %v1723_v35 = vlaneseq }
 0xd73   : > { %v3551_v36 = vadd.f32 %v2159_v31, %v1480_v34  ;;  %2331 = vmatprep.subr.bf16.mxu1 %v2983_v0  ;;  %v2547_v31 = vld [vmem:[%s3694_s15 + $0x30] ss:$20 sps:$4 sm:$0xff]   ;;  %v2551_v34 = vld [vmem:[%s3694_s15 + $0x38] ss:$20 sps:$4 sm:$0xff]  }
 0xd75   : > { %v1491_v37 = vsel %vm748_vm2, %v3551_v36, 0.0 }
 0xd76   : > { %1492 = vadd.xlane.f32.xlu1 %v1491_v37  ;;  %2332 = vmatpush3.bf16.msra.mxu1 %v2531_v55 }
 0xd77   : > { %2333 = vmatprep.subr.bf16.mxu1 %v2983_v0 }
 0xd7a   : > { %2334 = vmatpush3.bf16.msra.mxu1 %v2532_v56 }
 0xd7b   : > { %2335 = vmatprep.subr.bf16.mxu1 %v2983_v0 }
 0xd7e   : > { %2336 = vmatpush3.bf16.msra.mxu1 %v2533_v57 }
 0xd7f   : > { %2337 = vmatprep.subr.bf16.mxu1 %v2983_v0 }
 0xd82   : > { %2338 = vmatpush3.bf16.msra.mxu1 %v2534_v58 }
 0xd83   : > { %2339 = vmatprep.subr.bf16.mxu1 %v2983_v0 }
 0xd86   : > { %2340 = vmatpush3.bf16.msra.mxu1 %v2535_v59 }
 0xd87   : > { %2341 = vmatprep.subr.bf16.mxu1 %v2983_v0 }
 0xd8a   : > { %2342 = vmatpush3.bf16.msra.mxu1 %v2536_v60 }
 0xd8b   : > { %2343 = vmatprep.subr.bf16.mxu1 %v2983_v0 }
 0xd8e   : > { %2344 = vmatpush3.bf16.msra.mxu1 %v2537_v61 }
 0xe03   : > { %v1493_v38 = vpop.xlane.xlu1 %1492 }
 0xe04   : > { %v1494_v39 = vmul.f32 0.03125, %v1493_v38  ;;  %v1721_v38 = vld [vmem:[#allocation19] sm:$0x1f] }
 0xe06   : > { %v1495_v40 = vsub.f32 %v3551_v36, %v1494_v39 }
 0xe08   : > { %v1496_v41 = vmul.f32 %v1495_v40, %v1495_v40 }
 0xe0a   : > { %v1497_v42 = vsel %vm748_vm2, %v1496_v41, 0.0 }
 0xe0b   : > { %1498 = vadd.xlane.f32.xlu1 %v1497_v42 }
 0xe98   : > { %v1499_v45 = vpop.xlane.xlu1 %1498 }
 0xe99   : > { %v1500_v46 = vmul.f32 0.03125, %v1499_v45 }
 0xe9b   : > { %v1501_v47 = vadd.f32 1e-05, %v1500_v46 }
 0xe9d   : > { %2570 = vrsqrt.f32 %v1501_v47 }
 0xea7   : > { %v2571_v48 = vpop.eup %2570 }
 0xea8   : > { %v1503_v50 = vmul.f32 %v2571_v48, %v1495_v40 }
 0xeaa   : > { %v1510_v52 = vmul.f32 %v2160_v49, %v1503_v50 }
 0xeac   : > { %v1517_v53 = vadd.f32 %v2161_v51, %v1510_v52 }
 0xeae   : > { %v1522_v54 = vpack.c.bf16 %v1517_v53, %v1517_v53 }
 0xeb0   : > { %2326 = vmatmul.mubr.msk.bf16.vlgmr.msra.gmra.mrb[28].mxu0 %vm748_vm2, %v1522_v54 }
 0xeb1   : > { %1804 = vmatpush1.bf16.msra.mxu0 %v2538_v62  ;;  %1835 = vmatprep.mubr.bf16.mxu0 %v2996_v20 }
 0xeb2   : > { %1805 = vmatprep.subr.bf16.mxu0 %v2543_v18 }
 0xeb5   : > { %1806 = vmatpush1.bf16.msra.mxu0 %v2541_v19 }
 0xeb6   : > { %1844 = vmatprep.subr.bf16.mxu0 %v2546_v21 }
 0xf83   : > { %v1579_v2 = vpop.f32.mrb[28].mxu0 }
 0xf84   : > { %v1580_v3 = vadd.f32 %v2162_v1, %v1579_v2  ;;  %v2327_v4 = vpop.f32.mrb[29].mxu0 }
 0xf85   : > { %v1582_v5 = vpop.f32.mrb[30].mxu0 }
 0xf86   : > { %v1586_v7 = vmul.f32 0.044715, %v1580_v3  ;;  %v2328_v8 = vpop.f32.mrb[31].mxu0  ;;  %v1585_v14 = vmul.f32 0.5, %v1580_v3 }
 0xf88   : > { %v1587_v9 = vmul.f32 %v1586_v7, %v1580_v3 }
 0xf8a   : > { %v1588_v10 = vmul.f32 %v1587_v9, %v1580_v3 }
 0xf8c   : > { %v1589_v11 = vadd.f32 %v1588_v10, %v1580_v3 }
 0xf8e   : > { %v1590_v12 = vmul.f32 0.7978846, %v1589_v11 }
 0xf90   : > { %2572 = vtanh.f32 %v1590_v12 }
 0xf9a   : > { %v2573_v13 = vpop.eup %2572 }
 0xf9b   : > { %v1592_v15 = vadd.f32 1.0, %v2573_v13 }
 0xf9d   : > { %v1593_v16 = vmul.f32 %v1592_v15, %v1585_v14 }
 0xf9f   : > { %v1610_v17 = vpack.c.bf16 %v1593_v16, %v1593_v16 }
 0xfa1   : > { %2346 = vmatmul.mubr.bf16.vlgmr.msra.gmra.mrb[28].mxu1 %v1610_v17 }
0x1074   : > { %v1693_v33 = vpop.f32.mrb[28].mxu1 }
0x1075   : > { %v1699_v23 = vadd.f32 %v1693_v33, %v3551_v36  ;;  %v2347_v24 = vpop.f32.mrb[29].mxu1  ;;  %v1724_v36 = vshrl.u32 %v1723_v35, 7 }
0x1076   : > { %v1696_v25 = vpop.f32.mrb[30].mxu1 }
0x1077   : > { %v1707_v26 = vadd.f32 %v2174_v22, %v1699_v23  ;;  %v2348_v27 = vpop.f32.mrb[31].mxu1  ;;  %v1725_v37 = vsub.s32 0, %v1724_v36  ;;  %v1729_v39 = vsub.s32 1, %v1724_v36  ;;  %v1733_v6 = vsub.s32 2, %v1724_v36 }
0x1078   : > { %v1741_v53 = vsub.s32 4, %v1724_v36 }
0x1079   : > { %v1720_v29 = vpack.c.bf16 %v1707_v26, %v1707_v26  ;;  %v1726_v40 = vrot.slane %v1721_v38, %v1725_v37  ;;  %v1730_v41 = vrot.slane %v1721_v38, %v1729_v39  ;;  %v1734_v48 = vrot.slane %v1721_v38, %v1733_v6 }
0x107a   : > { %v1742_v57 = vrot.slane %v1721_v38, %v1741_v53 }
0x107b   : > { %2185 = vmatmul.mubr.msk.bf16.vlgmr.msra.gmra.mrb[32].mxu0 %vm748_vm2, %v1720_v29 }
0x107c   : > { %1845 = vmatpush1.bf16.msra.mxu0 %v2544_v28  ;;  %1876 = vmatprep.mubr.bf16.mxu0 %v2996_v20 }
0x107d   : > { %1846 = vmatprep.subr.bf16.mxu0 %v2549_v30 }
0x1080   : > { %1847 = vmatpush1.bf16.msra.mxu0 %v2547_v31 }
0x1081   : > { %2349 = vmatprep.subr.bf16.mxu0 %v2983_v0 }
0x1083   : > { %2186 = vmatmul.mubr.msk.bf16.vlgmr.msra.gmra.mrb[36].mxu0 %vm748_vm2, %v1720_v29 }
0x1084   : > { %2350 = vmatpush3.bf16.msra.mxu0 %v2550_v32  ;;  %2353 = vmatprep.mubr.msk.bf16.mxu0 %vm2984_vm0, %v2983_v0 }
0x1085   : > { %2351 = vmatprep.subr.bf16.mxu0 %v2983_v0  ;;  %v1737_v0 = vsub.s32 3, %v1724_v36 }
0x1087   : > { %v1738_v49 = vrot.slane %v1721_v38, %v1737_v0 }
0x1088   : > { %2352 = vmatpush3.bf16.msra.mxu0 %v2551_v34 }
0x108b   : > { %2354 = vmatmul.mubr.msk.bf16.vlgmr.msra.gmra.mrb[40].mxu0 %vm748_vm2, %v1720_v29 }
0x114e   : > { %v1837_v42 = vpop.f32.mrb[32].mxu0 }
0x114f   : > { %v1838_v43 = vadd.f32 %v1837_v42, %v1726_v40  ;;  %v1839_v44 = vpop.f32.mrb[33].mxu0 }
0x1150   : > { %v1840_v45 = vadd.f32 %v1839_v44, %v1730_v41  ;;  %v1841_v46 = vpop.f32.mrb[34].mxu0 }
0x1151   : > { %1925 = vst [vmem:[%s679_s17] sm:$0xff] %v1838_v43  ;;  %v1842_v47 = vpop.f32.mrb[35].mxu0 }
0x1152   : > { %1926 = vst [vmem:[%s679_s17 + $0x8] sm:$0xff] %v1840_v45 }
0x1156   : > { %v1878_v50 = vpop.f32.mrb[36].mxu0 }
0x1157   : > { %v1879_v51 = vadd.f32 %v1878_v50, %v1734_v48  ;;  %v1880_v52 = vpop.f32.mrb[37].mxu0 }
0x1158   : > { %v1881_v54 = vadd.f32 %v1880_v52, %v1738_v49  ;;  %v1882_v55 = vpop.f32.mrb[38].mxu0 }
0x1159   : > { %1927 = vst [vmem:[%s679_s17 + $0x10] sm:$0xff] %v1879_v51  ;;  %v1883_v56 = vpop.f32.mrb[39].mxu0 }
0x115a   : > { %1928 = vst [vmem:[%s679_s17 + $0x18] sm:$0xff] %v1881_v54 }
0x115e   : > { %v1919_v58 = vpop.f32.mrb[40].mxu0 }
0x115f   : > { %v1920_v59 = vadd.f32 %v1919_v58, %v1742_v57  ;;  %v2355_v60 = vpop.f32.mrb[41].mxu0 }
0x1160   : > { %v1922_v61 = vpop.f32.mrb[42].mxu0 }
0x1161   : > { %1929 = vst [vmem:[%s679_s17 + $0x20] sm:$0xff] %v1920_v59  ;;  %v2356_v62 = vpop.f32.mrb[43].mxu0 }
0x1162   : > { %2895 = shalt.err (!%p2892_p10)
}
0x1163   : > { %s2896_s24 = scalar_lea.hbm %s3635_s0, 640  ;;  %s2900_s29 = scalar_lea.hbm %s3749_s20, 1280 }
0x1164   : > { %p2897_p2 = scmp.ne.s32.totalorder %s3635_s0, %s2896_s24  ;;  %p2901_p7 = scmp.lt.u32.totalorder %s3635_s0, %s3749_s20 }
0x1165   : > { %p2902_p8 = scmp.lt.u32.totalorder %s2900_s29, %s2896_s24  ;;  %p2904_p13 = scmp.lt.u32.totalorder %s2896_s24, %s3635_s0 }
0x1166   : > { %p2898_p3 = pnand %p2897_p2, %p3750_p1 }
0x1167   : > { %p2903_p11 = por %p2902_p8, %p2901_p7 }
0x1168   : > { %p2899_p4 = pneg %p2898_p3 }
0x1169   : > { %p2905_p0 = por %p2904_p13, %p2903_p11 }
0x116b   : > { %p2906_p6 = pnand %p2905_p0, %p2899_p4 }
0x116d   : > { %2909 = shalt.err (!%p2906_p6)
}
0x116e   : > { %2403 = dma.vmem_to_hbm [thread:$0]  (%p3750_p1), %s3637_s22, 640, %s3635_s0, %s1931_s6  }
0x116f PF: > { %s3751_s30 = sld [smem:[#allocation31_spill]]  ;;  %s3752_s25 = sld [smem:[#allocation28_spill]] }
0x1170   : > { %s3753_s26 = sld [smem:[#allocation35_spill]] }
0x1175   : > { %p2465_p5 = scmp.ge.s32.totalorder %s3751_s30, 2  ;;  %s1957_s28 = sand.u32 1, %s3752_s25  }
0x1176   : > { %p3754_p9 = scmp.ne.s32.totalorder %s3753_s26, 0  ;;  %s1958_s3 = scalar_lea.sflag [#allocation4], %s1957_s28 }
0x1178   : > { %p2440_p12 = pnand %p2465_p5, %p3754_p9 }
0x117a   : > { %2951 = dma.done.wait (!%p2440_p12), %s1958_s3, 640  }
0x117b   : > { %2953 = vsyncadd (!%p2440_p12), %s1958_s3, 4294966656  ;;  %s3755_s27 = sld [smem:[#allocation32_spill]]  ;;  %s3756_s24 = sld [smem:[#allocation29_spill]] }
0x117c   : > { %s3757_s25 = sld [smem:[#allocation30_spill]]  ;;  %s3758_s26 = sld [smem:[#allocation33_spill]] }
0x1181   : > { %p33_p10 = scmp.ge.s32.totalorder %s3755_s27, 4  }
0x1183   :  { %35 = sbr.rel (!%p33_p10) target bundleno = 15 (0xf), region = 168 }
0x118a   :  { %1963 = vsyncpa [#allocation3], 1 }
0x118b   :  { %1965 = vsyncpa [#allocation3 + $0x1], 1 }
0x118c   :  { %1966 = vsyncpa [#allocation6], 1 }
0x118d   :  { %1967 = vsyncpa [#allocation9], 1 }
0x118e   :  { %1968 = vsyncpa [#allocation12], 1 }
0x118f   :  { %1969 = vsyncpa [#allocation15], 1 }
0x1190   :  { %1970 = vsyncpa [#allocation18], 1 }
0x1191   :  { %1971 = vsyncpa [#allocation4], 1 }
0x1192   :  { %1973 = vsyncpa [#allocation4 + $0x1], 1 }

// kernel: tpu_custom_call.1
= control target key start
LH: loop header
LB: loop body
LE: loop exit
PB: predicated region body
PF: predicated region fallthrough
CT: control target
= control target key end

     0   :  { %s3679_s0 = inlined_call_operand.vmem [shape: f32[16,16], index: 0, kind: input, shape index: {}]   ;;  %s3680_s1 = inlined_call_operand.vmem [shape: bf16[16,32], index: 1, kind: input, shape index: {}]   ;;  %s3681_s2 = inlined_call_operand.hbm [shape: f32[1,32], index: 2, kind: input, shape index: {}]   ;;  %s3682_s3 = inlined_call_operand.hbm [shape: f32[1,32], index: 3, kind: input, shape index: {}]   ;;  %s3683_s4 = inlined_call_operand.hbm [shape: f32[1,32], index: 4, kind: input, shape index: {}]   ;;  %s3684_s5 = inlined_call_operand.vmem [shape: bf16[32,96], index: 5, kind: input, shape index: {}]   ;;  %s3685_s6 = inlined_call_operand.hbm [shape: f32[1,96], index: 6, kind: input, shape index: {}]   ;;  %s3686_s7 = inlined_call_operand.vmem [shape: bf16[32,32], index: 7, kind: input, shape index: {}]   ;;  %s3687_s8 = inlined_call_operand.hbm [shape: f32[1,32], index: 8, kind: input, shape index: {}]   ;;  %s3688_s9 = inlined_call_operand.hbm [shape: f32[1,32], index: 9, kind: input, shape index: {}]   ;;  %s3689_s10 = inlined_call_operand.hbm [shape: f32[1,32], index: 10, kind: input, shape index: {}]   ;;  %s3690_s11 = inlined_call_operand.hbm [shape: bf16[32,128], index: 11, kind: input, shape index: {}]   ;;  %s3691_s12 = inlined_call_operand.hbm [shape: f32[1,128], index: 12, kind: input, shape index: {}]   ;;  %s3692_s13 = inlined_call_operand.vmem [shape: bf16[128,32], index: 13, kind: input, shape index: {}]   ;;  %s3693_s14 = inlined_call_operand.hbm [shape: f32[1,32], index: 14, kind: input, shape index: {}]   ;;  %s3694_s15 = inlined_call_operand.vmem [shape: bf16[32,640], index: 15, kind: input, shape index: {}]   ;;  %s3695_s16 = inlined_call_operand.hbm [shape: f32[1,640], index: 16, kind: input, shape index: {}]   ;;  %s3696_s17 = inlined_call_operand.hbm [shape: f32[16,640], index: 17, kind: output, shape index: {}]  }
   0x1   :  { %3711 = sst [smem:[#allocation36_spill]] %s3679_s0 }
   0x2   :  { %3712 = sst [smem:[#allocation37_spill]] %s3680_s1 }
   0x3   :  { %3713 = sst [smem:[#allocation38_spill]] %s3682_s3 }
   0x4   :  { %3714 = sst [smem:[#allocation39_spill]] %s3685_s6 }
   0x5   :  { %3715 = sst [smem:[#allocation40_spill]] %s3696_s17 }
   0x6   :  { %22 = vsyncpa [#allocation3], 0 }
   0x7   :  { %23 = vsyncpa [#allocation6], 0 }
   0x8   :  { %24 = vsyncpa [#allocation9], 0 }
   0x9   :  { %25 = vsyncpa [#allocation12], 0 }
   0xa   :  { %26 = vsyncpa [#allocation15], 0 }
   0xb   :  { %27 = vsyncpa [#allocation18], 0 }
   0xc   :  { %28 = vsyncpa [#allocation4], 0 }
   0xd   :  { %30 = vsyncpa [#allocation4 + $0x1], 0  ;;  %s3088_s24 = smov 0   ;;  %s3090_s25 = smov 0  }
   0xe   :  { %s3092_s26 = smov 0   ;;  %s3094_s27 = smov 0  }
   0xf LB: > { %3716 = sst [smem:[#allocation28_spill]] %s2956_s24  ;;  %s3109_s28 = sadd.s32 4294967295, %s2968_s27   ;;  %s2968_s27 = sphi %s3094_s27, %s3755_s27   ;;  %s2964_s26 = sphi %s3092_s26, %s3758_s26   ;;  %s2960_s25 = sphi %s3090_s25, %s3757_s25   ;;  %s2956_s24 = sphi %s3088_s24, %s3756_s24  }
  0x10   : > { %3717 = sst [smem:[#allocation29_spill]] %s2960_s25  ;;  %s2111_s29 = sadd.s32 4294967294, %s2968_s27  }
  0x11   : > { %3718 = sst [smem:[#allocation30_spill]] %s2964_s26  ;;  %s3113_s0 = sadd.s32 1, %s2968_s27  }
  0x12   : > { %3719 = sst [smem:[#allocation31_spill]] %s2968_s27  ;;  %s405_s30 = sadd.s32 1, %s2964_s26 }
  0x13   : > { %3720 = sst [smem:[#allocation32_spill]] %s3113_s0  ;;  %s402_s18 = ssub.s32 %s2968_s27, %s3113_s0 }
  0x14   : > { %p415_p0 = scmp.ne.s32.totalorder %s2964_s26, %s2960_s25  ;;  %p403_p1 = scmp.eq.s32.totalorder %s402_s18, 0 }
  0x15   : > { %p416_p2 = scmp.eq.s32.totalorder %s3109_s28, 1  ;;  %p421_p3 = scmp.ne.s32.totalorder %s2960_s25, %s2956_s24 }
  0x16   : > { %p422_p4 = scmp.eq.s32.totalorder %s2111_s29, 1  ;;  %p2112_p7 = scmp.ge.s32.totalorder %s2968_s27, 1 }
  0x17   : > { %s3124_s19 = scalar_select %p403_p1, %s2964_s26, %s405_s30  }
  0x18   : > { %p3126_p5 = por %p416_p2, %p415_p0  ;;  %p3130_p6 = por %p422_p4, %p421_p3 }
  0x19   : > { %3721 = sst [smem:[#allocation33_spill]] %s3124_s19  ;;  %p429_p8 = scmp.lt.s32.totalorder %s2968_s27, 3 }
  0x1a   : > { %s3722_s1 = scalar_select %p3126_p5, 1, 0 }
  0x1b   : > { %s3724_s20 = scalar_select %p3130_p6, 1, 0 }
  0x1c   : > { %3723 = sst [smem:[#allocation34_spill]] %s3722_s1  ;;  %p3704_p9 = scmp.eq.s32.totalorder %s3109_s28, 0 }
  0x1d   : > { %3725 = sst [smem:[#allocation35_spill]] %s3724_s20  ;;  %p3137_p10 = pnand %p2112_p7, %p429_p8 }
  0x1e   : > { %s2970_s22 = smov [#allocation5]   ;;  %s2971_s29 = smov [#allocation8]  }
  0x1f   : > { %s3726_s21 = scalar_select %p3137_p10, 1, 0 }
  0x20   : > { %s456_s23 = sshll.u32 %s2970_s22, 4  ;;  %p2405_p11 = pneg %p3137_p10  ;;  %s457_s23 = int_to_ptr.vmem [resolvable:$true] %s456_s23 }
  0x21   : > { %s481_s30 = sshll.u32 %s2971_s29, 4  ;;  %s2972_s19 = smov [#allocation11]   ;;  %s3149_s30 = int_to_ptr.vmem [resolvable:$true] %s481_s30 }
  0x22   : > { %p3145_p12 = pnand %p3704_p9, %p2405_p11  ;;  %s506_s26 = sshll.u32 %s2972_s19, 4  ;;  %s3151_s26 = int_to_ptr.vmem [resolvable:$true] %s506_s26 }
  0x23   : > { %s3728_s3 = sld [smem:[#allocation38_spill]] }
  0x24   : > { %p3161_p0 = pneg %p3145_p12 }
  0x29   : > { %s2574_s22 = scalar_lea.hbm %s3728_s3, 16 }
  0x2a   : > { %p2575_p13 = scmp.ne.s32.totalorder %s3728_s3, %s2574_s22  ;;  %p2581_p3 = scmp.lt.u32.totalorder %s2574_s22, %s3728_s3 }
  0x2c   : > { %p2577_p1 = pnand %p3161_p0, %p2575_p13 }
  0x2e   : > { %p2578_p2 = pneg %p2577_p1 }
  0x30   : > { %p2583_p4 = pnand %p2581_p3, %p2578_p2 }
  0x32   : > { %2586 = shalt.err (!%p2583_p4)
}
  0x33   : > { %s2587_s0 = scalar_lea.vmem %s457_s23, 16  ;;  %s2594_s24 = scalar_lea.vmem %s457_s23, 32 }
  0x34   : > { %p2588_p7 = scmp.ne.s32.totalorder %s457_s23, %s2587_s0  ;;  %p2595_p9 = scmp.lt.s32.totalorder %s457_s23, %s457_s23 }
  0x35   : > { %p2596_p6 = scmp.lt.s32.totalorder %s2594_s24, %s2587_s0 }
  0x36   : > { %p2590_p8 = pnand %p2588_p7, %p3161_p0 }
  0x37   : > { %p2597_p5 = por %p2596_p6, %p2595_p9 }
  0x38   : > { %p2591_p11 = pneg %p2590_p8 }
  0x3a   : > { %p2598_p10 = pnand %p2597_p5, %p2591_p11 }
  0x3c   : > { %2601 = shalt.err (!%p2598_p10)
}
  0x3d   : > { %2411 = dma.hbm_to_vmem [thread:$0]  (!%p3145_p12), %s3728_s3, 16, %s457_s23, [#allocation6]  }
  0x3e   : > { %s3730_s6 = sld [smem:[#allocation39_spill]] }
  0x44   : > { %s2602_s19 = scalar_lea.hbm %s3730_s6, 16 }
  0x45   : > { %p2603_p13 = scmp.ne.s32.totalorder %s3730_s6, %s2602_s19  ;;  %p2609_p5 = scmp.lt.u32.totalorder %s2602_s19, %s3730_s6 }
  0x47   : > { %p2605_p1 = pnand %p2603_p13, %p3161_p0 }
  0x49   : > { %p2606_p6 = pneg %p2605_p1 }
  0x4b   : > { %p2611_p9 = pnand %p2609_p5, %p2606_p6 }
  0x4d   : > { %2614 = shalt.err (!%p2611_p9)
}
  0x4e   : > { %s2615_s23 = scalar_lea.vmem %s3149_s30, 16  ;;  %s2622_s25 = scalar_lea.vmem %s3149_s30, 32 }
  0x4f   : > { %p2616_p10 = scmp.ne.s32.totalorder %s3149_s30, %s2615_s23  ;;  %p2623_p4 = scmp.lt.s32.totalorder %s3149_s30, %s3149_s30 }
  0x50   : > { %p2624_p7 = scmp.lt.s32.totalorder %s2622_s25, %s2615_s23 }
  0x51   : > { %p2618_p2 = pnand %p2616_p10, %p3161_p0 }
  0x52   : > { %p2625_p8 = por %p2624_p7, %p2623_p4 }
  0x53   : > { %p2619_p3 = pneg %p2618_p2 }
  0x55   : > { %p2626_p11 = pnand %p2625_p8, %p2619_p3 }
  0x57   : > { %2629 = shalt.err (!%p2626_p11)
}
  0x58   : > { %2417 = dma.hbm_to_vmem [thread:$0]  (!%p3145_p12), %s3730_s6, 16, %s3149_s30, [#allocation9]  }
  0x59   : > { %s2630_s22 = scalar_lea.hbm %s3688_s9, 16 }
  0x5a   : > { %p2631_p13 = scmp.ne.s32.totalorder %s3688_s9, %s2630_s22  ;;  %p2637_p5 = scmp.lt.u32.totalorder %s2630_s22, %s3688_s9 }
  0x5c   : > { %p2633_p1 = pnand %p2631_p13, %p3161_p0 }
  0x5e   : > { %p2634_p6 = pneg %p2633_p1 }
  0x60   : > { %p2639_p9 = pnand %p2637_p5, %p2634_p6 }
  0x62   : > { %2642 = shalt.err (!%p2639_p9)
}
  0x63   : > { %s2643_s30 = scalar_lea.vmem %s3151_s26, 16  ;;  %s2650_s25 = scalar_lea.vmem %s3151_s26, 32 }
  0x64   : > { %p2644_p10 = scmp.ne.s32.totalorder %s3151_s26, %s2643_s30  ;;  %p2651_p4 = scmp.lt.s32.totalorder %s3151_s26, %s3151_s26 }
  0x65   : > { %p2652_p7 = scmp.lt.s32.totalorder %s2650_s25, %s2643_s30 }
  0x66   : > { %p2646_p2 = pnand %p2644_p10, %p3161_p0 }
  0x67   : > { %p2653_p8 = por %p2652_p7, %p2651_p4 }
  0x68   : > { %p2647_p3 = pneg %p2646_p2 }
  0x6a   : > { %p2654_p11 = pnand %p2653_p8, %p2647_p3 }
  0x6c   : > { %2657 = shalt.err (!%p2654_p11)
}
  0x6d   : > { %2423 = dma.hbm_to_vmem [thread:$0]  (!%p3145_p12), %s3688_s9, 16, %s3151_s26, [#allocation12]  }
  0x6e   : > { %s2973_s20 = smov [#allocation14]   ;;  %s2658_s0 = scalar_lea.hbm %s3690_s11, 256 }
  0x6f   : > { %s527_s17 = sshll.u32 %s2973_s20, 4  ;;  %p2659_p13 = scmp.ne.s32.totalorder %s3690_s11, %s2658_s0  ;;  %s528_s17 = int_to_ptr.vmem [resolvable:$true] %s527_s17 }
  0x70   : > { %p2665_p5 = scmp.lt.u32.totalorder %s2658_s0, %s3690_s11 }
  0x71   : > { %p2661_p1 = pnand %p2659_p13, %p3161_p0 }
  0x73   : > { %p2662_p6 = pneg %p2661_p1 }
  0x75   : > { %p2667_p9 = pnand %p2665_p5, %p2662_p6 }
  0x77   : > { %2670 = shalt.err (!%p2667_p9)
}
  0x78   : > { %s2671_s26 = scalar_lea.vmem %s528_s17, 256  ;;  %p2679_p4 = scmp.lt.s32.totalorder %s528_s17, %s528_s17 }
  0x79   : > { %p2672_p10 = scmp.ne.s32.totalorder %s528_s17, %s2671_s26  ;;  %p2680_p7 = scmp.lt.s32.totalorder %s2671_s26, %s2671_s26 }
  0x7b   : > { %p2674_p2 = pnand %p2672_p10, %p3161_p0  ;;  %p2681_p8 = por %p2680_p7, %p2679_p4 }
  0x7d   : > { %p2675_p3 = pneg %p2674_p2 }
  0x7f   : > { %p2682_p11 = pnand %p2681_p8, %p2675_p3 }
  0x81   : > { %2685 = shalt.err (!%p2682_p11)
}
  0x82   : > { %s2974_s1 = smov 64   ;;  %s2975_s27 = smov 4  }
  0x83   : > { %2429 = dma.hbm_to_vmem [thread:$0]  (!%p3145_p12), %s3690_s11, 256, %s528_s17, [#allocation15], %s2974_s1, %s2974_s1, %s2975_s27  }
  0x84   : > { %s2976_s19 = smov [#allocation17]   ;;  %s2977_s24 = smov [#allocation2]  }
  0x85   : > { %s555_s0 = sshll.u32 %s2976_s19, 4  ;;  %s445_s23 = sshll.u32 %s2977_s24, 4  ;;  %s556_s0 = int_to_ptr.vmem [resolvable:$true] %s555_s0  ;;  %s3243_s23 = int_to_ptr.vmem [resolvable:$true] %s445_s23 }
  0x86   : > { %s2686_s26 = scalar_lea.hbm %s3693_s14, 16 }
  0x87   : > { %p2687_p13 = scmp.ne.s32.totalorder %s3693_s14, %s2686_s26  ;;  %p2693_p5 = scmp.lt.u32.totalorder %s2686_s26, %s3693_s14 }
  0x89   : > { %p2689_p1 = pnand %p2687_p13, %p3161_p0 }
  0x8b   : > { %p2690_p6 = pneg %p2689_p1 }
  0x8d   : > { %p2695_p9 = pnand %p2693_p5, %p2690_p6 }
  0x8f   : > { %2698 = shalt.err (!%p2695_p9)
}
  0x90   : > { %s2699_s1 = scalar_lea.vmem %s556_s0, 16  ;;  %s2706_s27 = scalar_lea.vmem %s556_s0, 32 }
  0x91   : > { %p2700_p10 = scmp.ne.s32.totalorder %s556_s0, %s2699_s1  ;;  %p2707_p4 = scmp.lt.s32.totalorder %s556_s0, %s556_s0 }
  0x92   : > { %p2708_p7 = scmp.lt.s32.totalorder %s2706_s27, %s2699_s1 }
  0x93   : > { %p2702_p2 = pnand %p2700_p10, %p3161_p0 }
  0x94   : > { %p2709_p8 = por %p2708_p7, %p2707_p4 }
  0x95   : > { %p2703_p3 = pneg %p2702_p2 }
  0x97   : > { %p2710_p11 = pnand %p2709_p8, %p2703_p3 }
  0x99   : > { %2713 = shalt.err (!%p2710_p11)
}
  0x9a   : > { %2435 = dma.hbm_to_vmem [thread:$0]  (!%p3145_p12), %s3693_s14, 16, %s556_s0, [#allocation18]  }
  0x9b   : > { %s2714_s24 = scalar_lea.hbm %s3681_s2, 16 }
  0x9c   : > { %p2715_p13 = scmp.ne.s32.totalorder %s3681_s2, %s2714_s24  ;;  %p2721_p5 = scmp.lt.u32.totalorder %s2714_s24, %s3681_s2 }
  0x9e   : > { %p2717_p1 = pnand %p2715_p13, %p3161_p0 }
  0xa0   : > { %p2718_p6 = pneg %p2717_p1 }
  0xa2   : > { %p2723_p9 = pnand %p2721_p5, %p2718_p6 }
  0xa4   : > { %2726 = shalt.err (!%p2723_p9)
}
  0xa5   : > { %s2727_s0 = scalar_lea.vmem %s3243_s23, 16  ;;  %s2734_s17 = scalar_lea.vmem %s3243_s23, 32 }
  0xa6   : > { %p2728_p10 = scmp.ne.s32.totalorder %s3243_s23, %s2727_s0  ;;  %p2735_p4 = scmp.lt.s32.totalorder %s3243_s23, %s3243_s23 }
  0xa7   : > { %p2736_p7 = scmp.lt.s32.totalorder %s2734_s17, %s2727_s0 }
  0xa8   : > { %p2730_p2 = pnand %p2728_p10, %p3161_p0 }
  0xa9   : > { %p2737_p8 = por %p2736_p7, %p2735_p4 }
  0xaa   : > { %p2731_p3 = pneg %p2730_p2 }
  0xac   : > { %p2738_p11 = pnand %p2737_p8, %p2731_p3 }
  0xae   : > { %2741 = shalt.err (!%p2738_p11)
}
  0xaf   : > { %2408 = dma.hbm_to_vmem [thread:$0]  (!%p3145_p12), %s3681_s2, 16, %s3243_s23, [#allocation3]  }
  0xb0   : > { %s2978_s3 = smov [#allocation7]   ;;  %s2979_s22 = smov [#allocation10]  }
  0xb1   : > { %s467_s6 = sshll.u32 %s2978_s3, 4  ;;  %s495_s19 = sshll.u32 %s2979_s22, 4  ;;  %s468_s6 = int_to_ptr.vmem [resolvable:$true] %s467_s6  ;;  %s3287_s19 = int_to_ptr.vmem [resolvable:$true] %s495_s19 }
  0xb2   : > { %s2742_s25 = scalar_lea.hbm %s3683_s4, 16 }
  0xb3   : > { %p2743_p13 = scmp.ne.s32.totalorder %s3683_s4, %s2742_s25  ;;  %p2749_p5 = scmp.lt.u32.totalorder %s2742_s25, %s3683_s4 }
  0xb5   : > { %p2745_p1 = pnand %p2743_p13, %p3161_p0 }
  0xb7   : > { %p2746_p6 = pneg %p2745_p1 }
  0xb9   : > { %p2751_p9 = pnand %p2749_p5, %p2746_p6 }
  0xbb   : > { %2754 = shalt.err (!%p2751_p9)
}
  0xbc   : > { %s2755_s17 = scalar_lea.vmem %s468_s6, 16  ;;  %s2762_s1 = scalar_lea.vmem %s468_s6, 32 }
  0xbd   : > { %p2756_p10 = scmp.ne.s32.totalorder %s468_s6, %s2755_s17  ;;  %p2763_p4 = scmp.lt.s32.totalorder %s468_s6, %s468_s6 }
  0xbe   : > { %p2764_p7 = scmp.lt.s32.totalorder %s2762_s1, %s2755_s17 }
  0xbf   : > { %p2758_p2 = pnand %p2756_p10, %p3161_p0 }
  0xc0   : > { %p2765_p8 = por %p2764_p7, %p2763_p4 }
  0xc1   : > { %p2759_p3 = pneg %p2758_p2 }
  0xc3   : > { %p2766_p11 = pnand %p2765_p8, %p2759_p3 }
  0xc5   : > { %2769 = shalt.err (!%p2766_p11)
}
  0xc6   : > { %2414 = dma.hbm_to_vmem [thread:$0]  (!%p3145_p12), %s3683_s4, 16, %s468_s6, [#allocation6]  }
  0xc7   : > { %s2770_s30 = scalar_lea.hbm %s3687_s8, 16 }
  0xc8   : > { %p2771_p13 = scmp.ne.s32.totalorder %s3687_s8, %s2770_s30  ;;  %p2777_p5 = scmp.lt.u32.totalorder %s2770_s30, %s3687_s8 }
  0xca   : > { %p2773_p1 = pnand %p2771_p13, %p3161_p0 }
  0xcc   : > { %p2774_p6 = pneg %p2773_p1 }
  0xce   : > { %p2779_p9 = pnand %p2777_p5, %p2774_p6 }
  0xd0   : > { %2782 = shalt.err (!%p2779_p9)
}
  0xd1   : > { %s2783_s6 = scalar_lea.vmem %s3287_s19, 16  ;;  %s2790_s23 = scalar_lea.vmem %s3287_s19, 32 }
  0xd2   : > { %p2784_p10 = scmp.ne.s32.totalorder %s3287_s19, %s2783_s6  ;;  %p2791_p4 = scmp.lt.s32.totalorder %s3287_s19, %s3287_s19 }
  0xd3   : > { %p2792_p7 = scmp.lt.s32.totalorder %s2790_s23, %s2783_s6 }
  0xd4   : > { %p2786_p2 = pnand %p2784_p10, %p3161_p0 }
  0xd5   : > { %p2793_p8 = por %p2792_p7, %p2791_p4 }
  0xd6   : > { %p2787_p3 = pneg %p2786_p2 }
  0xd8   : > { %p2794_p11 = pnand %p2793_p8, %p2787_p3 }
  0xda   : > { %2797 = shalt.err (!%p2794_p11)
}
  0xdb   : > { %2420 = dma.hbm_to_vmem [thread:$0]  (!%p3145_p12), %s3687_s8, 16, %s3287_s19, [#allocation9]  }
  0xdc   : > { %s2980_s27 = smov [#allocation13]   ;;  %s2981_s22 = smov [#allocation16]  }
  0xdd   : > { %s517_s3 = sshll.u32 %s2980_s27, 4  ;;  %s541_s24 = sshll.u32 %s2981_s22, 4  ;;  %s518_s3 = int_to_ptr.vmem [resolvable:$true] %s517_s3  ;;  %s3331_s24 = int_to_ptr.vmem [resolvable:$true] %s541_s24 }
  0xde   : > { %s2798_s26 = scalar_lea.hbm %s3689_s10, 16 }
  0xdf   : > { %p2799_p13 = scmp.ne.s32.totalorder %s3689_s10, %s2798_s26  ;;  %p2805_p5 = scmp.lt.u32.totalorder %s2798_s26, %s3689_s10 }
  0xe1   : > { %p2801_p1 = pnand %p2799_p13, %p3161_p0 }
  0xe3   : > { %p2802_p6 = pneg %p2801_p1 }
  0xe5   : > { %p2807_p9 = pnand %p2805_p5, %p2802_p6 }
  0xe7   : > { %2810 = shalt.err (!%p2807_p9)
}
  0xe8   : > { %s2811_s23 = scalar_lea.vmem %s518_s3, 16  ;;  %s2818_s17 = scalar_lea.vmem %s518_s3, 32 }
  0xe9   : > { %p2812_p10 = scmp.ne.s32.totalorder %s518_s3, %s2811_s23  ;;  %p2819_p4 = scmp.lt.s32.totalorder %s518_s3, %s518_s3 }
  0xea   : > { %p2820_p7 = scmp.lt.s32.totalorder %s2818_s17, %s2811_s23 }
  0xeb   : > { %p2814_p2 = pnand %p2812_p10, %p3161_p0 }
  0xec   : > { %p2821_p8 = por %p2820_p7, %p2819_p4 }
  0xed   : > { %p2815_p3 = pneg %p2814_p2 }
  0xef   : > { %p2822_p11 = pnand %p2821_p8, %p2815_p3 }
  0xf1   : > { %2825 = shalt.err (!%p2822_p11)
}
  0xf2   : > { %2426 = dma.hbm_to_vmem [thread:$0]  (!%p3145_p12), %s3689_s10, 16, %s518_s3, [#allocation12]  }
  0xf3   : > { %s2826_s25 = scalar_lea.hbm %s3691_s12, 16 }
  0xf4   : > { %p2827_p13 = scmp.ne.s32.totalorder %s3691_s12, %s2826_s25  ;;  %p2833_p5 = scmp.lt.u32.totalorder %s2826_s25, %s3691_s12 }
  0xf6   : > { %p2829_p1 = pnand %p2827_p13, %p3161_p0 }
  0xf8   : > { %p2830_p6 = pneg %p2829_p1 }
  0xfa   : > { %p2835_p9 = pnand %p2833_p5, %p2830_p6 }
  0xfc   : > { %2838 = shalt.err (!%p2835_p9)
}
  0xfd   : > { %s2839_s3 = scalar_lea.vmem %s3331_s24, 16  ;;  %s2846_s19 = scalar_lea.vmem %s3331_s24, 32 }
  0xfe   : > { %p2840_p10 = scmp.ne.s32.totalorder %s3331_s24, %s2839_s3  ;;  %p2847_p4 = scmp.lt.s32.totalorder %s3331_s24, %s3331_s24 }
  0xff   : > { %p2848_p7 = scmp.lt.s32.totalorder %s2846_s19, %s2839_s3 }
 0x100   : > { %p2842_p2 = pnand %p2840_p10, %p3161_p0 }
 0x101   : > { %p2849_p8 = por %p2848_p7, %p2847_p4 }
 0x102   : > { %p2843_p3 = pneg %p2842_p2 }
 0x104   : > { %p2850_p11 = pnand %p2849_p8, %p2843_p3 }
 0x106   : > { %2853 = shalt.err (!%p2850_p11)
}
 0x107   : > { %2432 = dma.hbm_to_vmem [thread:$0]  (!%p3145_p12), %s3691_s12, 16, %s3331_s24, [#allocation15]  }
 0x108   : > { %s2982_s1 = smov [#allocation19]   ;;  %s2854_s25 = scalar_lea.hbm %s3695_s16, 80 }
 0x109   : > { %s569_s27 = sshll.u32 %s2982_s1, 4  ;;  %p2855_p13 = scmp.ne.s32.totalorder %s3695_s16, %s2854_s25  ;;  %s570_s27 = int_to_ptr.vmem [resolvable:$true] %s569_s27 }
 0x10a   : > { %p2861_p5 = scmp.lt.u32.totalorder %s2854_s25, %s3695_s16 }
 0x10b   : > { %p2857_p1 = pnand %p2855_p13, %p3161_p0 }
 0x10d   : > { %p2858_p6 = pneg %p2857_p1 }
 0x10f   : > { %p2863_p9 = pnand %p2861_p5, %p2858_p6 }
 0x111   : > { %2866 = shalt.err (!%p2863_p9)
}
 0x112   : > { %s2867_s24 = scalar_lea.vmem %s570_s27, 80  ;;  %s2874_s3 = scalar_lea.vmem %s570_s27, 96 }
 0x113   : > { %p2868_p10 = scmp.ne.s32.totalorder %s570_s27, %s2867_s24  ;;  %p2875_p4 = scmp.lt.s32.totalorder %s570_s27, %s570_s27 }
 0x114   : > { %p2876_p7 = scmp.lt.s32.totalorder %s2874_s3, %s2867_s24 }
 0x115   : > { %p2870_p2 = pnand %p2868_p10, %p3161_p0 }
 0x116   : > { %p2877_p8 = por %p2876_p7, %p2875_p4 }
 0x117   : > { %p2871_p3 = pneg %p2870_p2 }
 0x119   : > { %p2878_p11 = pnand %p2877_p8, %p2871_p3 }
 0x11b   : > { %2881 = shalt.err (!%p2878_p11)
}
 0x11c   : > { %2438 = dma.hbm_to_vmem [thread:$0]  (!%p3145_p12), %s3695_s16, 80, %s570_s27, [#allocation18]  }
 0x11d   : > { %p3731_p13 = scmp.ne.s32.totalorder %s3726_s21, 0 }
 0x11e   : > { %p3732_p1 = scmp.eq.s32.totalorder (!%p3731_p13), %s3109_s28, 0 }
 0x11f   : > { %589 = sbr.rel (%p3731_p13) target bundleno = 4463 (0x116f), region = 88 }
 0x126   : > { %2927 = dma.done.wait (%p3732_p1), [#allocation3], 16   ;;  %p3733_p0 = pmov %p3732_p1 }
 0x128   : > { %2929 = vsyncadd (%p3733_p0), [#allocation3], 4294967280  ;;  %p3734_p6 = pmov %p3733_p0 }
 0x129   : > { %p3735_p5 = pmov %p3733_p0 }
 0x12a   : > { %2931 = dma.done.wait (%p3734_p6), [#allocation6], 32  }
 0x12b   : > { %2933 = vsyncadd (%p3735_p5), [#allocation6], 4294967264  ;;  %p3736_p9 = pmov %p3733_p0 }
 0x12c   : > { %p3737_p12 = pmov %p3733_p0 }
 0x12d   : > { %2935 = dma.done.wait (%p3736_p9), [#allocation9], 32  }
 0x12e   : > { %2937 = vsyncadd (%p3737_p12), [#allocation9], 4294967264  ;;  %p3738_p10 = pmov %p3733_p0 }
 0x12f   : > { %p3739_p2 = pmov %p3733_p0 }
 0x130   : > { %2939 = dma.done.wait (%p3738_p10), [#allocation12], 32  }
 0x131   : > { %2941 = vsyncadd (%p3739_p2), [#allocation12], 4294967264  ;;  %p3740_p3 = pmov %p3733_p0 }
 0x132   : > { %p3741_p4 = pmov %p3733_p0 }
 0x133   : > { %2943 = dma.done.wait (%p3740_p3), [#allocation15], 272  }
 0x134   : > { %2945 = vsyncadd (%p3741_p4), [#allocation15], 4294967024  ;;  %p3742_p7 = pmov %p3733_p0 }
 0x135   : > { %p3743_p8 = pmov %p3733_p0 }
 0x136   : > { %2947 = dma.done.wait (%p3742_p7), [#allocation18], 96  }
 0x137   : > { %2949 = vsyncadd (%p3743_p8), [#allocation18], 4294967200  ;;  %p680_p11 = scmp.lt.s32.totalorder %s3109_s28, 1  ;;  %v2983_v0 = vmov 0.0   ;;  %vm2984_vm0 = vmmov 0   ;;  %s3744_s1 = sld [smem:[#allocation36_spill]] }
 0x138   : > { %2235 = vmatprep.subr.bf16.mxu0 %v2983_v0  ;;  %2237 = vmatprep.mubr.msk.bf16.mxu0 %vm2984_vm0, %v2983_v0  ;;  %s3745_s25 = sld [smem:[#allocation37_spill]]  ;;  %vm702_vm1 = vcmask 130048   ;;  %v2138_v4 = vld [vmem:[#allocation2] ss:$0 sm:$0xff]  ;;  %vm748_vm2 = vcmask 261120   ;;  %v2527_v17 = vld [vmem:[%s3684_s5 + $0x8] sm:$0xff]  }
 0x139   : > { %s681_s21 = scalar_select %p680_p11, %s3109_s28, 1  ;;  %2241 = vmatprep.subr.bf16.mxu1 %v2983_v0  ;;  %2245 = vmatprep.mubr.msk.bf16.mxu1 %vm2984_vm0, %v2983_v0  ;;  %v2526_v16 = vld [vmem:[%s3684_s5] sm:$0xff]   ;;  %vm848_vm3 = vcmask 64512   ;;  %vm912_vm4 = vcmask 1043456  }
 0x13a   : > { %2242 = vmatpush3.bf16.msra.mxu1 %v2526_v16  ;;  %v2141_v22 = vld [vmem:[#allocation5] ss:$0 sm:$0xff]  ;;  %v2142_v24 = vld [vmem:[#allocation7] ss:$0 sm:$0xff]  ;;  %v2143_v28 = vld [vmem:[#allocation8] ss:$0 sm:$0xff] }
 0x13b   : > { %s2137_s18 = sshll.u32 %s681_s21, 3  ;;  %2243 = vmatprep.subr.bf16.mxu1 %v2983_v0  ;;  %s2985_s24 = smov 120  }
 0x13c   : > { %s2986_s3 = smov 96   ;;  %s2987_s19 = smov 88  }
 0x13d   : > { %s683_s27 = scalar_lea.vmem %s3744_s1, %s2137_s18  ;;  %s2988_s23 = smov 56  }
 0x13e   : > { %v2525_v1 = vld [vmem:[%s3745_s25] sm:$0xff]   ;;  %2244 = vmatpush3.bf16.msra.mxu1 %v2527_v17  ;;  %s2989_s21 = smov 64   ;;  %s2990_s18 = smov 80  }
 0x13f   : > { %v685_v2 = vld [vmem:[%s683_s27] sm:$0xff]  ;;  %2236 = vmatpush3.bf16.msra.mxu0 %v2525_v1  ;;  %2255 = vmatprep.subr.bf16.mxu1 %v2983_v0  ;;  %s2991_s29 = smov 112   ;;  %s2992_s30 = smov 48  }
 0x140   : > { %v688_v3 = vpack.c.bf16 %v685_v2, %v685_v2  ;;  %2249 = vmatprep.subr.bf16.mxu0 %v2983_v0  ;;  %s2993_s25 = smov 104   ;;  %s2994_s26 = smov 72  }
 0x141   : > { %s2995_s6 = smov 40   ;;  %s3747_s1 = sld [smem:[#allocation34_spill]] }
 0x142   : > { %2238 = vmatmul.mubr.msk.bf16.vlgmr.msra.gmra.mrb[0].mxu0 %vm702_vm1, %v688_v3  ;;  %s2358_s27 = smul.u32 640, %s3109_s28 }
 0x143   : > { %2251 = vmatprep.mubr.msk.bf16.mxu0 %vm2984_vm0, %v2983_v0 }
 0x147   : > { %p3750_p1 = scmp.ne.s32.totalorder %s3747_s1, 0 }
 0x215   : > { %v740_v5 = vpop.f32.mrb[0].mxu0 }
 0x216   : > { %v3436_v6 = vadd.f32 %v2138_v4, %v740_v5  ;;  %v2239_v7 = vpop.f32.mrb[1].mxu0 }
 0x217   : > { %v743_v8 = vpop.f32.mrb[2].mxu0 }
 0x218   : > { %v2240_v9 = vpop.f32.mrb[3].mxu0  ;;  %v749_v10 = vsel %vm748_vm2, %v3436_v6, 0.0 }
 0x219   : > { %750 = vadd.xlane.f32.xlu0 %v749_v10  ;;  %v956_v10 = vld [vmem:[%s3686_s7] sm:$0xf] }
 0x2a6   : > { %v751_v11 = vpop.xlane.xlu0 %750 }
 0x2a7   : > { %v753_v12 = vmul.f32 0.03125, %v751_v11  ;;  %v1120_v11 = vsel %vm912_vm4, %v956_v10, 0 }
 0x2a9   : > { %v754_v13 = vsub.f32 %v3436_v6, %v753_v12  ;;  %v1068_v12 = vld [vmem:[%s3686_s7 + $0x4] sm:$0xf] }
 0x2ab   : > { %v755_v14 = vmul.f32 %v754_v13, %v754_v13 }
 0x2ad   : > { %v756_v15 = vsel %vm748_vm2, %v755_v14, 0.0 }
 0x2ae   : > { %757 = vadd.xlane.f32.xlu0 %v756_v15 }
 0x33b   : > { %v758_v18 = vpop.xlane.xlu0 %757 }
 0x33c   : > { %v759_v19 = vmul.f32 0.03125, %v758_v18 }
 0x33e   : > { %v760_v20 = vadd.f32 1e-05, %v759_v19 }
 0x340   : > { %2552 = vrsqrt.f32 %v760_v20 }
 0x34a   : > { %v2553_v21 = vpop.eup %2552 }
 0x34b   : > { %v762_v23 = vmul.f32 %v2553_v21, %v754_v13  ;;  %v1074_v13 = vsel %vm912_vm4, %v1068_v12, 0 }
 0x34d   : > { %v769_v25 = vmul.f32 %v2141_v22, %v762_v23 }
 0x34f   : > { %v776_v26 = vadd.f32 %v2142_v24, %v769_v25 }
 0x351   : > { %v781_v27 = vpack.c.bf16 %v776_v26, %v776_v26 }
 0x353   : > { %2246 = vmatmul.mubr.msk.bf16.vlgmr.msra.gmra.mrb[0].mxu1 %vm748_vm2, %v781_v27 }
 0x354   : > { %2257 = vmatprep.mubr.msk.bf16.mxu1 %vm2984_vm0, %v2983_v0 }
 0x426   : > { %v838_v29 = vpop.f32.mrb[0].mxu1 }
 0x427   : > { %v839_v30 = vadd.f32 %v2143_v28, %v838_v29  ;;  %v2247_v31 = vpop.f32.mrb[1].mxu1 }
 0x428   : > { %v841_v32 = vpop.f32.mrb[2].mxu1 }
 0x429   : > { %v3453_v33 = vpack.c.bf16 %v839_v30, %v839_v30  ;;  %v2248_v34 = vpop.f32.mrb[3].mxu1 }
 0x42b   : > { %958 = vrot.lane.b32.xlu0 %v3453_v33, %s2985_s24  ;;  %846 = vrot.lane.b32.xlu1 %v3453_v33, %s2986_s3  ;;  %s3746_s24 = sld [smem:[#allocation29_spill]]  ;;  %s2997_s3 = smov [#allocation20]  }
 0x42f   : > { %960 = vrot.lane.b32.xlu1 %v3453_v33, %s2987_s19  ;;  %s2886_s19 = sshll.u32 %s2997_s3, 4  ;;  %s2887_s19 = int_to_ptr.vmem [resolvable:$false] %s2886_s19 }
 0x49d   : > { %v847_v35 = vpop.permute.xlu1 %846  ;;  %v959_v39 = vpop.permute.xlu0 %958 }
 0x49e   : > { %v853_v36 = vsel %vm848_vm3, %v847_v35, 0 }
 0x49f   : > { %2250 = vmatpush3.bf16.xpose.msra.mxu0 %v853_v36 }
 0x4a0   : > { %2261 = vmatprep.subr.bf16.mxu0 %v2983_v0 }
 0x4a1   : > { %v961_v37 = vpop.permute.xlu1 %960 }
 0x4a2   : > { %v966_v38 = vsel %vm848_vm3, %v961_v37, 0 }
 0x4a6   : > { %2252 = vmatmul.mubr.msk.bf16.vlgmr.msra.gmra.mrb[4].mxu0 %vm848_vm3, %v3453_v33 }
 0x4a7   : > { %2262 = vmatpush3.bf16.xpose.msra.mxu0 %v966_v38  ;;  %2263 = vmatprep.mubr.msk.bf16.mxu0 %vm2984_vm0, %v2983_v0 }
 0x4a8   : > { %2273 = vmatprep.subr.bf16.mxu0 %v2983_v0 }
 0x4ae   : > { %2264 = vmatmul.mubr.msk.bf16.vlgmr.msra.gmra.mrb[8].mxu0 %vm848_vm3, %v959_v39 }
 0x4af   : > { %2275 = vmatprep.mubr.msk.bf16.mxu0 %vm2984_vm0, %v2983_v0  ;;  %2274 = vmatpush3.bf16.msra.mxu0 %v1074_v13 }
 0x4b0   : > { %2285 = vmatprep.subr.bf16.mxu0 %v2983_v0 }
 0x579   : > { %v889_v40 = vpop.f32.mrb[4].mxu0 }
 0x57a   : > { %v2253_v41 = vpop.f32.mrb[5].mxu0  ;;  %v895_v42 = vsel %vm848_vm3, %v889_v40, -inf }
 0x57b   : > { %896 = vmax.xlane.f32.xlu1 %v895_v42  ;;  %v892_v43 = vpop.f32.mrb[6].mxu0 }
 0x57c   : > { %v2254_v44 = vpop.f32.mrb[7].mxu0 }
 0x581   : > { %v1002_v45 = vpop.f32.mrb[8].mxu0 }
 0x582   : > { %v2265_v46 = vpop.f32.mrb[9].mxu0  ;;  %v1008_v47 = vsel %vm848_vm3, %v1002_v45, -inf }
 0x583   : > { %1009 = vmax.xlane.f32.xlu0 %v1008_v47  ;;  %v1005_v48 = vpop.f32.mrb[10].mxu0 }
 0x584   : > { %v2266_v49 = vpop.f32.mrb[11].mxu0 }
 0x599   : > { %1020 = vrot.lane.b32.xlu0 %v3453_v33, %s2988_s23  ;;  %s2888_s23 = scalar_lea.vmem %s2887_s19, 1280 }
 0x608   : > { %v897_v50 = vpop.xlane.xlu1 %896 }
 0x609   : > { %v898_v51 = vsub.f32 %v889_v40, %v897_v50 }
 0x60b   : > { %v899_v52 = vmul.f32 1.442695, %v898_v51 }
 0x60d   : > { %2554 = vpow2.f32 %v899_v52 }
 0x610   : > { %v1010_v53 = vpop.xlane.xlu0 %1009 }
 0x611   : > { %v1011_v54 = vsub.f32 %v1002_v45, %v1010_v53 }
 0x613   : > { %v1012_v55 = vmul.f32 1.442695, %v1011_v54 }
 0x614   : > { %v1021_v3 = vpop.permute.xlu0 %1020 }
 0x615   : > { %2556 = vpow2.f32 %v1012_v55  ;;  %v1026_v5 = vsel %vm912_vm4, %v1021_v3, 0 }
 0x617   : > { %v2555_v56 = vpop.eup %2554 }
 0x618   : > { %v901_v57 = vsel %vm848_vm3, %v2555_v56, 0.0 }
 0x619   : > { %902 = vadd.xlane.f32.xlu1 %v901_v57 }
 0x61f   : > { %v2557_v58 = vpop.eup %2556 }
 0x620   : > { %v1014_v59 = vsel %vm848_vm3, %v2557_v58, 0.0 }
 0x621   : > { %1015 = vadd.xlane.f32.xlu1 %v1014_v59 }
 0x632   : > { %907 = vrot.lane.b32.xlu1 %v3453_v33, %s2989_s21 }
 0x636   : > { %1164 = vrot.lane.b32.xlu1 %v3453_v33, %s2990_s18  ;;  %s677_s18 = sand.u32 1, %s3746_s24  }
 0x63a   : > { %1162 = vrot.lane.b32.xlu1 %v3453_v33, %s2991_s29  ;;  %s2357_s29 = smul.u32 40, %s677_s18 }
 0x63c   : > { %s679_s17 = scalar_lea.vmem [#allocation20], %s2357_s29 }
 0x63d   : > { %s1945_s22 = sshll.u32 %s679_s17, 4  ;;  %s3637_s22 = int_to_ptr.vmem [resolvable:$true] %s1945_s22 }
 0x63e   : > { %s2882_s28 = scalar_lea.vmem %s3637_s22, 640  ;;  %p2889_p5 = scmp.lt.s32.totalorder %s3637_s22, %s2887_s19 }
 0x63f   : > { %p2883_p13 = scmp.ne.s32.totalorder %s3637_s22, %s2882_s28  ;;  %p2890_p9 = scmp.lt.s32.totalorder %s2888_s23, %s2882_s28 }
 0x641   : > { %p2884_p0 = pnand %p2883_p13, %p3750_p1  ;;  %p2891_p12 = por %p2890_p9, %p2889_p5 }
 0x643   : > { %p2885_p6 = pneg %p2884_p0 }
 0x645   : > { %p2892_p10 = pnand %p2891_p12, %p2885_p6 }
 0x6a6   : > { %v903_v60 = vpop.xlane.xlu1 %902 }
 0x6a7   : > { %2558 = vrcp.f32 %v903_v60 }
 0x6ae   : > { %v1016_v61 = vpop.xlane.xlu1 %1015 }
 0x6af   : > { %2560 = vrcp.f32 %v1016_v61 }
 0x6b1   : > { %v2559_v62 = vpop.eup %2558 }
 0x6b2   : > { %v905_v63 = vmul.f32 %v2559_v62, %v2555_v56  ;;  %v908_v1 = vpop.permute.xlu1 %907  ;;  %v1272_v56 = vld [vmem:[%s3686_s7 + $0x8] sm:$0xf] }
 0x6b3   : > { %v914_v2 = vsel %vm912_vm4, %v908_v1, 0  ;;  %v1278_v57 = vsel %vm912_vm4, %v1272_v56, 0  ;;  %v2532_v56 = vld [vmem:[%s3692_s13 + $0x10] sm:$0xff]  }
 0x6b4   : > { %2256 = vmatpush3.bf16.msra.mxu1 %v914_v2  ;;  %v906_v4 = vpack.c.bf16 %v905_v63, %v905_v63 }
 0x6b5   : > { %2267 = vmatprep.subr.bf16.mxu1 %v2983_v0 }
 0x6b6   : > { %v1165_v19 = vpop.permute.xlu1 %1164 }
 0x6b7   : > { %2258 = vmatmul.mubr.msk.bf16.vlgmr.msra.gmra.mrb[4].mxu1 %vm848_vm3, %v906_v4  ;;  %v1170_v24 = vsel %vm848_vm3, %v1165_v19, 0 }
 0x6b8   : > { %2268 = vmatpush3.bf16.msra.mxu1 %v1026_v5  ;;  %2269 = vmatprep.mubr.msk.bf16.mxu1 %vm2984_vm0, %v2983_v0 }
 0x6b9   : > { %v2561_v7 = vpop.eup %2560  ;;  %2279 = vmatprep.subr.bf16.mxu1 %v2983_v0 }
 0x6ba   : > { %v1018_v8 = vmul.f32 %v2561_v7, %v2557_v58  ;;  %v1163_v26 = vpop.permute.xlu1 %1162 }
 0x6bc   : > { %v1019_v9 = vpack.c.bf16 %v1018_v8, %v1018_v8 }
 0x6bf   : > { %2270 = vmatmul.mubr.msk.bf16.vlgmr.msra.gmra.mrb[8].mxu1 %vm848_vm3, %v1019_v9 }
 0x6c0   : > { %2281 = vmatprep.mubr.msk.bf16.mxu1 %vm2984_vm0, %v2983_v0  ;;  %2280 = vmatpush3.bf16.msra.mxu1 %v1120_v11 }
 0x6c1   : > { %2291 = vmatprep.subr.bf16.mxu1 %v2983_v0 }
 0x78a   : > { %v950_v14 = vpop.f32.mrb[4].mxu1 }
 0x78b   : > { %v957_v15 = vpack.c.bf16 %v950_v14, %v950_v14  ;;  %v2259_v16 = vpop.f32.mrb[5].mxu1 }
 0x78c   : > { %v953_v17 = vpop.f32.mrb[6].mxu1 }
 0x78d   : > { %v2260_v18 = vpop.f32.mrb[7].mxu1  ;;  %2282 = vmatmul.mubr.msk.bf16.vlgmr.msra.gmra.mrb[12].mxu1 %vm848_vm3, %v957_v15 }
 0x78e   : > { %2293 = vmatprep.mubr.msk.bf16.mxu1 %vm2984_vm0, %v2983_v0 }
 0x792   : > { %v1062_v20 = vpop.f32.mrb[8].mxu1 }
 0x793   : > { %v1069_v21 = vpack.c.bf16 %v1062_v20, %v1062_v20  ;;  %v2271_v22 = vpop.f32.mrb[9].mxu1 }
 0x794   : > { %v1065_v23 = vpop.f32.mrb[10].mxu1 }
 0x795   : > { %v2272_v25 = vpop.f32.mrb[11].mxu1  ;;  %2276 = vmatmul.mubr.msk.bf16.vlgmr.msra.gmra.mrb[12].mxu0 %vm848_vm3, %v1069_v21 }
 0x796   : > { %2286 = vmatpush3.bf16.xpose.msra.mxu0 %v1170_v24  ;;  %2287 = vmatprep.mubr.msk.bf16.mxu0 %vm2984_vm0, %v2983_v0 }
 0x797   : > { %2297 = vmatprep.subr.bf16.mxu0 %v2983_v0 }
 0x79d   : > { %2288 = vmatmul.mubr.msk.bf16.vlgmr.msra.gmra.mrb[16].mxu0 %vm848_vm3, %v1163_v26 }
 0x79e   : > { %2299 = vmatprep.mubr.msk.bf16.mxu0 %vm2984_vm0, %v2983_v0  ;;  %2298 = vmatpush3.bf16.msra.mxu0 %v1278_v57  ;;  %v2533_v57 = vld [vmem:[%s3692_s13 + $0x18] sm:$0xff]  }
 0x79f   : > { %2309 = vmatprep.subr.bf16.mxu0 %v2983_v0 }
 0x860   : > { %v1156_v27 = vpop.f32.mrb[12].mxu1 }
 0x861   : > { %v2283_v28 = vpop.f32.mrb[13].mxu1 }
 0x862   : > { %v1159_v29 = vpop.f32.mrb[14].mxu1 }
 0x863   : > { %v2284_v30 = vpop.f32.mrb[15].mxu1 }
 0x868   : > { %v1110_v31 = vpop.f32.mrb[12].mxu0 }
 0x869   : > { %v3508_v32 = vadd.f32 %v1156_v27, %v1110_v31  ;;  %v2277_v34 = vpop.f32.mrb[13].mxu0  ;;  %v2159_v31 = vld [vmem:[#allocation10] ss:$0 sm:$0xff] }
 0x86a   : > { %v1113_v35 = vpop.f32.mrb[14].mxu0 }
 0x86b   : > { %v2278_v36 = vpop.f32.mrb[15].mxu0 }
 0x870   : > { %v1206_v37 = vpop.f32.mrb[16].mxu0 }
 0x871   : > { %v2289_v38 = vpop.f32.mrb[17].mxu0  ;;  %v1212_v39 = vsel %vm848_vm3, %v1206_v37, -inf }
 0x872   : > { %1213 = vmax.xlane.f32.xlu1 %v1212_v39  ;;  %v1209_v40 = vpop.f32.mrb[18].mxu0 }
 0x873   : > { %v2290_v41 = vpop.f32.mrb[19].mxu0 }
 0x883   : > { %1224 = vrot.lane.b32.xlu1 %v3453_v33, %s2992_s30 }
 0x887   : > { %1321 = vrot.lane.b32.xlu1 %v3453_v33, %s2993_s25 }
 0x8ff   : > { %v1214_v42 = vpop.xlane.xlu1 %1213 }
 0x900   : > { %v1215_v43 = vsub.f32 %v1206_v37, %v1214_v42 }
 0x902   : > { %v1216_v44 = vmul.f32 1.442695, %v1215_v43  ;;  %v2528_v43 = vld [vmem:[#allocation14] sm:$0xff]  }
 0x903   : > { %v1225_v45 = vpop.permute.xlu1 %1224 }
 0x904   : > { %2562 = vpow2.f32 %v1216_v44  ;;  %v1230_v46 = vsel %vm912_vm4, %v1225_v45, 0  ;;  %v2529_v44 = vld [vmem:[#allocation14 + $0x8] sm:$0xff]  }
 0x905   : > { %2292 = vmatpush3.bf16.msra.mxu1 %v1230_v46 }
 0x906   : > { %2303 = vmatprep.subr.bf16.mxu1 %v2983_v0 }
 0x907   : > { %v1322_v55 = vpop.permute.xlu1 %1321 }
 0x90e   : > { %v2563_v47 = vpop.eup %2562 }
 0x90f   : > { %v1218_v48 = vsel %vm848_vm3, %v2563_v47, 0.0 }
 0x910   : > { %1219 = vadd.xlane.f32.xlu0 %v1218_v48 }
 0x926   : > { %1323 = vrot.lane.b32.xlu0 %v3453_v33, %s2994_s26  ;;  %s3748_s26 = sld [smem:[#allocation40_spill]] }
 0x92c   : > { %s3749_s20 = smov %s3748_s26  ;;  %s3635_s0 = scalar_lea.hbm %s3748_s26, %s2358_s27 }
 0x99d   : > { %v1220_v49 = vpop.xlane.xlu0 %1219 }
 0x99e   : > { %2564 = vrcp.f32 %v1220_v49  ;;  %v2160_v49 = vld [vmem:[#allocation11] ss:$0 sm:$0xff] }
 0x9a1   : > { %v1324_v52 = vpop.permute.xlu0 %1323 }
 0x9a2   : > { %v1329_v54 = vsel %vm848_vm3, %v1324_v52, 0 }
 0x9a8   : > { %v2565_v50 = vpop.eup %2564 }
 0x9a9   : > { %v1222_v51 = vmul.f32 %v2565_v50, %v2563_v47 }
 0x9ab   : > { %v1223_v53 = vpack.c.bf16 %v1222_v51, %v1222_v51  ;;  %v2161_v51 = vld [vmem:[#allocation13] ss:$0 sm:$0xff] }
 0x9ad   : > { %2294 = vmatmul.mubr.msk.bf16.vlgmr.msra.gmra.mrb[16].mxu1 %vm848_vm3, %v1223_v53 }
 0x9ae   : > { %2304 = vmatpush3.bf16.xpose.msra.mxu1 %v1329_v54  ;;  %2305 = vmatprep.mubr.msk.bf16.mxu1 %vm2984_vm0, %v2983_v0 }
 0x9af   : > { %2315 = vmatprep.subr.bf16.mxu1 %v2983_v0 }
 0x9b5   : > { %2306 = vmatmul.mubr.msk.bf16.vlgmr.msra.gmra.mrb[20].mxu1 %vm848_vm3, %v1322_v55  ;;  %v2531_v55 = vld [vmem:[%s3692_s13 + $0x8] sm:$0xff]  }
 0x9b6   : > { %2317 = vmatprep.mubr.msk.bf16.mxu1 %vm2984_vm0, %v2983_v0 }
 0xa80   : > { %v1266_v58 = vpop.f32.mrb[16].mxu1 }
 0xa81   : > { %v1273_v59 = vpack.c.bf16 %v1266_v58, %v1266_v58  ;;  %v2295_v60 = vpop.f32.mrb[17].mxu1  ;;  %v2534_v58 = vld [vmem:[%s3692_s13 + $0x20] sm:$0xff]  }
 0xa82   : > { %v1269_v61 = vpop.f32.mrb[18].mxu1  ;;  %v2536_v60 = vld [vmem:[%s3692_s13 + $0x30] sm:$0xff]  }
 0xa83   : > { %v2296_v62 = vpop.f32.mrb[19].mxu1  ;;  %2300 = vmatmul.mubr.msk.bf16.vlgmr.msra.gmra.mrb[20].mxu0 %vm848_vm3, %v1273_v59  ;;  %v2535_v59 = vld [vmem:[%s3692_s13 + $0x28] sm:$0xff]   ;;  %v2537_v61 = vld [vmem:[%s3692_s13 + $0x38] sm:$0xff]  }
 0xa84   : > { %2311 = vmatprep.mubr.msk.bf16.mxu0 %vm2984_vm0, %v2983_v0  ;;  %v2538_v62 = vld [vmem:[%s3694_s15] ss:$20 sps:$4 sm:$0xff]  }
 0xa88   : > { %v1365_v63 = vpop.f32.mrb[20].mxu1 }
 0xa89   : > { %v2307_v1 = vpop.f32.mrb[21].mxu1  ;;  %v1371_v2 = vsel %vm848_vm3, %v1365_v63, -inf }
 0xa8a   : > { %1372 = vmax.xlane.f32.xlu1 %v1371_v2  ;;  %v1368_v3 = vpop.f32.mrb[22].mxu1  ;;  %v2162_v1 = vld [vmem:[#allocation16] ss:$0 sm:$0xff] }
 0xa8b   : > { %v2308_v4 = vpop.f32.mrb[23].mxu1 }
 0xb17   : > { %v1373_v5 = vpop.xlane.xlu1 %1372 }
 0xb18   : > { %v1374_v7 = vsub.f32 %v1365_v63, %v1373_v5  ;;  %v2540_v63 = vld [vmem:[%s3694_s15 + $0x4] ss:$20 sps:$4 sm:$0xff]  }
 0xb1a   : > { %v1375_v8 = vmul.f32 1.442695, %v1374_v7 }
 0xb1c   : > { %2566 = vpow2.f32 %v1375_v8 }
 0xb26   : > { %v2567_v9 = vpop.eup %2566 }
 0xb27   : > { %v1377_v10 = vsel %vm848_vm3, %v2567_v9, 0.0 }
 0xb28   : > { %1378 = vadd.xlane.f32.xlu0 %v1377_v10 }
 0xb3e   : > { %1383 = vrot.lane.b32.xlu0 %v3453_v33, %s2995_s6  ;;  %v1431_v33 = vld [vmem:[%s3686_s7 + $0xc] sm:$0xf]  ;;  %s1931_s6 = scalar_lea.sflag [#allocation4], %s677_s18 }
 0xb3f   : > { %v1437_v22 = vsel %vm912_vm4, %v1431_v33, 0 }
 0xb40   : > { %2316 = vmatpush3.bf16.msra.mxu1 %v1437_v22  ;;  %v2174_v22 = vld [vmem:[#allocation17] ss:$0 sm:$0xff] }
 0xb41   : > { %2329 = vmatprep.subr.bf16.mxu1 %v2983_v0 }
 0xb56   : > { %v1314_v11 = vpop.f32.mrb[20].mxu0 }
 0xb57   : > { %v1320_v12 = vadd.f32 %v1314_v11, %v3508_v32  ;;  %v2301_v13 = vpop.f32.mrb[21].mxu0 }
 0xb58   : > { %v1317_v14 = vpop.f32.mrb[22].mxu0 }
 0xb59   : > { %v2302_v15 = vpop.f32.mrb[23].mxu0 }
 0xbb5   : > { %v1379_v16 = vpop.xlane.xlu0 %1378 }
 0xbb6   : > { %2568 = vrcp.f32 %v1379_v16 }
 0xbb9   : > { %v1384_v17 = vpop.permute.xlu0 %1383 }
 0xbba   : > { %v1389_v18 = vsel %vm912_vm4, %v1384_v17, 0 }
 0xbbb   : > { %2310 = vmatpush3.bf16.msra.mxu0 %v1389_v18  ;;  %v2543_v18 = vld [vmem:[%s3694_s15 + $0x2c] ss:$20 sps:$4 sm:$0xff]  }
 0xbbc   : > { %2321 = vmatprep.subr.bf16.mxu0 %v2983_v0 }
 0xbc0   : > { %v2569_v19 = vpop.eup %2568 }
 0xbc1   : > { %v1381_v20 = vmul.f32 %v2569_v19, %v2567_v9  ;;  %v2541_v19 = vld [vmem:[%s3694_s15 + $0x28] ss:$20 sps:$4 sm:$0xff]  }
 0xbc3   : > { %v1382_v21 = vpack.c.bf16 %v1381_v20, %v1381_v20  ;;  %v2996_v20 = vmov 0  }
 0xbc5   : > { %2312 = vmatmul.mubr.msk.bf16.vlgmr.msra.gmra.mrb[24].mxu0 %vm848_vm3, %v1382_v21  ;;  %v2546_v21 = vld [vmem:[%s3694_s15 + $0xc] ss:$20 sps:$4 sm:$0xff]  }
 0xbc6   : > { %2325 = vmatprep.mubr.msk.bf16.mxu0 %vm2984_vm0, %v2983_v0  ;;  %2322 = vmatpush3.bf16.msra.mxu0 %v2528_v43 }
 0xbc7   : > { %2323 = vmatprep.subr.bf16.mxu0 %v2983_v0 }
 0xbca   : > { %2324 = vmatpush3.bf16.msra.mxu0 %v2529_v44 }
 0xbcb   : > { %1803 = vmatprep.subr.bf16.mxu0 %v2540_v63 }
 0xc98   : > { %v1425_v23 = vpop.f32.mrb[24].mxu0 }
 0xc99   : > { %v1432_v24 = vpack.c.bf16 %v1425_v23, %v1425_v23  ;;  %v2313_v25 = vpop.f32.mrb[25].mxu0 }
 0xc9a   : > { %v1428_v26 = vpop.f32.mrb[26].mxu0 }
 0xc9b   : > { %v2314_v27 = vpop.f32.mrb[27].mxu0  ;;  %2318 = vmatmul.mubr.msk.bf16.vlgmr.msra.gmra.mrb[24].mxu1 %vm848_vm3, %v1432_v24 }
 0xc9c   : > { %2345 = vmatprep.mubr.msk.bf16.mxu1 %vm2984_vm0, %v2983_v0 }
 0xd6e   : > { %v1473_v28 = vpop.f32.mrb[24].mxu1 }
 0xd6f   : > { %v1479_v29 = vadd.f32 %v1473_v28, %v1320_v12  ;;  %v2319_v30 = vpop.f32.mrb[25].mxu1  ;;  %v2544_v28 = vld [vmem:[%s3694_s15 + $0x8] ss:$20 sps:$4 sm:$0xff]  }
 0xd70   : > { %v1476_v32 = vpop.f32.mrb[26].mxu1  ;;  %v2549_v30 = vld [vmem:[%s3694_s15 + $0x34] ss:$20 sps:$4 sm:$0xff]  }
 0xd71   : > { %v1480_v34 = vadd.f32 %v1479_v29, %v3436_v6  ;;  %v2320_v35 = vpop.f32.mrb[27].mxu1  ;;  %v2530_v6 = vld [vmem:[%s3692_s13] sm:$0xff]  }
 0xd72   : > { %2330 = vmatpush3.bf16.msra.mxu1 %v2530_v6  ;;  %v2550_v32 = vld [vmem:[%s3694_s15 + $0x10] ss:$20 sps:$4 sm:$0xff]   ;;  %v1723_v35 = vlaneseq }
 0xd73   : > { %v3551_v36 = vadd.f32 %v2159_v31, %v1480_v34  ;;  %2331 = vmatprep.subr.bf16.mxu1 %v2983_v0  ;;  %v2547_v31 = vld [vmem:[%s3694_s15 + $0x30] ss:$20 sps:$4 sm:$0xff]   ;;  %v2551_v34 = vld [vmem:[%s3694_s15 + $0x38] ss:$20 sps:$4 sm:$0xff]  }
 0xd75   : > { %v1491_v37 = vsel %vm748_vm2, %v3551_v36, 0.0 }
 0xd76   : > { %1492 = vadd.xlane.f32.xlu1 %v1491_v37  ;;  %2332 = vmatpush3.bf16.msra.mxu1 %v2531_v55 }
 0xd77   : > { %2333 = vmatprep.subr.bf16.mxu1 %v2983_v0 }
 0xd7a   : > { %2334 = vmatpush3.bf16.msra.mxu1 %v2532_v56 }
 0xd7b   : > { %2335 = vmatprep.subr.bf16.mxu1 %v2983_v0 }
 0xd7e   : > { %2336 = vmatpush3.bf16.msra.mxu1 %v2533_v57 }
 0xd7f   : > { %2337 = vmatprep.subr.bf16.mxu1 %v2983_v0 }
 0xd82   : > { %2338 = vmatpush3.bf16.msra.mxu1 %v2534_v58 }
 0xd83   : > { %2339 = vmatprep.subr.bf16.mxu1 %v2983_v0 }
 0xd86   : > { %2340 = vmatpush3.bf16.msra.mxu1 %v2535_v59 }
 0xd87   : > { %2341 = vmatprep.subr.bf16.mxu1 %v2983_v0 }
 0xd8a   : > { %2342 = vmatpush3.bf16.msra.mxu1 %v2536_v60 }
 0xd8b   : > { %2343 = vmatprep.subr.bf16.mxu1 %v2983_v0 }
 0xd8e   : > { %2344 = vmatpush3.bf16.msra.mxu1 %v2537_v61 }
 0xe03   : > { %v1493_v38 = vpop.xlane.xlu1 %1492 }
 0xe04   : > { %v1494_v39 = vmul.f32 0.03125, %v1493_v38  ;;  %v1721_v38 = vld [vmem:[#allocation19] sm:$0x1f] }
 0xe06   : > { %v1495_v40 = vsub.f32 %v3551_v36, %v1494_v39 }
 0xe08   : > { %v1496_v41 = vmul.f32 %v1495_v40, %v1495_v40 }
 0xe0a   : > { %v1497_v42 = vsel %vm748_vm2, %v1496_v41, 0.0 }
 0xe0b   : > { %1498 = vadd.xlane.f32.xlu1 %v1497_v42 }
 0xe98   : > { %v1499_v45 = vpop.xlane.xlu1 %1498 }
 0xe99   : > { %v1500_v46 = vmul.f32 0.03125, %v1499_v45 }
 0xe9b   : > { %v1501_v47 = vadd.f32 1e-05, %v1500_v46 }
 0xe9d   : > { %2570 = vrsqrt.f32 %v1501_v47 }
 0xea7   : > { %v2571_v48 = vpop.eup %2570 }
 0xea8   : > { %v1503_v50 = vmul.f32 %v2571_v48, %v1495_v40 }
 0xeaa   : > { %v1510_v52 = vmul.f32 %v2160_v49, %v1503_v50 }
 0xeac   : > { %v1517_v53 = vadd.f32 %v2161_v51, %v1510_v52 }
 0xeae   : > { %v1522_v54 = vpack.c.bf16 %v1517_v53, %v1517_v53 }
 0xeb0   : > { %2326 = vmatmul.mubr.msk.bf16.vlgmr.msra.gmra.mrb[28].mxu0 %vm748_vm2, %v1522_v54 }
 0xeb1   : > { %1804 = vmatpush1.bf16.msra.mxu0 %v2538_v62  ;;  %1835 = vmatprep.mubr.bf16.mxu0 %v2996_v20 }
 0xeb2   : > { %1805 = vmatprep.subr.bf16.mxu0 %v2543_v18 }
 0xeb5   : > { %1806 = vmatpush1.bf16.msra.mxu0 %v2541_v19 }
 0xeb6   : > { %1844 = vmatprep.subr.bf16.mxu0 %v2546_v21 }
 0xf83   : > { %v1579_v2 = vpop.f32.mrb[28].mxu0 }
 0xf84   : > { %v1580_v3 = vadd.f32 %v2162_v1, %v1579_v2  ;;  %v2327_v4 = vpop.f32.mrb[29].mxu0 }
 0xf85   : > { %v1582_v5 = vpop.f32.mrb[30].mxu0 }
 0xf86   : > { %v1586_v7 = vmul.f32 0.044715, %v1580_v3  ;;  %v2328_v8 = vpop.f32.mrb[31].mxu0  ;;  %v1585_v14 = vmul.f32 0.5, %v1580_v3 }
 0xf88   : > { %v1587_v9 = vmul.f32 %v1586_v7, %v1580_v3 }
 0xf8a   : > { %v1588_v10 = vmul.f32 %v1587_v9, %v1580_v3 }
 0xf8c   : > { %v1589_v11 = vadd.f32 %v1588_v10, %v1580_v3 }
 0xf8e   : > { %v1590_v12 = vmul.f32 0.7978846, %v1589_v11 }
 0xf90   : > { %2572 = vtanh.f32 %v1590_v12 }
 0xf9a   : > { %v2573_v13 = vpop.eup %2572 }
 0xf9b   : > { %v1592_v15 = vadd.f32 1.0, %v2573_v13 }
 0xf9d   : > { %v1593_v16 = vmul.f32 %v1592_v15, %v1585_v14 }
 0xf9f   : > { %v1610_v17 = vpack.c.bf16 %v1593_v16, %v1593_v16 }
 0xfa1   : > { %2346 = vmatmul.mubr.bf16.vlgmr.msra.gmra.mrb[28].mxu1 %v1610_v17 }
0x1074   : > { %v1693_v33 = vpop.f32.mrb[28].mxu1 }
0x1075   : > { %v1699_v23 = vadd.f32 %v1693_v33, %v3551_v36  ;;  %v2347_v24 = vpop.f32.mrb[29].mxu1  ;;  %v1724_v36 = vshrl.u32 %v1723_v35, 7 }
0x1076   : > { %v1696_v25 = vpop.f32.mrb[30].mxu1 }
0x1077   : > { %v1707_v26 = vadd.f32 %v2174_v22, %v1699_v23  ;;  %v2348_v27 = vpop.f32.mrb[31].mxu1  ;;  %v1725_v37 = vsub.s32 0, %v1724_v36  ;;  %v1729_v39 = vsub.s32 1, %v1724_v36  ;;  %v1733_v6 = vsub.s32 2, %v1724_v36 }
0x1078   : > { %v1741_v53 = vsub.s32 4, %v1724_v36 }
0x1079   : > { %v1720_v29 = vpack.c.bf16 %v1707_v26, %v1707_v26  ;;  %v1726_v40 = vrot.slane %v1721_v38, %v1725_v37  ;;  %v1730_v41 = vrot.slane %v1721_v38, %v1729_v39  ;;  %v1734_v48 = vrot.slane %v1721_v38, %v1733_v6 }
0x107a   : > { %v1742_v57 = vrot.slane %v1721_v38, %v1741_v53 }
0x107b   : > { %2185 = vmatmul.mubr.msk.bf16.vlgmr.msra.gmra.mrb[32].mxu0 %vm748_vm2, %v1720_v29 }
0x107c   : > { %1845 = vmatpush1.bf16.msra.mxu0 %v2544_v28  ;;  %1876 = vmatprep.mubr.bf16.mxu0 %v2996_v20 }
0x107d   : > { %1846 = vmatprep.subr.bf16.mxu0 %v2549_v30 }
0x1080   : > { %1847 = vmatpush1.bf16.msra.mxu0 %v2547_v31 }
0x1081   : > { %2349 = vmatprep.subr.bf16.mxu0 %v2983_v0 }
0x1083   : > { %2186 = vmatmul.mubr.msk.bf16.vlgmr.msra.gmra.mrb[36].mxu0 %vm748_vm2, %v1720_v29 }
0x1084   : > { %2350 = vmatpush3.bf16.msra.mxu0 %v2550_v32  ;;  %2353 = vmatprep.mubr.msk.bf16.mxu0 %vm2984_vm0, %v2983_v0 }
0x1085   : > { %2351 = vmatprep.subr.bf16.mxu0 %v2983_v0  ;;  %v1737_v0 = vsub.s32 3, %v1724_v36 }
0x1087   : > { %v1738_v49 = vrot.slane %v1721_v38, %v1737_v0 }
0x1088   : > { %2352 = vmatpush3.bf16.msra.mxu0 %v2551_v34 }
0x108b   : > { %2354 = vmatmul.mubr.msk.bf16.vlgmr.msra.gmra.mrb[40].mxu0 %vm748_vm2, %v1720_v29 }
0x114e   : > { %v1837_v42 = vpop.f32.mrb[32].mxu0 }
0x114f   : > { %v1838_v43 = vadd.f32 %v1837_v42, %v1726_v40  ;;  %v1839_v44 = vpop.f32.mrb[33].mxu0 }
0x1150   : > { %v1840_v45 = vadd.f32 %v1839_v44, %v1730_v41  ;;  %v1841_v46 = vpop.f32.mrb[34].mxu0 }
0x1151   : > { %1925 = vst [vmem:[%s679_s17] sm:$0xff] %v1838_v43  ;;  %v1842_v47 = vpop.f32.mrb[35].mxu0 }
0x1152   : > { %1926 = vst [vmem:[%s679_s17 + $0x8] sm:$0xff] %v1840_v45 }
0x1156   : > { %v1878_v50 = vpop.f32.mrb[36].mxu0 }
0x1157   : > { %v1879_v51 = vadd.f32 %v1878_v50, %v1734_v48  ;;  %v1880_v52 = vpop.f32.mrb[37].mxu0 }
0x1158   : > { %v1881_v54 = vadd.f32 %v1880_v52, %v1738_v49  ;;  %v1882_v55 = vpop.f32.mrb[38].mxu0 }
0x1159   : > { %1927 = vst [vmem:[%s679_s17 + $0x10] sm:$0xff] %v1879_v51  ;;  %v1883_v56 = vpop.f32.mrb[39].mxu0 }
0x115a   : > { %1928 = vst [vmem:[%s679_s17 + $0x18] sm:$0xff] %v1881_v54 }
0x115e   : > { %v1919_v58 = vpop.f32.mrb[40].mxu0 }
0x115f   : > { %v1920_v59 = vadd.f32 %v1919_v58, %v1742_v57  ;;  %v2355_v60 = vpop.f32.mrb[41].mxu0 }
0x1160   : > { %v1922_v61 = vpop.f32.mrb[42].mxu0 }
0x1161   : > { %1929 = vst [vmem:[%s679_s17 + $0x20] sm:$0xff] %v1920_v59  ;;  %v2356_v62 = vpop.f32.mrb[43].mxu0 }
0x1162   : > { %2895 = shalt.err (!%p2892_p10)
}
0x1163   : > { %s2896_s24 = scalar_lea.hbm %s3635_s0, 640  ;;  %s2900_s29 = scalar_lea.hbm %s3749_s20, 1280 }
0x1164   : > { %p2897_p2 = scmp.ne.s32.totalorder %s3635_s0, %s2896_s24  ;;  %p2901_p7 = scmp.lt.u32.totalorder %s3635_s0, %s3749_s20 }
0x1165   : > { %p2902_p8 = scmp.lt.u32.totalorder %s2900_s29, %s2896_s24  ;;  %p2904_p13 = scmp.lt.u32.totalorder %s2896_s24, %s3635_s0 }
0x1166   : > { %p2898_p3 = pnand %p2897_p2, %p3750_p1 }
0x1167   : > { %p2903_p11 = por %p2902_p8, %p2901_p7 }
0x1168   : > { %p2899_p4 = pneg %p2898_p3 }
0x1169   : > { %p2905_p0 = por %p2904_p13, %p2903_p11 }
0x116b   : > { %p2906_p6 = pnand %p2905_p0, %p2899_p4 }
0x116d   : > { %2909 = shalt.err (!%p2906_p6)
}
0x116e   : > { %2403 = dma.vmem_to_hbm [thread:$0]  (%p3750_p1), %s3637_s22, 640, %s3635_s0, %s1931_s6  }
0x116f PF: > { %s3751_s30 = sld [smem:[#allocation31_spill]]  ;;  %s3752_s25 = sld [smem:[#allocation28_spill]] }
0x1170   : > { %s3753_s26 = sld [smem:[#allocation35_spill]] }
0x1175   : > { %p2465_p5 = scmp.ge.s32.totalorder %s3751_s30, 2  ;;  %s1957_s28 = sand.u32 1, %s3752_s25  }
0x1176   : > { %p3754_p9 = scmp.ne.s32.totalorder %s3753_s26, 0  ;;  %s1958_s3 = scalar_lea.sflag [#allocation4], %s1957_s28 }
0x1178   : > { %p2440_p12 = pnand %p2465_p5, %p3754_p9 }
0x117a   : > { %2951 = dma.done.wait (!%p2440_p12), %s1958_s3, 640  }
0x117b   : > { %2953 = vsyncadd (!%p2440_p12), %s1958_s3, 4294966656  ;;  %s3755_s27 = sld [smem:[#allocation32_spill]]  ;;  %s3756_s24 = sld [smem:[#allocation29_spill]] }
0x117c   : > { %s3757_s25 = sld [smem:[#allocation30_spill]]  ;;  %s3758_s26 = sld [smem:[#allocation33_spill]] }
0x1181   : > { %p33_p10 = scmp.ge.s32.totalorder %s3755_s27, 4  }
0x1183   :  { %35 = sbr.rel (!%p33_p10) target bundleno = 15 (0xf), region = 168 }
0x118a   :  { %1963 = vsyncpa [#allocation3], 1 }
0x118b   :  { %1965 = vsyncpa [#allocation3 + $0x1], 1 }
0x118c   :  { %1966 = vsyncpa [#allocation6], 1 }
0x118d   :  { %1967 = vsyncpa [#allocation9], 1 }
0x118e   :  { %1968 = vsyncpa [#allocation12], 1 }
0x118f   :  { %1969 = vsyncpa [#allocation15], 1 }
0x1190   :  { %1970 = vsyncpa [#allocation18], 1 }
0x1191   :  { %1971 = vsyncpa [#allocation4], 1 }
0x1192   :  { %1973 = vsyncpa [#allocation4 + $0x1], 1 }

</bundles_post_ra>
